<compile_context>
chip_gen: v7x
topology: tpu7x:2x2x1
jax: 0.10.0
libtpu: 0.0.40
codegen_flags: <defaults>
</compile_context>

<pallas_src>
import jax
import jax.numpy as jnp
import numpy as np
from jax import lax
from jax.experimental import pallas as pl
from jax.experimental.pallas import tpu as pltpu

HIDDEN = 256    # TemporalModule hidden_dim
FC1 = 128       # fc1 output width
FEATURES = 32   # features_dim (LSTM input size)
SEQ = 10        # "10 consecutive frames"
BATCH = 4
SUBLANE = 8     # f32 sublane tile


def critic_kernel(xf_ref, wih_ref, whh_ref, b_ref, w1_ref, b1_ref, w2_ref, b2_ref,
                  out_ref, gates_ref):
    """Full LSTM recurrence + MLP head for one (small, batch-padded) batch.

    xf_ref:    (T*Bp, D)  time-major, batch-padded inputs (f32)
    wih_ref:   (D, 4H)    input->gates weights, pre-transposed, gate cols (i,f,o,g) (bf16)
    whh_ref:   (H, 4H)    hidden->gates weights, pre-transposed, gate cols (i,f,o,g) (bf16)
    b_ref:     (1, 4H)    combined bias b_ih + b_hh, gate cols (i,f,o,g) (f32)
    w1_ref:    (H, 128) bf16,  b1_ref: (1, 128) f32
    w2_ref:    (1, 128) f32 (fc2 weight row),  b2_ref: (1, 1) f32
    out_ref:   (Bp, 1)    value estimates (f32)
    gates_ref: (T*Bp, 4H) VMEM scratch holding the hoisted input projection (f32)
    """
    H = whh_ref.shape[0]
    Bp = out_ref.shape[0]
    T = xf_ref.shape[0] // Bp

    # ---- Hoisted input projection + bias: ONE MXU call for all timesteps. ----
    gates_ref[...] = (
        jnp.dot(xf_ref[...].astype(jnp.bfloat16), wih_ref[...],
                preferred_element_type=jnp.float32)
        + b_ref[...])

    # TODO(synk): on v6e/v7x, W_hh (4 bf16 tiles of 256x256) could be staged once
    # in MXU weight registers (pltpu.matmul_push_rhs before the loop,
    # matmul_acc_lhs/matmul_pop inside) to avoid re-streaming 512 KB per step.
    # Skipped: v5e's 4x128^2 MXU cannot stage all 16 tiles, and the portable
    # jnp.dot path is guaranteed to lower cleanly on every generation.

    # ---- Serial recurrence: h/c carried in vregs, fully unrolled (T static). ----
    def step(t, carry):
        h, c = carry
        row = pl.multiple_of(t * Bp, SUBLANE)
        g_x = gates_ref[pl.ds(row, Bp), :]                     # (Bp, 4H) aligned slice
        gates = g_x + jnp.dot(h.astype(jnp.bfloat16), whh_ref[...],
                              preferred_element_type=jnp.float32)
        # Packed gate order (i, f, o, g): sigmoid gates are one contiguous slab.
        # sigmoid(x) = 0.5*tanh(0.5*x) + 0.5  -> one EUP op per vreg (vs exp+div).
        sfo = 0.5 * jnp.tanh(0.5 * gates[:, 0:3 * H]) + 0.5     # i, f, o sigmoids
        g = jnp.tanh(gates[:, 3 * H:4 * H])                     # cell candidate
        i = sfo[:, 0:H]
        f = sfo[:, H:2 * H]
        o = sfo[:, 2 * H:3 * H]
        c_new = f * c + i * g
        h_new = o * jnp.tanh(c_new)
        return h_new, c_new

    h0 = jnp.zeros((Bp, H), jnp.float32)
    c0 = jnp.zeros((Bp, H), jnp.float32)
    h_last, _ = lax.fori_loop(0, T, step, (h0, c0), unroll=True)

    # ---- MLP head on the last hidden state. ----
    hid = jnp.dot(h_last.astype(jnp.bfloat16), w1_ref[...],
                  preferred_element_type=jnp.float32) + b1_ref[...]
    hid = jnp.maximum(hid, 0.0)                                # ReLU
    # TODO(synk): Dropout(0.3) is identity in eval mode; training-mode random
    # masking (pltpu.prng_seed + prng_random_bits) not implemented.
    # fc2 has N=1: VPU multiply + lane reduction instead of a degenerate MXU call.
    out_ref[...] = jnp.sum(hid * w2_ref[...], axis=-1, keepdims=True) + b2_ref[...]


@jax.jit
def custom_critic_forward(x, wih, whh, b, w1, b1, w2, b2):
    """x: (B, T, D) float32 (batch_first, like PyTorch)  ->  (B, 1) float32."""
    B, T, D = x.shape
    Bp = ((B + SUBLANE - 1) // SUBLANE) * SUBLANE   # pad batch to a full sublane tile
    if Bp != B:
        x = jnp.pad(x, ((0, Bp - B), (0, 0), (0, 0)))
    # Time-major + flattened so the kernel does ONE input projection for all steps.
    xf = jnp.transpose(x, (1, 0, 2)).reshape(T * Bp, D)

    vmem_spec = pl.BlockSpec(memory_space=pltpu.MemorySpace.VMEM)
    out = pl.pallas_call(
        critic_kernel,
        out_shape=jax.ShapeDtypeStruct((Bp, 1), jnp.float32),
        in_specs=[vmem_spec] * 8,
        out_specs=vmem_spec,
        scratch_shapes=[pltpu.VMEM((T * Bp, 4 * HIDDEN), jnp.float32)],
        # Let XLA fuse the tiny pad/transpose/reshape into the kernel's input DMA
        # instead of dispatching separate ops for a latency-bound kernel.
        compiler_params=pltpu.CompilerParams(
            allow_input_fusion=[True] + [False] * 7),
        # No grid: at these sizes the kernel is latency-bound.  If batch scales,
        # add grid=(Bp//tile,) with dimension_semantics=("parallel",), size the
        # gates scratch per-tile (or store it bf16), and budget VMEM against
        # v7x's 64 MiB rather than 128 MiB.
    )(xf, wih, whh, b, w1, b1, w2, b2)
    return out[:B]


def init_torch_like_params(key, features_dim=FEATURES, hidden=HIDDEN, fc1=FC1):
    """Random params in PyTorch-native layout / gate order (i, f, g, o)."""
    ks = jax.random.split(key, 8)
    s = 1.0 / np.sqrt(hidden)
    w_ih = jax.random.uniform(ks[0], (4 * hidden, features_dim), jnp.float32, -s, s)
    w_hh = jax.random.uniform(ks[1], (4 * hidden, hidden), jnp.float32, -s, s)
    b_ih = jax.random.uniform(ks[2], (4 * hidden,), jnp.float32, -s, s)
    b_hh = jax.random.uniform(ks[3], (4 * hidden,), jnp.float32, -s, s)
    w1 = jax.random.uniform(ks[4], (fc1, hidden), jnp.float32, -s, s)
    b1 = jax.random.uniform(ks[5], (fc1,), jnp.float32, -s, s)
    s2 = 1.0 / np.sqrt(fc1)
    w2 = jax.random.uniform(ks[6], (1, fc1), jnp.float32, -s2, s2)
    b2 = jax.random.uniform(ks[7], (1,), jnp.float32, -s2, s2)
    return dict(w_ih=w_ih, w_hh=w_hh, b_ih=b_ih, b_hh=b_hh,
                w1=w1, b1=b1, w2=w2, b2=b2)


def pack_params(p, hidden=HIDDEN):
    """PyTorch layout -> kernel layout.

    * LSTM weights transposed for right-multiplication.
    * Gate blocks reordered from PyTorch's (i, f, g, o) to the kernel's
      (i, f, o, g) so the sigmoid gates form one contiguous slab.
    * Combined bias b_ih + b_hh.
    * MXU operands (wih, whh, w1) stored bf16; biases and the fc2 row stay f32.
    """
    H = hidden

    def reorder(m):  # rows packed (i, f, g, o) -> (i, f, o, g)
        return jnp.concatenate([m[0:2 * H], m[3 * H:4 * H], m[2 * H:3 * H]], axis=0)

    wih = reorder(p["w_ih"]).T.astype(jnp.bfloat16)              # (D, 4H)
    whh = reorder(p["w_hh"]).T.astype(jnp.bfloat16)              # (H, 4H)
    b = reorder(p["b_ih"] + p["b_hh"]).reshape(1, 4 * H)         # (1, 4H) f32
    w1 = p["w1"].T.astype(jnp.bfloat16)                          # (H, 128)
    b1 = p["b1"].reshape(1, -1)                                  # (1, 128) f32
    w2 = p["w2"]                                                 # (1, 128) f32
    b2 = p["b2"].reshape(1, 1)                                   # (1, 1) f32
    return wih, whh, b, w1, b1, w2, b2


def reference_forward(x, p, hidden=HIDDEN):
    """Pure-JAX reference in PyTorch layout/gate order; MXU operands are cast to
    bf16 (then upcast) to mirror the kernel's bf16-in / f32-accumulate matmuls."""
    H = hidden
    bf = lambda a: a.astype(jnp.bfloat16).astype(jnp.float32)
    w_ih = bf(p["w_ih"])
    w_hh = bf(p["w_hh"])
    bias = (p["b_ih"] + p["b_hh"])[None, :]
    B, T, _ = x.shape
    h = jnp.zeros((B, H), jnp.float32)
    c = jnp.zeros((B, H), jnp.float32)
    for t in range(T):
        gates = bf(x[:, t, :]) @ w_ih.T + bf(h) @ w_hh.T + bias
        i = jax.nn.sigmoid(gates[:, 0:H])
        f = jax.nn.sigmoid(gates[:, H:2 * H])
        g = jnp.tanh(gates[:, 2 * H:3 * H])
        o = jax.nn.sigmoid(gates[:, 3 * H:4 * H])
        c = f * c + i * g
        h = o * jnp.tanh(c)
    hid = jnp.maximum(bf(h) @ bf(p["w1"]).T + p["b1"][None, :], 0.0)
    return hid @ p["w2"].T + p["b2"][None, :]


if __name__ == "__main__":
    key = jax.random.PRNGKey(0)
    k_param, k_x = jax.random.split(key)
    torch_params = init_torch_like_params(k_param)
    params = pack_params(torch_params)
    x = jax.random.normal(k_x, (BATCH, SEQ, FEATURES), jnp.float32)

    out = custom_critic_forward(x, *params)
    out = jax.block_until_ready(out)

    ref = reference_forward(x, torch_params)
    assert out.shape == (BATCH, 1), out.shape
    np.testing.assert_allclose(np.asarray(out), np.asarray(ref), rtol=5e-2, atol=2e-2)

    print("KERNEL_OK")
</pallas_src>

<mosaic_0001>
module attributes {stable_mosaic.version = 11 : i64} {
  func.func @critic_kernel(%arg0: memref<80x32xf32, #tpu.memory_space<vmem>>, %arg1: memref<32x1024xbf16, #tpu.memory_space<vmem>>, %arg2: memref<256x1024xbf16, #tpu.memory_space<vmem>>, %arg3: memref<1x1024xf32, #tpu.memory_space<vmem>>, %arg4: memref<256x128xbf16, #tpu.memory_space<vmem>>, %arg5: memref<1x128xf32, #tpu.memory_space<vmem>>, %arg6: memref<1x128xf32, #tpu.memory_space<vmem>>, %arg7: memref<1x1xf32, #tpu.memory_space<vmem>>, %arg8: memref<8x1xf32, #tpu.memory_space<vmem>>, %arg9: memref<80x1024xf32, #tpu.memory_space<vmem>>) attributes {dimension_semantics = [], scalar_prefetch = 0 : i64, scratch_operands = 1 : i64, tpu.core_type = #tpu.core_type<tc>} {
    %c0 = arith.constant 0 : index
    %c0_0 = arith.constant 0 : index
    %0 = vector.load %arg0[%c0, %c0_0] : memref<80x32xf32, #tpu.memory_space<vmem>>, vector<80x32xf32>
    %1 = arith.truncf %0 : vector<80x32xf32> to vector<80x32xbf16>
    %c0_1 = arith.constant 0 : index
    %c0_2 = arith.constant 0 : index
    %2 = vector.load %arg1[%c0_1, %c0_2] : memref<32x1024xbf16, #tpu.memory_space<vmem>>, vector<32x1024xbf16>
    %cst = arith.constant dense<0.000000e+00> : vector<80x1024xf32>
    %3 = tpu.matmul %1, %2, %cst {dimension_numbers = #tpu.dot_dimension_numbers<[1], [0], [0], [1], [0, 0, 1, 1], [], []>} : vector<80x32xbf16>, vector<32x1024xbf16>, vector<80x1024xf32> -> vector<80x1024xf32>
    %c0_3 = arith.constant 0 : index
    %c0_4 = arith.constant 0 : index
    %4 = vector.load %arg3[%c0_3, %c0_4] : memref<1x1024xf32, #tpu.memory_space<vmem>>, vector<1x1024xf32>
    %5 = vector.broadcast %4 : vector<1x1024xf32> to vector<80x1024xf32>
    %6 = arith.addf %3, %5 : vector<80x1024xf32>
    %c0_5 = arith.constant 0 : index
    %c0_6 = arith.constant 0 : index
    %7 = vector.load %arg9[%c0_5, %c0_6] : memref<80x1024xf32, #tpu.memory_space<vmem>>, vector<80x1024xf32>
    tpu.vector_store %arg9[%c0_5, %c0_6], %6 {strides = array<i32>} : memref<80x1024xf32, #tpu.memory_space<vmem>>, vector<80x1024xf32>,
    %cst_7 = arith.constant 0.000000e+00 : f32
    %8 = vector.broadcast %cst_7 : f32 to vector<8x256xf32>
    %cst_8 = arith.constant 0.000000e+00 : f32
    %9 = vector.broadcast %cst_8 : f32 to vector<8x256xf32>
    %c0_i32 = arith.constant 0 : i32
    %c8_i32 = arith.constant 8 : i32
    %10 = arith.muli %c0_i32, %c8_i32 : i32
    %11 = tpu.assume_multiple %10, 8 : i32
    %12 = arith.index_cast %11 : i32 to index
    %c0_9 = arith.constant 0 : index
    %13 = vector.load %arg9[%12, %c0_9] : memref<80x1024xf32, #tpu.memory_space<vmem>>, vector<8x1024xf32>
    %14 = arith.truncf %8 : vector<8x256xf32> to vector<8x256xbf16>
    %c0_10 = arith.constant 0 : index
    %c0_11 = arith.constant 0 : index
    %15 = vector.load %arg2[%c0_10, %c0_11] : memref<256x1024xbf16, #tpu.memory_space<vmem>>, vector<256x1024xbf16>
    %cst_12 = arith.constant dense<0.000000e+00> : vector<8x1024xf32>
    %16 = tpu.matmul %14, %15, %cst_12 {dimension_numbers = #tpu.dot_dimension_numbers<[1], [0], [0], [1], [0, 0, 1, 1], [], []>} : vector<8x256xbf16>, vector<256x1024xbf16>, vector<8x1024xf32> -> vector<8x1024xf32>
    %17 = arith.addf %13, %16 : vector<8x1024xf32>
    %18 = vector.extract_strided_slice %17 {offsets = [0, 0], sizes = [8, 768], strides = [1, 1]} : vector<8x1024xf32> to vector<8x768xf32>
    %cst_13 = arith.constant 5.000000e-01 : f32
    %19 = vector.broadcast %cst_13 : f32 to vector<8x768xf32>
    %20 = arith.mulf %19, %18 : vector<8x768xf32>
    %21 = math.tanh %20 : vector<8x768xf32>
    %cst_14 = arith.constant 5.000000e-01 : f32
    %22 = vector.broadcast %cst_14 : f32 to vector<8x768xf32>
    %23 = arith.mulf %22, %21 : vector<8x768xf32>
    %cst_15 = arith.constant 5.000000e-01 : f32
    %24 = vector.broadcast %cst_15 : f32 to vector<8x768xf32>
    %25 = arith.addf %23, %24 : vector<8x768xf32>
    %26 = vector.extract_strided_slice %17 {offsets = [0, 768], sizes = [8, 256], strides = [1, 1]} : vector<8x1024xf32> to vector<8x256xf32>
    %27 = math.tanh %26 : vector<8x256xf32>
    %28 = vector.extract_strided_slice %25 {offsets = [0, 0], sizes = [8, 256], strides = [1, 1]} : vector<8x768xf32> to vector<8x256xf32>
    %29 = vector.extract_strided_slice %25 {offsets = [0, 256], sizes = [8, 256], strides = [1, 1]} : vector<8x768xf32> to vector<8x256xf32>
    %30 = vector.extract_strided_slice %25 {offsets = [0, 512], sizes = [8, 256], strides = [1, 1]} : vector<8x768xf32> to vector<8x256xf32>
    %31 = arith.mulf %29, %9 : vector<8x256xf32>
    %32 = arith.mulf %28, %27 : vector<8x256xf32>
    %33 = arith.addf %31, %32 : vector<8x256xf32>
    %34 = math.tanh %33 : vector<8x256xf32>
    %35 = arith.mulf %30, %34 : vector<8x256xf32>
    %c1_i32 = arith.constant 1 : i32
    %c8_i32_16 = arith.constant 8 : i32
    %36 = arith.muli %c1_i32, %c8_i32_16 : i32
    %37 = tpu.assume_multiple %36, 8 : i32
    %38 = arith.index_cast %37 : i32 to index
    %c0_17 = arith.constant 0 : index
    %39 = vector.load %arg9[%38, %c0_17] : memref<80x1024xf32, #tpu.memory_space<vmem>>, vector<8x1024xf32>
    %40 = arith.truncf %35 : vector<8x256xf32> to vector<8x256xbf16>
    %c0_18 = arith.constant 0 : index
    %c0_19 = arith.constant 0 : index
    %41 = vector.load %arg2[%c0_18, %c0_19] : memref<256x1024xbf16, #tpu.memory_space<vmem>>, vector<256x1024xbf16>
    %cst_20 = arith.constant dense<0.000000e+00> : vector<8x1024xf32>
    %42 = tpu.matmul %40, %41, %cst_20 {dimension_numbers = #tpu.dot_dimension_numbers<[1], [0], [0], [1], [0, 0, 1, 1], [], []>} : vector<8x256xbf16>, vector<256x1024xbf16>, vector<8x1024xf32> -> vector<8x1024xf32>
    %43 = arith.addf %39, %42 : vector<8x1024xf32>
    %44 = vector.extract_strided_slice %43 {offsets = [0, 0], sizes = [8, 768], strides = [1, 1]} : vector<8x1024xf32> to vector<8x768xf32>
    %cst_21 = arith.constant 5.000000e-01 : f32
    %45 = vector.broadcast %cst_21 : f32 to vector<8x768xf32>
    %46 = arith.mulf %45, %44 : vector<8x768xf32>
    %47 = math.tanh %46 : vector<8x768xf32>
    %cst_22 = arith.constant 5.000000e-01 : f32
    %48 = vector.broadcast %cst_22 : f32 to vector<8x768xf32>
    %49 = arith.mulf %48, %47 : vector<8x768xf32>
    %cst_23 = arith.constant 5.000000e-01 : f32
    %50 = vector.broadcast %cst_23 : f32 to vector<8x768xf32>
    %51 = arith.addf %49, %50 : vector<8x768xf32>
    %52 = vector.extract_strided_slice %43 {offsets = [0, 768], sizes = [8, 256], strides = [1, 1]} : vector<8x1024xf32> to vector<8x256xf32>
    %53 = math.tanh %52 : vector<8x256xf32>
    %54 = vector.extract_strided_slice %51 {offsets = [0, 0], sizes = [8, 256], strides = [1, 1]} : vector<8x768xf32> to vector<8x256xf32>
    %55 = vector.extract_strided_slice %51 {offsets = [0, 256], sizes = [8, 256], strides = [1, 1]} : vector<8x768xf32> to vector<8x256xf32>
    %56 = vector.extract_strided_slice %51 {offsets = [0, 512], sizes = [8, 256], strides = [1, 1]} : vector<8x768xf32> to vector<8x256xf32>
    %57 = arith.mulf %55, %33 : vector<8x256xf32>
    %58 = arith.mulf %54, %53 : vector<8x256xf32>
    %59 = arith.addf %57, %58 : vector<8x256xf32>
    %60 = math.tanh %59 : vector<8x256xf32>
    %61 = arith.mulf %56, %60 : vector<8x256xf32>
    %c2_i32 = arith.constant 2 : i32
    %c8_i32_24 = arith.constant 8 : i32
    %62 = arith.muli %c2_i32, %c8_i32_24 : i32
    %63 = tpu.assume_multiple %62, 8 : i32
    %64 = arith.index_cast %63 : i32 to index
    %c0_25 = arith.constant 0 : index
    %65 = vector.load %arg9[%64, %c0_25] : memref<80x1024xf32, #tpu.memory_space<vmem>>, vector<8x1024xf32>
    %66 = arith.truncf %61 : vector<8x256xf32> to vector<8x256xbf16>
    %c0_26 = arith.constant 0 : index
    %c0_27 = arith.constant 0 : index
    %67 = vector.load %arg2[%c0_26, %c0_27] : memref<256x1024xbf16, #tpu.memory_space<vmem>>, vector<256x1024xbf16>
    %cst_28 = arith.constant dense<0.000000e+00> : vector<8x1024xf32>
    %68 = tpu.matmul %66, %67, %cst_28 {dimension_numbers = #tpu.dot_dimension_numbers<[1], [0], [0], [1], [0, 0, 1, 1], [], []>} : vector<8x256xbf16>, vector<256x1024xbf16>, vector<8x1024xf32> -> vector<8x1024xf32>
    %69 = arith.addf %65, %68 : vector<8x1024xf32>
    %70 = vector.extract_strided_slice %69 {offsets = [0, 0], sizes = [8, 768], strides = [1, 1]} : vector<8x1024xf32> to vector<8x768xf32>
    %cst_29 = arith.constant 5.000000e-01 : f32
    %71 = vector.broadcast %cst_29 : f32 to vector<8x768xf32>
    %72 = arith.mulf %71, %70 : vector<8x768xf32>
    %73 = math.tanh %72 : vector<8x768xf32>
    %cst_30 = arith.constant 5.000000e-01 : f32
    %74 = vector.broadcast %cst_30 : f32 to vector<8x768xf32>
    %75 = arith.mulf %74, %73 : vector<8x768xf32>
    %cst_31 = arith.constant 5.000000e-01 : f32
    %76 = vector.broadcast %cst_31 : f32 to vector<8x768xf32>
    %77 = arith.addf %75, %76 : vector<8x768xf32>
    %78 = vector.extract_strided_slice %69 {offsets = [0, 768], sizes = [8, 256], strides = [1, 1]} : vector<8x1024xf32> to vector<8x256xf32>
    %79 = math.tanh %78 : vector<8x256xf32>
    %80 = vector.extract_strided_slice %77 {offsets = [0, 0], sizes = [8, 256], strides = [1, 1]} : vector<8x768xf32> to vector<8x256xf32>
    %81 = vector.extract_strided_slice %77 {offsets = [0, 256], sizes = [8, 256], strides = [1, 1]} : vector<8x768xf32> to vector<8x256xf32>
    %82 = vector.extract_strided_slice %77 {offsets = [0, 512], sizes = [8, 256], strides = [1, 1]} : vector<8x768xf32> to vector<8x256xf32>
    %83 = arith.mulf %81, %59 : vector<8x256xf32>
    %84 = arith.mulf %80, %79 : vector<8x256xf32>
    %85 = arith.addf %83, %84 : vector<8x256xf32>
    %86 = math.tanh %85 : vector<8x256xf32>
    %87 = arith.mulf %82, %86 : vector<8x256xf32>
    %c3_i32 = arith.constant 3 : i32
    %c8_i32_32 = arith.constant 8 : i32
    %88 = arith.muli %c3_i32, %c8_i32_32 : i32
    %89 = tpu.assume_multiple %88, 8 : i32
    %90 = arith.index_cast %89 : i32 to index
    %c0_33 = arith.constant 0 : index
    %91 = vector.load %arg9[%90, %c0_33] : memref<80x1024xf32, #tpu.memory_space<vmem>>, vector<8x1024xf32>
    %92 = arith.truncf %87 : vector<8x256xf32> to vector<8x256xbf16>
    %c0_34 = arith.constant 0 : index
    %c0_35 = arith.constant 0 : index
    %93 = vector.load %arg2[%c0_34, %c0_35] : memref<256x1024xbf16, #tpu.memory_space<vmem>>, vector<256x1024xbf16>
    %cst_36 = arith.constant dense<0.000000e+00> : vector<8x1024xf32>
    %94 = tpu.matmul %92, %93, %cst_36 {dimension_numbers = #tpu.dot_dimension_numbers<[1], [0], [0], [1], [0, 0, 1, 1], [], []>} : vector<8x256xbf16>, vector<256x1024xbf16>, vector<8x1024xf32> -> vector<8x1024xf32>
    %95 = arith.addf %91, %94 : vector<8x1024xf32>
    %96 = vector.extract_strided_slice %95 {offsets = [0, 0], sizes = [8, 768], strides = [1, 1]} : vector<8x1024xf32> to vector<8x768xf32>
    %cst_37 = arith.constant 5.000000e-01 : f32
    %97 = vector.broadcast %cst_37 : f32 to vector<8x768xf32>
    %98 = arith.mulf %97, %96 : vector<8x768xf32>
    %99 = math.tanh %98 : vector<8x768xf32>
    %cst_38 = arith.constant 5.000000e-01 : f32
    %100 = vector.broadcast %cst_38 : f32 to vector<8x768xf32>
    %101 = arith.mulf %100, %99 : vector<8x768xf32>
    %cst_39 = arith.constant 5.000000e-01 : f32
    %102 = vector.broadcast %cst_39 : f32 to vector<8x768xf32>
    %103 = arith.addf %101, %102 : vector<8x768xf32>
    %104 = vector.extract_strided_slice %95 {offsets = [0, 768], sizes = [8, 256], strides = [1, 1]} : vector<8x1024xf32> to vector<8x256xf32>
    %105 = math.tanh %104 : vector<8x256xf32>
    %106 = vector.extract_strided_slice %103 {offsets = [0, 0], sizes = [8, 256], strides = [1, 1]} : vector<8x768xf32> to vector<8x256xf32>
    %107 = vector.extract_strided_slice %103 {offsets = [0, 256], sizes = [8, 256], strides = [1, 1]} : vector<8x768xf32> to vector<8x256xf32>
    %108 = vector.extract_strided_slice %103 {offsets = [0, 512], sizes = [8, 256], strides = [1, 1]} : vector<8x768xf32> to vector<8x256xf32>
    %109 = arith.mulf %107, %85 : vector<8x256xf32>
    %110 = arith.mulf %106, %105 : vector<8x256xf32>
    %111 = arith.addf %109, %110 : vector<8x256xf32>
    %112 = math.tanh %111 : vector<8x256xf32>
    %113 = arith.mulf %108, %112 : vector<8x256xf32>
    %c4_i32 = arith.constant 4 : i32
    %c8_i32_40 = arith.constant 8 : i32
    %114 = arith.muli %c4_i32, %c8_i32_40 : i32
    %115 = tpu.assume_multiple %114, 8 : i32
    %116 = arith.index_cast %115 : i32 to index
    %c0_41 = arith.constant 0 : index
    %117 = vector.load %arg9[%116, %c0_41] : memref<80x1024xf32, #tpu.memory_space<vmem>>, vector<8x1024xf32>
    %118 = arith.truncf %113 : vector<8x256xf32> to vector<8x256xbf16>
    %c0_42 = arith.constant 0 : index
    %c0_43 = arith.constant 0 : index
    %119 = vector.load %arg2[%c0_42, %c0_43] : memref<256x1024xbf16, #tpu.memory_space<vmem>>, vector<256x1024xbf16>
    %cst_44 = arith.constant dense<0.000000e+00> : vector<8x1024xf32>
    %120 = tpu.matmul %118, %119, %cst_44 {dimension_numbers = #tpu.dot_dimension_numbers<[1], [0], [0], [1], [0, 0, 1, 1], [], []>} : vector<8x256xbf16>, vector<256x1024xbf16>, vector<8x1024xf32> -> vector<8x1024xf32>
    %121 = arith.addf %117, %120 : vector<8x1024xf32>
    %122 = vector.extract_strided_slice %121 {offsets = [0, 0], sizes = [8, 768], strides = [1, 1]} : vector<8x1024xf32> to vector<8x768xf32>
    %cst_45 = arith.constant 5.000000e-01 : f32
    %123 = vector.broadcast %cst_45 : f32 to vector<8x768xf32>
    %124 = arith.mulf %123, %122 : vector<8x768xf32>
    %125 = math.tanh %124 : vector<8x768xf32>
    %cst_46 = arith.constant 5.000000e-01 : f32
    %126 = vector.broadcast %cst_46 : f32 to vector<8x768xf32>
    %127 = arith.mulf %126, %125 : vector<8x768xf32>
    %cst_47 = arith.constant 5.000000e-01 : f32
    %128 = vector.broadcast %cst_47 : f32 to vector<8x768xf32>
    %129 = arith.addf %127, %128 : vector<8x768xf32>
    %130 = vector.extract_strided_slice %121 {offsets = [0, 768], sizes = [8, 256], strides = [1, 1]} : vector<8x1024xf32> to vector<8x256xf32>
    %131 = math.tanh %130 : vector<8x256xf32>
    %132 = vector.extract_strided_slice %129 {offsets = [0, 0], sizes = [8, 256], strides = [1, 1]} : vector<8x768xf32> to vector<8x256xf32>
    %133 = vector.extract_strided_slice %129 {offsets = [0, 256], sizes = [8, 256], strides = [1, 1]} : vector<8x768xf32> to vector<8x256xf32>
    %134 = vector.extract_strided_slice %129 {offsets = [0, 512], sizes = [8, 256], strides = [1, 1]} : vector<8x768xf32> to vector<8x256xf32>
    %135 = arith.mulf %133, %111 : vector<8x256xf32>
    %136 = arith.mulf %132, %131 : vector<8x256xf32>
    %137 = arith.addf %135, %136 : vector<8x256xf32>
    %138 = math.tanh %137 : vector<8x256xf32>
    %139 = arith.mulf %134, %138 : vector<8x256xf32>
    %c5_i32 = arith.constant 5 : i32
    %c8_i32_48 = arith.constant 8 : i32
    %140 = arith.muli %c5_i32, %c8_i32_48 : i32
    %141 = tpu.assume_multiple %140, 8 : i32
    %142 = arith.index_cast %141 : i32 to index
    %c0_49 = arith.constant 0 : index
    %143 = vector.load %arg9[%142, %c0_49] : memref<80x1024xf32, #tpu.memory_space<vmem>>, vector<8x1024xf32>
    %144 = arith.truncf %139 : vector<8x256xf32> to vector<8x256xbf16>
    %c0_50 = arith.constant 0 : index
    %c0_51 = arith.constant 0 : index
    %145 = vector.load %arg2[%c0_50, %c0_51] : memref<256x1024xbf16, #tpu.memory_space<vmem>>, vector<256x1024xbf16>
    %cst_52 = arith.constant dense<0.000000e+00> : vector<8x1024xf32>
    %146 = tpu.matmul %144, %145, %cst_52 {dimension_numbers = #tpu.dot_dimension_numbers<[1], [0], [0], [1], [0, 0, 1, 1], [], []>} : vector<8x256xbf16>, vector<256x1024xbf16>, vector<8x1024xf32> -> vector<8x1024xf32>
    %147 = arith.addf %143, %146 : vector<8x1024xf32>
    %148 = vector.extract_strided_slice %147 {offsets = [0, 0], sizes = [8, 768], strides = [1, 1]} : vector<8x1024xf32> to vector<8x768xf32>
    %cst_53 = arith.constant 5.000000e-01 : f32
    %149 = vector.broadcast %cst_53 : f32 to vector<8x768xf32>
    %150 = arith.mulf %149, %148 : vector<8x768xf32>
    %151 = math.tanh %150 : vector<8x768xf32>
    %cst_54 = arith.constant 5.000000e-01 : f32
    %152 = vector.broadcast %cst_54 : f32 to vector<8x768xf32>
    %153 = arith.mulf %152, %151 : vector<8x768xf32>
    %cst_55 = arith.constant 5.000000e-01 : f32
    %154 = vector.broadcast %cst_55 : f32 to vector<8x768xf32>
    %155 = arith.addf %153, %154 : vector<8x768xf32>
    %156 = vector.extract_strided_slice %147 {offsets = [0, 768], sizes = [8, 256], strides = [1, 1]} : vector<8x1024xf32> to vector<8x256xf32>
    %157 = math.tanh %156 : vector<8x256xf32>
    %158 = vector.extract_strided_slice %155 {offsets = [0, 0], sizes = [8, 256], strides = [1, 1]} : vector<8x768xf32> to vector<8x256xf32>
    %159 = vector.extract_strided_slice %155 {offsets = [0, 256], sizes = [8, 256], strides = [1, 1]} : vector<8x768xf32> to vector<8x256xf32>
    %160 = vector.extract_strided_slice %155 {offsets = [0, 512], sizes = [8, 256], strides = [1, 1]} : vector<8x768xf32> to vector<8x256xf32>
    %161 = arith.mulf %159, %137 : vector<8x256xf32>
    %162 = arith.mulf %158, %157 : vector<8x256xf32>
    %163 = arith.addf %161, %162 : vector<8x256xf32>
    %164 = math.tanh %163 : vector<8x256xf32>
    %165 = arith.mulf %160, %164 : vector<8x256xf32>
    %c6_i32 = arith.constant 6 : i32
    %c8_i32_56 = arith.constant 8 : i32
    %166 = arith.muli %c6_i32, %c8_i32_56 : i32
    %167 = tpu.assume_multiple %166, 8 : i32
    %168 = arith.index_cast %167 : i32 to index
    %c0_57 = arith.constant 0 : index
    %169 = vector.load %arg9[%168, %c0_57] : memref<80x1024xf32, #tpu.memory_space<vmem>>, vector<8x1024xf32>
    %170 = arith.truncf %165 : vector<8x256xf32> to vector<8x256xbf16>
    %c0_58 = arith.constant 0 : index
    %c0_59 = arith.constant 0 : index
    %171 = vector.load %arg2[%c0_58, %c0_59] : memref<256x1024xbf16, #tpu.memory_space<vmem>>, vector<256x1024xbf16>
    %cst_60 = arith.constant dense<0.000000e+00> : vector<8x1024xf32>
    %172 = tpu.matmul %170, %171, %cst_60 {dimension_numbers = #tpu.dot_dimension_numbers<[1], [0], [0], [1], [0, 0, 1, 1], [], []>} : vector<8x256xbf16>, vector<256x1024xbf16>, vector<8x1024xf32> -> vector<8x1024xf32>
    %173 = arith.addf %169, %172 : vector<8x1024xf32>
    %174 = vector.extract_strided_slice %173 {offsets = [0, 0], sizes = [8, 768], strides = [1, 1]} : vector<8x1024xf32> to vector<8x768xf32>
    %cst_61 = arith.constant 5.000000e-01 : f32
    %175 = vector.broadcast %cst_61 : f32 to vector<8x768xf32>
    %176 = arith.mulf %175, %174 : vector<8x768xf32>
    %177 = math.tanh %176 : vector<8x768xf32>
    %cst_62 = arith.constant 5.000000e-01 : f32
    %178 = vector.broadcast %cst_62 : f32 to vector<8x768xf32>
    %179 = arith.mulf %178, %177 : vector<8x768xf32>
    %cst_63 = arith.constant 5.000000e-01 : f32
    %180 = vector.broadcast %cst_63 : f32 to vector<8x768xf32>
    %181 = arith.addf %179, %180 : vector<8x768xf32>
    %182 = vector.extract_strided_slice %173 {offsets = [0, 768], sizes = [8, 256], strides = [1, 1]} : vector<8x1024xf32> to vector<8x256xf32>
    %183 = math.tanh %182 : vector<8x256xf32>
    %184 = vector.extract_strided_slice %181 {offsets = [0, 0], sizes = [8, 256], strides = [1, 1]} : vector<8x768xf32> to vector<8x256xf32>
    %185 = vector.extract_strided_slice %181 {offsets = [0, 256], sizes = [8, 256], strides = [1, 1]} : vector<8x768xf32> to vector<8x256xf32>
    %186 = vector.extract_strided_slice %181 {offsets = [0, 512], sizes = [8, 256], strides = [1, 1]} : vector<8x768xf32> to vector<8x256xf32>
    %187 = arith.mulf %185, %163 : vector<8x256xf32>
    %188 = arith.mulf %184, %183 : vector<8x256xf32>
    %189 = arith.addf %187, %188 : vector<8x256xf32>
    %190 = math.tanh %189 : vector<8x256xf32>
    %191 = arith.mulf %186, %190 : vector<8x256xf32>
    %c7_i32 = arith.constant 7 : i32
    %c8_i32_64 = arith.constant 8 : i32
    %192 = arith.muli %c7_i32, %c8_i32_64 : i32
    %193 = tpu.assume_multiple %192, 8 : i32
    %194 = arith.index_cast %193 : i32 to index
    %c0_65 = arith.constant 0 : index
    %195 = vector.load %arg9[%194, %c0_65] : memref<80x1024xf32, #tpu.memory_space<vmem>>, vector<8x1024xf32>
    %196 = arith.truncf %191 : vector<8x256xf32> to vector<8x256xbf16>
    %c0_66 = arith.constant 0 : index
    %c0_67 = arith.constant 0 : index
    %197 = vector.load %arg2[%c0_66, %c0_67] : memref<256x1024xbf16, #tpu.memory_space<vmem>>, vector<256x1024xbf16>
    %cst_68 = arith.constant dense<0.000000e+00> : vector<8x1024xf32>
    %198 = tpu.matmul %196, %197, %cst_68 {dimension_numbers = #tpu.dot_dimension_numbers<[1], [0], [0], [1], [0, 0, 1, 1], [], []>} : vector<8x256xbf16>, vector<256x1024xbf16>, vector<8x1024xf32> -> vector<8x1024xf32>
    %199 = arith.addf %195, %198 : vector<8x1024xf32>
    %200 = vector.extract_strided_slice %199 {offsets = [0, 0], sizes = [8, 768], strides = [1, 1]} : vector<8x1024xf32> to vector<8x768xf32>
    %cst_69 = arith.constant 5.000000e-01 : f32
    %201 = vector.broadcast %cst_69 : f32 to vector<8x768xf32>
    %202 = arith.mulf %201, %200 : vector<8x768xf32>
    %203 = math.tanh %202 : vector<8x768xf32>
    %cst_70 = arith.constant 5.000000e-01 : f32
    %204 = vector.broadcast %cst_70 : f32 to vector<8x768xf32>
    %205 = arith.mulf %204, %203 : vector<8x768xf32>
    %cst_71 = arith.constant 5.000000e-01 : f32
    %206 = vector.broadcast %cst_71 : f32 to vector<8x768xf32>
    %207 = arith.addf %205, %206 : vector<8x768xf32>
    %208 = vector.extract_strided_slice %199 {offsets = [0, 768], sizes = [8, 256], strides = [1, 1]} : vector<8x1024xf32> to vector<8x256xf32>
    %209 = math.tanh %208 : vector<8x256xf32>
    %210 = vector.extract_strided_slice %207 {offsets = [0, 0], sizes = [8, 256], strides = [1, 1]} : vector<8x768xf32> to vector<8x256xf32>
    %211 = vector.extract_strided_slice %207 {offsets = [0, 256], sizes = [8, 256], strides = [1, 1]} : vector<8x768xf32> to vector<8x256xf32>
    %212 = vector.extract_strided_slice %207 {offsets = [0, 512], sizes = [8, 256], strides = [1, 1]} : vector<8x768xf32> to vector<8x256xf32>
    %213 = arith.mulf %211, %189 : vector<8x256xf32>
    %214 = arith.mulf %210, %209 : vector<8x256xf32>
    %215 = arith.addf %213, %214 : vector<8x256xf32>
    %216 = math.tanh %215 : vector<8x256xf32>
    %217 = arith.mulf %212, %216 : vector<8x256xf32>
    %c8_i32_72 = arith.constant 8 : i32
    %c8_i32_73 = arith.constant 8 : i32
    %218 = arith.muli %c8_i32_72, %c8_i32_73 : i32
    %219 = tpu.assume_multiple %218, 8 : i32
    %220 = arith.index_cast %219 : i32 to index
    %c0_74 = arith.constant 0 : index
    %221 = vector.load %arg9[%220, %c0_74] : memref<80x1024xf32, #tpu.memory_space<vmem>>, vector<8x1024xf32>
    %222 = arith.truncf %217 : vector<8x256xf32> to vector<8x256xbf16>
    %c0_75 = arith.constant 0 : index
    %c0_76 = arith.constant 0 : index
    %223 = vector.load %arg2[%c0_75, %c0_76] : memref<256x1024xbf16, #tpu.memory_space<vmem>>, vector<256x1024xbf16>
    %cst_77 = arith.constant dense<0.000000e+00> : vector<8x1024xf32>
    %224 = tpu.matmul %222, %223, %cst_77 {dimension_numbers = #tpu.dot_dimension_numbers<[1], [0], [0], [1], [0, 0, 1, 1], [], []>} : vector<8x256xbf16>, vector<256x1024xbf16>, vector<8x1024xf32> -> vector<8x1024xf32>
    %225 = arith.addf %221, %224 : vector<8x1024xf32>
    %226 = vector.extract_strided_slice %225 {offsets = [0, 0], sizes = [8, 768], strides = [1, 1]} : vector<8x1024xf32> to vector<8x768xf32>
    %cst_78 = arith.constant 5.000000e-01 : f32
    %227 = vector.broadcast %cst_78 : f32 to vector<8x768xf32>
    %228 = arith.mulf %227, %226 : vector<8x768xf32>
    %229 = math.tanh %228 : vector<8x768xf32>
    %cst_79 = arith.constant 5.000000e-01 : f32
    %230 = vector.broadcast %cst_79 : f32 to vector<8x768xf32>
    %231 = arith.mulf %230, %229 : vector<8x768xf32>
    %cst_80 = arith.constant 5.000000e-01 : f32
    %232 = vector.broadcast %cst_80 : f32 to vector<8x768xf32>
    %233 = arith.addf %231, %232 : vector<8x768xf32>
    %234 = vector.extract_strided_slice %225 {offsets = [0, 768], sizes = [8, 256], strides = [1, 1]} : vector<8x1024xf32> to vector<8x256xf32>
    %235 = math.tanh %234 : vector<8x256xf32>
    %236 = vector.extract_strided_slice %233 {offsets = [0, 0], sizes = [8, 256], strides = [1, 1]} : vector<8x768xf32> to vector<8x256xf32>
    %237 = vector.extract_strided_slice %233 {offsets = [0, 256], sizes = [8, 256], strides = [1, 1]} : vector<8x768xf32> to vector<8x256xf32>
    %238 = vector.extract_strided_slice %233 {offsets = [0, 512], sizes = [8, 256], strides = [1, 1]} : vector<8x768xf32> to vector<8x256xf32>
    %239 = arith.mulf %237, %215 : vector<8x256xf32>
    %240 = arith.mulf %236, %235 : vector<8x256xf32>
    %241 = arith.addf %239, %240 : vector<8x256xf32>
    %242 = math.tanh %241 : vector<8x256xf32>
    %243 = arith.mulf %238, %242 : vector<8x256xf32>
    %c9_i32 = arith.constant 9 : i32
    %c8_i32_81 = arith.constant 8 : i32
    %244 = arith.muli %c9_i32, %c8_i32_81 : i32
    %245 = tpu.assume_multiple %244, 8 : i32
    %246 = arith.index_cast %245 : i32 to index
    %c0_82 = arith.constant 0 : index
    %247 = vector.load %arg9[%246, %c0_82] : memref<80x1024xf32, #tpu.memory_space<vmem>>, vector<8x1024xf32>
    %248 = arith.truncf %243 : vector<8x256xf32> to vector<8x256xbf16>
    %c0_83 = arith.constant 0 : index
    %c0_84 = arith.constant 0 : index
    %249 = vector.load %arg2[%c0_83, %c0_84] : memref<256x1024xbf16, #tpu.memory_space<vmem>>, vector<256x1024xbf16>
    %cst_85 = arith.constant dense<0.000000e+00> : vector<8x1024xf32>
    %250 = tpu.matmul %248, %249, %cst_85 {dimension_numbers = #tpu.dot_dimension_numbers<[1], [0], [0], [1], [0, 0, 1, 1], [], []>} : vector<8x256xbf16>, vector<256x1024xbf16>, vector<8x1024xf32> -> vector<8x1024xf32>
    %251 = arith.addf %247, %250 : vector<8x1024xf32>
    %252 = vector.extract_strided_slice %251 {offsets = [0, 0], sizes = [8, 768], strides = [1, 1]} : vector<8x1024xf32> to vector<8x768xf32>
    %cst_86 = arith.constant 5.000000e-01 : f32
    %253 = vector.broadcast %cst_86 : f32 to vector<8x768xf32>
    %254 = arith.mulf %253, %252 : vector<8x768xf32>
    %255 = math.tanh %254 : vector<8x768xf32>
    %cst_87 = arith.constant 5.000000e-01 : f32
    %256 = vector.broadcast %cst_87 : f32 to vector<8x768xf32>
    %257 = arith.mulf %256, %255 : vector<8x768xf32>
    %cst_88 = arith.constant 5.000000e-01 : f32
    %258 = vector.broadcast %cst_88 : f32 to vector<8x768xf32>
    %259 = arith.addf %257, %258 : vector<8x768xf32>
    %260 = vector.extract_strided_slice %251 {offsets = [0, 768], sizes = [8, 256], strides = [1, 1]} : vector<8x1024xf32> to vector<8x256xf32>
    %261 = math.tanh %260 : vector<8x256xf32>
    %262 = vector.extract_strided_slice %259 {offsets = [0, 0], sizes = [8, 256], strides = [1, 1]} : vector<8x768xf32> to vector<8x256xf32>
    %263 = vector.extract_strided_slice %259 {offsets = [0, 256], sizes = [8, 256], strides = [1, 1]} : vector<8x768xf32> to vector<8x256xf32>
    %264 = vector.extract_strided_slice %259 {offsets = [0, 512], sizes = [8, 256], strides = [1, 1]} : vector<8x768xf32> to vector<8x256xf32>
    %265 = arith.mulf %263, %241 : vector<8x256xf32>
    %266 = arith.mulf %262, %261 : vector<8x256xf32>
    %267 = arith.addf %265, %266 : vector<8x256xf32>
    %268 = math.tanh %267 : vector<8x256xf32>
    %269 = arith.mulf %264, %268 : vector<8x256xf32>
    %c10_i32 = arith.constant 10 : i32
    %270 = arith.truncf %269 : vector<8x256xf32> to vector<8x256xbf16>
    %c0_89 = arith.constant 0 : index
    %c0_90 = arith.constant 0 : index
    %271 = vector.load %arg4[%c0_89, %c0_90] : memref<256x128xbf16, #tpu.memory_space<vmem>>, vector<256x128xbf16>
    %cst_91 = arith.constant dense<0.000000e+00> : vector<8x128xf32>
    %272 = tpu.matmul %270, %271, %cst_91 {dimension_numbers = #tpu.dot_dimension_numbers<[1], [0], [0], [1], [0, 0, 1, 1], [], []>} : vector<8x256xbf16>, vector<256x128xbf16>, vector<8x128xf32> -> vector<8x128xf32>
    %c0_92 = arith.constant 0 : index
    %c0_93 = arith.constant 0 : index
    %273 = vector.load %arg5[%c0_92, %c0_93] : memref<1x128xf32, #tpu.memory_space<vmem>>, vector<1x128xf32>
    %274 = vector.broadcast %273 : vector<1x128xf32> to vector<8x128xf32>
    %275 = arith.addf %272, %274 : vector<8x128xf32>
    %cst_94 = arith.constant 0.000000e+00 : f32
    %276 = vector.broadcast %cst_94 : f32 to vector<8x128xf32>
    %277 = arith.maximumf %275, %276 : vector<8x128xf32>
    %c0_95 = arith.constant 0 : index
    %c0_96 = arith.constant 0 : index
    %278 = vector.load %arg6[%c0_95, %c0_96] : memref<1x128xf32, #tpu.memory_space<vmem>>, vector<1x128xf32>
    %279 = vector.broadcast %278 : vector<1x128xf32> to vector<8x128xf32>
    %280 = arith.mulf %277, %279 : vector<8x128xf32>
    %cst_97 = arith.constant dense<0.000000e+00> : vector<8xf32>
    %281 = vector.multi_reduction <add>, %280, %cst_97 [1] : vector<8x128xf32> to vector<8xf32>
    %282 = vector.shape_cast %281 : vector<8xf32> to vector<8x1xf32>
    %c0_98 = arith.constant 0 : index
    %c0_99 = arith.constant 0 : index
    %283 = vector.load %arg7[%c0_98, %c0_99] : memref<1x1xf32, #tpu.memory_space<vmem>>, vector<1x1xf32>
    %284 = vector.broadcast %283 : vector<1x1xf32> to vector<8x1xf32>
    %285 = arith.addf %282, %284 : vector<8x1xf32>
    %c0_100 = arith.constant 0 : index
    %c0_101 = arith.constant 0 : index
    %286 = vector.load %arg8[%c0_100, %c0_101] : memref<8x1xf32, #tpu.memory_space<vmem>>, vector<8x1xf32>
    tpu.vector_store %arg8[%c0_100, %c0_101], %285 {strides = array<i32>} : memref<8x1xf32, #tpu.memory_space<vmem>>, vector<8x1xf32>,
    return
  }
}

</mosaic_0001>

<bundles_post_ra>
// kernel: custom_critic_forward.2
= control target key start
LH: loop header
LB: loop body
LE: loop exit
PB: predicated region body
PF: predicated region fallthrough
CT: control target
= control target key end

     0   :  { %s6850_s0 = inlined_call_operand.hbm [shape: bf16[32,1024], index: 0, kind: input, shape index: {}]   ;;  %s6851_s1 = inlined_call_operand.hbm [shape: bf16[256,1024], index: 1, kind: input, shape index: {}]   ;;  %s6852_s2 = inlined_call_operand.vmem [shape: f32[1,1024], index: 2, kind: input, shape index: {}]   ;;  %s6853_s3 = inlined_call_operand.hbm [shape: bf16[256,128], index: 3, kind: input, shape index: {}]   ;;  %s6854_s4 = inlined_call_operand.vmem [shape: f32[1,128], index: 4, kind: input, shape index: {}]   ;;  %s6855_s5 = inlined_call_operand.vmem [shape: f32[1,128], index: 5, kind: input, shape index: {}]   ;;  %s6856_s6 = inlined_call_operand.<no memory space> [shape: f32[1,1], index: 6, kind: input, shape index: {}]   ;;  %s6857_s7 = inlined_call_operand.hbm [shape: f32[4,10,32], index: 7, kind: input, shape index: {}]   ;;  %s6858_s8 = inlined_call_operand.<no memory space> [shape: f32[], index: 8, kind: input, shape index: {}]   ;;  %s6859_s9 = inlined_call_operand.vmem [shape: f32[8,1], index: 9, kind: output, shape index: {}]  }
   0x1   :  { %v4598_v0 = vstv %s6858_s8  ;;  %v15_v1 = vstv %s6856_s6 }
   0x2   :  { %16 = vst [vmem:[#allocation8] sm:$0x1] %v15_v1 }
   0x3   :  { %17 = vsyncpa [#allocation10], 0 }
   0x4   :  { %18 = vsyncpa [#allocation12], 0 }
   0x5   :  { %19 = vsyncpa [#allocation15], 0  ;;  %s4536_s13 = smov [#allocation11]   ;;  %s4442_s17 = scalar_lea.hbm %s6850_s0, 2048 }
   0x6   :  { %s37_s14 = sshll.u32 %s4536_s13, 4  ;;  %p4443_p0 = scmp.ne.s32.totalorder %s6850_s0, %s4442_s17  ;;  %s38_s14 = int_to_ptr.vmem [resolvable:$true] %s37_s14 }
   0x7   :  { %p4446_p1 = scmp.lt.u32.totalorder %s4442_s17, %s6850_s0 }
   0x9   :  { %p4448_p2 = pnand %p4446_p1, %p4443_p0 }
   0xb   :  { %4451 = shalt.err (!%p4448_p2)
}
   0xc   :  { %s4452_s6 = scalar_lea.vmem %s38_s14, 2048  ;;  %p4457_p4 = scmp.lt.s32.totalorder %s38_s14, %s38_s14 }
   0xd   :  { %p4453_p3 = scmp.ne.s32.totalorder %s38_s14, %s4452_s6  ;;  %p4458_p5 = scmp.lt.s32.totalorder %s4452_s6, %s4452_s6 }
   0xf   :  { %p4459_p6 = por %p4458_p5, %p4457_p4 }
  0x11   :  { %p4460_p7 = pnand %p4459_p6, %p4453_p3 }
  0x13   :  { %4463 = shalt.err (!%p4460_p7)
}
  0x14   :  { %s4537_s21 = smov 512   ;;  %s4538_s22 = smov 32  }
  0x15   :  { %43 = dma.hbm_to_vmem [thread:$0]  %s6850_s0, 2048, %s38_s14, [#allocation12], %s4537_s21, %s4537_s21, %s4538_s22  }
  0x16   :  { %s4539_s25 = smov [#allocation9]   ;;  %s4464_s29 = scalar_lea.hbm %s6857_s7, 640 }
  0x17   :  { %s25_s26 = sshll.u32 %s4539_s25, 4  ;;  %p4465_p8 = scmp.ne.s32.totalorder %s6857_s7, %s4464_s29  ;;  %s26_s26 = int_to_ptr.vmem [resolvable:$true] %s25_s26 }
  0x18   :  { %p4468_p9 = scmp.lt.u32.totalorder %s4464_s29, %s6857_s7 }
  0x1a   :  { %p4470_p10 = pnand %p4468_p9, %p4465_p8 }
  0x1c   :  { %4473 = shalt.err (!%p4470_p10)
}
  0x1d   :  { %s4474_s13 = scalar_lea.vmem %s26_s26, 640  ;;  %p4479_p12 = scmp.lt.s32.totalorder %s26_s26, %s26_s26 }
  0x1e   :  { %p4475_p11 = scmp.ne.s32.totalorder %s26_s26, %s4474_s13  ;;  %p4480_p13 = scmp.lt.s32.totalorder %s4474_s13, %s4474_s13 }
  0x20   :  { %p4481_p0 = por %p4480_p13, %p4479_p12 }
  0x22   :  { %p4482_p1 = pnand %p4481_p0, %p4475_p11 }
  0x24   :  { %4485 = shalt.err (!%p4482_p1)
}
  0x25   :  { %s4540_s0 = smov 64   ;;  %s4541_s14 = smov 4  }
  0x26   :  { %31 = dma.hbm_to_vmem [thread:$0]  %s6857_s7, 640, %s26_s26, [#allocation10], %s4540_s0, %s4540_s0, %s4541_s14  }
  0x27   :  { %s4542_s17 = smov [#allocation13]   ;;  %s4543_s19 = smov [#allocation14]  }
  0x28   :  { %s49_s18 = sshll.u32 %s4542_s17, 4  ;;  %s63_s8 = sshll.u32 %s4543_s19, 4  ;;  %s50_s18 = int_to_ptr.vmem [resolvable:$true] %s49_s18  ;;  %s4633_s8 = int_to_ptr.vmem [resolvable:$true] %s63_s8 }
  0x29   :  { %s4486_s23 = scalar_lea.hbm %s6851_s1, 16384 }
  0x2a   :  { %p4487_p2 = scmp.ne.s32.totalorder %s6851_s1, %s4486_s23  ;;  %p4490_p3 = scmp.lt.u32.totalorder %s4486_s23, %s6851_s1 }
  0x2c   :  { %p4492_p4 = pnand %p4490_p3, %p4487_p2 }
  0x2e   :  { %4495 = shalt.err (!%p4492_p4)
}
  0x2f   :  { %s4496_s7 = scalar_lea.vmem %s50_s18, 16384  ;;  %p4501_p6 = scmp.lt.s32.totalorder %s50_s18, %s50_s18 }
  0x30   :  { %p4497_p5 = scmp.ne.s32.totalorder %s50_s18, %s4496_s7  ;;  %p4502_p7 = scmp.lt.s32.totalorder %s4496_s7, %s4496_s7 }
  0x32   :  { %p4503_p8 = por %p4502_p7, %p4501_p6 }
  0x34   :  { %p4504_p9 = pnand %p4503_p8, %p4497_p5 }
  0x36   :  { %4507 = shalt.err (!%p4504_p9)
}
  0x37   :  { %55 = dma.hbm_to_vmem [thread:$0]  %s6851_s1, 16384, %s50_s18, [#allocation12], %s4537_s21, %s4537_s21, %s4538_s22  }
  0x38   :  { %s4508_s11 = scalar_lea.hbm %s6853_s3, 2048 }
  0x39   :  { %p4509_p10 = scmp.ne.s32.totalorder %s6853_s3, %s4508_s11  ;;  %p4512_p11 = scmp.lt.u32.totalorder %s4508_s11, %s6853_s3 }
  0x3b   :  { %p4514_p12 = pnand %p4512_p11, %p4509_p10 }
  0x3d   :  { %4517 = shalt.err (!%p4514_p12)
}
  0x3e   :  { %s4518_s17 = scalar_lea.vmem %s4633_s8, 2048  ;;  %p4523_p0 = scmp.lt.s32.totalorder %s4633_s8, %s4633_s8 }
  0x3f   :  { %p4519_p13 = scmp.ne.s32.totalorder %s4633_s8, %s4518_s17  ;;  %p4524_p1 = scmp.lt.s32.totalorder %s4518_s17, %s4518_s17 }
  0x41   :  { %p4525_p2 = por %p4524_p1, %p4523_p0 }
  0x43   :  { %p4526_p3 = pnand %p4525_p2, %p4519_p13 }
  0x45   :  { %4529 = shalt.err (!%p4526_p3)
}
  0x46   :  { %69 = dma.hbm_to_vmem [thread:$0]  %s6853_s3, 2048, %s4633_s8, [#allocation15], %s4540_s0, %s4540_s0, %s4541_s14  }
  0x47   :  { %4530 = dma.done.wait [#allocation10], 640  }
  0x48   :  { %4531 = vsyncadd [#allocation10], 4294966656 }
  0x49   :  { %4532 = dma.done.wait [#allocation12], 18432  }
  0x4a   :  { %4533 = vsyncadd [#allocation12], 4294948864 }
  0x4b   :  { %4534 = dma.done.wait [#allocation15], 2048  }
  0x4c   :  { %4535 = vsyncadd [#allocation15], 4294965248  ;;  %v89_v2 = vlaneseq  ;;  %v6860_v3 = vmov 0   ;;  %v252_v6 = vld [vmem:[#allocation11] sm:$0xff]  ;;  %v88_v12 = vld [vmem:[#allocation9] sm:$0xf] }
  0x4d   :  { %438 = vmatprep.mubr.bf16.mxu0 %v6860_v3  ;;  %468 = vmatprep.mubr.bf16.mxu1 %v6860_v3  ;;  %v256_v7 = vld [vmem:[#allocation11 + $0x20] sm:$0xff]  ;;  %v102_v13 = vld [vmem:[#allocation9 + $0x4] sm:$0xf]  ;;  %v177_v17 = vld [vmem:[#allocation9 + $0x18] sm:$0xf]  ;;  %vm390_vm2 = vcmask 261120  }
  0x4e   :  { %v4672_v4 = vshrl.u32 %v89_v2, 7  ;;  %v4674_v5 = vand.u32 127, %v89_v2  ;;  %v260_v8 = vld [vmem:[#allocation11 + $0x40] sm:$0xff]  ;;  %v4009_v9 = vcombine.high %v252_v6, %v256_v7  ;;  %v4008_v10 = vcombine.low %v252_v6, %v256_v7  ;;  %v192_v18 = vld [vmem:[#allocation9 + $0x1c] sm:$0xf]  ;;  %v253_v19 = vld [vmem:[#allocation11 + $0x8] sm:$0xff] }
  0x4f   :  { %v264_v11 = vld [vmem:[#allocation11 + $0x60] sm:$0xff]  ;;  %v257_v23 = vld [vmem:[#allocation11 + $0x28] sm:$0xff]  ;;  %v207_v31 = vld [vmem:[#allocation9 + $0x20] sm:$0xf]  ;;  %vm3990_vm3 = vcmask 7168  }
  0x50   :  { %vm92_vm0 = vcmp.lt.s32.totalorder %v4672_v4, 4  ;;  %vm97_vm1 = vcmp.lt.s32.totalorder %v4674_v5, 32  ;;  %v4017_v14 = vcombine.high %v260_v8, %v264_v11  ;;  %406 = vmatprep.subr.bf16.mxu0 %v4009_v9  ;;  %4213 = vmatprep.subr.bf16.mxu1 %v4009_v9  ;;  %v4016_v20 = vcombine.low %v260_v8, %v264_v11  ;;  %v117_v27 = vld [vmem:[#allocation9 + $0x8] sm:$0xf]  ;;  %v132_v30 = vld [vmem:[#allocation9 + $0xc] sm:$0xf] }
  0x51   :  { %v93_v15 = vsel %vm92_vm0, %v88_v12, %v4598_v0  ;;  %v107_v16 = vsel %vm92_vm0, %v102_v13, %v4598_v0  ;;  %v182_v22 = vsel %vm92_vm0, %v177_v17, %v4598_v0  ;;  %407 = vmatpush1.bf16.msra.mxu0 %v4008_v10  ;;  %4215 = vmatpush1.bf16.msra.mxu1 %v4008_v10  ;;  %v222_v32 = vld [vmem:[#allocation9 + $0x24] sm:$0xf]  ;;  %v261_v33 = vld [vmem:[#allocation11 + $0x48] sm:$0xff]  ;;  %v254_v38 = vld [vmem:[#allocation11 + $0x10] sm:$0xff] }
  0x52   :  { %v98_v21 = vsel %vm97_vm1, %v93_v15, %v4598_v0  ;;  %v112_v24 = vsel %vm97_vm1, %v107_v16, %v4598_v0  ;;  %v187_v25 = vsel %vm97_vm1, %v182_v22, %v4598_v0  ;;  %v197_v26 = vsel %vm92_vm0, %v192_v18, %v4598_v0  ;;  %408 = vmatprep.subr.bf16.mxu0 %v4017_v14  ;;  %v265_v34 = vld [vmem:[#allocation11 + $0x68] sm:$0xff]  ;;  %v258_v39 = vld [vmem:[#allocation11 + $0x30] sm:$0xff]  ;;  %v255_v49 = vld [vmem:[#allocation11 + $0x18] sm:$0xff] }
  0x53   :  { %4214 = vmatprep.subr.bf16.mxu1 %v4017_v14  ;;  %v202_v28 = vsel %vm97_vm1, %v197_v26, %v4598_v0  ;;  %v4011_v29 = vcombine.high %v253_v19, %v257_v23  ;;  %v4702_v35 = vpack.c.bf16 %v112_v24, %v98_v21  ;;  %v122_v37 = vsel %vm92_vm0, %v117_v27, %v4598_v0  ;;  %v262_v45 = vld [vmem:[#allocation11 + $0x50] sm:$0xff]  ;;  %v259_v50 = vld [vmem:[#allocation11 + $0x38] sm:$0xff]  ;;  %v147_v58 = vld [vmem:[#allocation9 + $0x10] sm:$0xf] }
  0x54   :  { %v4704_v36 = vpack.c.bf16 %v202_v28, %v187_v25  ;;  %v4010_v40 = vcombine.low %v253_v19, %v257_v23  ;;  %v137_v41 = vsel %vm92_vm0, %v132_v30, %v4598_v0  ;;  %v212_v42 = vsel %vm92_vm0, %v207_v31, %v4598_v0  ;;  %v266_v46 = vld [vmem:[#allocation11 + $0x70] sm:$0xff]  ;;  %v162_v59 = vld [vmem:[#allocation9 + $0x14] sm:$0xf]  ;;  %v829_v62 = vld [vmem:[#allocation13] sm:$0xff] }
  0x55   :  { %409 = vmatpush1.bf16.msra.mxu0 %v4016_v20  ;;  %4216 = vmatpush1.bf16.msra.mxu1 %v4016_v20  ;;  %v227_v43 = vsel %vm92_vm0, %v222_v32, %v4598_v0  ;;  %v4019_v44 = vcombine.high %v261_v33, %v265_v34  ;;  %v127_v47 = vsel %vm97_vm1, %v122_v37, %v4598_v0  ;;  %v833_v63 = vld [vmem:[#allocation13 + $0x20] sm:$0xff]  ;;  %v263_v10 = vld [vmem:[#allocation11 + $0x58] sm:$0xff]  ;;  %v4763_v15 = vld [vmem:[#allocation13 + $0x8] sm:$0xff] }
  0x56   :  { %489 = vmatprep.subr.bf16.mxu1 %v4011_v29  ;;  %v4013_v48 = vcombine.high %v254_v38, %v258_v39  ;;  %v142_v51 = vsel %vm97_vm1, %v137_v41, %v4598_v0  ;;  %v217_v52 = vsel %vm97_vm1, %v212_v42, %v4598_v0  ;;  %v4012_v53 = vcombine.low %v254_v38, %v258_v39  ;;  %v267_v11 = vld [vmem:[#allocation11 + $0x78] sm:$0xff]  ;;  %v4765_v16 = vld [vmem:[#allocation13 + $0x28] sm:$0xff]  ;;  %v837_v17 = vld [vmem:[#allocation13 + $0x40] sm:$0xff] }
  0x57   :  { %v232_v54 = vsel %vm97_vm1, %v227_v43, %v4598_v0  ;;  %v4018_v55 = vcombine.low %v261_v33, %v265_v34  ;;  %v4021_v56 = vcombine.high %v262_v45, %v266_v46  ;;  %v4015_v57 = vcombine.high %v255_v49, %v259_v50  ;;  %v841_v18 = vld [vmem:[#allocation13 + $0x60] sm:$0xff] }
  0x58   :  { %4024 = vmatmul.mubr.msk.bf16.vlgmr.msra.gmra.mrb[0].mxu0 %vm390_vm2, %v4702_v35  ;;  %4027 = vmatmul.mubr.msk.bf16.vlgmr.msra.gmra.mrb[0].mxu1 %vm390_vm2, %v4704_v36  ;;  %v4736_v60 = vpack.c.bf16 %v142_v51, %v127_v47  ;;  %v4738_v61 = vpack.c.bf16 %v232_v54, %v217_v52  ;;  %v152_v1 = vsel %vm92_vm0, %v147_v58, %v4598_v0  ;;  %v845_v21 = vld [vmem:[#allocation13 + $0x80] sm:$0xff]  ;;  %v842_v54 = vld [vmem:[#allocation13 + $0x68] sm:$0xff] }
  0x59   :  { %490 = vmatpush1.bf16.msra.mxu1 %v4010_v40  ;;  %448 = vmatprep.mubr.bf16.mxu0 %v6860_v3  ;;  %v167_v2 = vsel %vm92_vm0, %v162_v59, %v4598_v0  ;;  %v4020_v6 = vcombine.low %v262_v45, %v266_v46  ;;  %v4746_v7 = vcombine.high %v829_v62, %v833_v63  ;;  %v849_v22 = vld [vmem:[#allocation13 + $0xa0] sm:$0xff] }
  0x5a   :  { %478 = vmatprep.mubr.bf16.mxu1 %v6860_v3  ;;  %491 = vmatprep.subr.bf16.mxu1 %v4019_v44  ;;  %v157_v8 = vsel %vm97_vm1, %v152_v1, %v4598_v0  ;;  %v172_v9 = vsel %vm97_vm1, %v167_v2, %v4598_v0  ;;  %v4014_v13 = vcombine.low %v255_v49, %v259_v50  ;;  %v853_v25 = vld [vmem:[#allocation13 + $0xc0] sm:$0xff]  ;;  %v850_v1 = vld [vmem:[#allocation13 + $0xa8] sm:$0xff] }
  0x5b   :  { %572 = vmatprep.subr.bf16.mxu0 %v4013_v48  ;;  %7116 = vst [vmem:[#allocation20_spill] sm:$0xff] %v4746_v7  ;;  %v4761_v12 = vpack.c.bf16 %v172_v9, %v157_v8  ;;  %v4023_v14 = vcombine.high %v263_v10, %v267_v11  ;;  %v4022_v0 = vcombine.low %v263_v10, %v267_v11  ;;  %v857_v26 = vld [vmem:[#allocation13 + $0xe0] sm:$0xff]  ;;  %v854_v11 = vld [vmem:[#allocation13 + $0xc8] sm:$0xff] }
  0x5c   :  { %573 = vmatpush1.bf16.msra.mxu0 %v4012_v53  ;;  %v4775_v5 = vcombine.high %v4763_v15, %v4765_v16  ;;  %v4777_v19 = vcombine.low %v829_v62, %v833_v63  ;;  %v4779_v20 = vcombine.high %v837_v17, %v841_v18  ;;  %v4787_v23 = vcombine.low %v837_v17, %v841_v18  ;;  %v861_v29 = vld [vmem:[#allocation13 + $0x100] sm:$0xff]  ;;  %v838_v53 = vld [vmem:[#allocation13 + $0x48] sm:$0xff] }
  0x5d   :  { %492 = vmatpush1.bf16.msra.mxu1 %v4018_v55  ;;  %574 = vmatprep.subr.bf16.mxu0 %v4021_v56  ;;  %v4791_v24 = vcombine.high %v845_v21, %v849_v22  ;;  %v4795_v27 = vcombine.low %v845_v21, %v849_v22  ;;  %v4798_v28 = vcombine.high %v853_v25, %v857_v26  ;;  %v865_v30 = vld [vmem:[#allocation13 + $0x120] sm:$0xff]  ;;  %v846_v63 = vld [vmem:[#allocation13 + $0x88] sm:$0xff] }
  0x5e   :  { %655 = vmatprep.subr.bf16.mxu1 %v4015_v57  ;;  %7117 = vst [vmem:[#allocation21_spill] sm:$0xff] %v4775_v5  ;;  %7118 = vst [vmem:[#allocation22_spill] sm:$0xff] %v4777_v19  ;;  %v4805_v31 = vcombine.low %v853_v25, %v857_v26  ;;  %v4809_v32 = vcombine.high %v861_v29, %v865_v30  ;;  %v869_v33 = vld [vmem:[#allocation13 + $0x140] sm:$0xff]  ;;  %v4813_v37 = vcombine.low %v861_v29, %v865_v30  ;;  %v862_v21 = vld [vmem:[#allocation13 + $0x108] sm:$0xff] }
  0x5f   :  { %7119 = vst [vmem:[#allocation23_spill] sm:$0xff] %v4779_v20  ;;  %7120 = vst [vmem:[#allocation24_spill] sm:$0xff] %v4787_v23  ;;  %v873_v34 = vld [vmem:[#allocation13 + $0x160] sm:$0xff]  ;;  %v4853_v56 = vcombine.low %v4763_v15, %v4765_v16  ;;  %v4858_v58 = vcombine.high %v838_v53, %v842_v54  ;;  %v4874_v9 = vcombine.high %v846_v63, %v850_v1  ;;  %v866_v22 = vld [vmem:[#allocation13 + $0x128] sm:$0xff] }
  0x60   :  { %4025 = vmatmul.mubr.msk.bf16.gmra.mrb[4].mxu0 %vm390_vm2, %v4736_v60  ;;  %4028 = vmatmul.mubr.msk.bf16.gmra.mrb[4].mxu1 %vm390_vm2, %v4738_v61  ;;  %7121 = vst [vmem:[#allocation25_spill] sm:$0xff] %v4791_v24  ;;  %7122 = vst [vmem:[#allocation26_spill] sm:$0xff] %v4795_v27  ;;  %v877_v38 = vld [vmem:[#allocation13 + $0x180] sm:$0xff]  ;;  %v4816_v39 = vcombine.high %v869_v33, %v873_v34  ;;  %v4823_v41 = vcombine.low %v869_v33, %v873_v34 }
  0x61   :  { %458 = vmatprep.mubr.bf16.mxu0 %v6860_v3  ;;  %521 = vmatprep.mubr.bf16.mxu1 %v6860_v3  ;;  %7123 = vst [vmem:[#allocation27_spill] sm:$0xff] %v4798_v28  ;;  %7124 = vst [vmem:[#allocation28_spill] sm:$0xff] %v4805_v31  ;;  %v881_v40 = vld [vmem:[#allocation13 + $0x1a0] sm:$0xff]  ;;  %v4882_v15 = vcombine.low %v846_v63, %v850_v1  ;;  %v4902_v30 = vcombine.high %v862_v21, %v866_v22 }
  0x62   :  { %575 = vmatpush1.bf16.msra.mxu0 %v4020_v6  ;;  %7125 = vst [vmem:[#allocation29_spill] sm:$0xff] %v4809_v32  ;;  %7126 = vst [vmem:[#allocation30_spill] sm:$0xff] %v4813_v37  ;;  %v885_v42 = vld [vmem:[#allocation13 + $0x1c0] sm:$0xff]  ;;  %v4827_v44 = vcombine.high %v877_v38, %v881_v40  ;;  %v4831_v45 = vcombine.low %v877_v38, %v881_v40  ;;  %v4868_v6 = vcombine.low %v838_v53, %v842_v54  ;;  %v870_v38 = vld [vmem:[#allocation13 + $0x148] sm:$0xff] }
  0x63   :  { %1597 = vmatprep.subr.bf16.mxu0 %v4746_v7  ;;  %7127 = vst [vmem:[#allocation31_spill] sm:$0xff] %v4816_v39  ;;  %7128 = vst [vmem:[#allocation32_spill] sm:$0xff] %v4823_v41  ;;  %v889_v43 = vld [vmem:[#allocation13 + $0x1e0] sm:$0xff]  ;;  %v882_v53 = vld [vmem:[#allocation13 + $0x1a8] sm:$0xff] }
  0x64   :  { %7129 = vst [vmem:[#allocation33_spill] sm:$0xff] %v4827_v44  ;;  %7130 = vst [vmem:[#allocation34_spill] sm:$0xff] %v4831_v45  ;;  %v893_v46 = vld [vmem:[#allocation13 + $0x200] sm:$0xff]  ;;  %v4834_v48 = vcombine.high %v885_v42, %v889_v43  ;;  %v4841_v49 = vcombine.low %v885_v42, %v889_v43  ;;  %v4909_v42 = vcombine.low %v862_v21, %v866_v22  ;;  %v894_v21 = vld [vmem:[#allocation13 + $0x208] sm:$0xff] }
  0x65   :  { %v897_v47 = vld [vmem:[#allocation13 + $0x220] sm:$0xff]  ;;  %7135 = vst [vmem:[#allocation39_spill] sm:$0xff] %v4853_v56  ;;  %7137 = vst [vmem:[#allocation41_spill] sm:$0xff] %v4858_v58  ;;  %v898_v22 = vld [vmem:[#allocation13 + $0x228] sm:$0xff] }
  0x66   :  { %7131 = vst [vmem:[#allocation35_spill] sm:$0xff] %v4834_v48  ;;  %7132 = vst [vmem:[#allocation36_spill] sm:$0xff] %v4841_v49  ;;  %v901_v50 = vld [vmem:[#allocation13 + $0x240] sm:$0xff]  ;;  %v4845_v51 = vcombine.high %v893_v46, %v897_v47  ;;  %v4849_v55 = vcombine.low %v893_v46, %v897_v47 }
  0x67   :  { %v905_v52 = vld [vmem:[#allocation13 + $0x260] sm:$0xff]  ;;  %7139 = vst [vmem:[#allocation43_spill] sm:$0xff] %v4868_v6  ;;  %7141 = vst [vmem:[#allocation45_spill] sm:$0xff] %v4874_v9 }
  0x68   :  { %4026 = vmatmul.mubr.msk.bf16.gmra.mrb[8].mxu0 %vm390_vm2, %v4761_v12  ;;  %4029 = vmatmul.mubr.msk.bf16.vlgmr.msra.gmra.mrb[8].mxu1 %vm390_vm2, %v4702_v35  ;;  %7133 = vst [vmem:[#allocation37_spill] sm:$0xff] %v4845_v51  ;;  %7134 = vst [vmem:[#allocation38_spill] sm:$0xff] %v4849_v55  ;;  %v4856_v57 = vcombine.high %v901_v50, %v905_v52  ;;  %v909_v59 = vld [vmem:[#allocation13 + $0x280] sm:$0xff]  ;;  %v4866_v2 = vcombine.low %v901_v50, %v905_v52  ;;  %v878_v52 = vld [vmem:[#allocation13 + $0x188] sm:$0xff] }
  0x69   :  { %656 = vmatpush1.bf16.msra.mxu1 %v4014_v13  ;;  %531 = vmatprep.mubr.bf16.mxu1 %v6860_v3  ;;  %v913_v62 = vld [vmem:[#allocation13 + $0x2a0] sm:$0xff]  ;;  %v858_v13 = vld [vmem:[#allocation13 + $0xe8] sm:$0xff]  ;;  %7143 = vst [vmem:[#allocation47_spill] sm:$0xff] %v4882_v15  ;;  %7149 = vst [vmem:[#allocation53_spill] sm:$0xff] %v4902_v30  ;;  %v4929_v63 = vcombine.high %v878_v52, %v882_v53 }
  0x6a   :  { %604 = vmatprep.mubr.bf16.mxu0 %v6860_v3  ;;  %657 = vmatprep.subr.bf16.mxu1 %v4023_v14  ;;  %7136 = vst [vmem:[#allocation40_spill] sm:$0xff] %v4856_v57  ;;  %7138 = vst [vmem:[#allocation42_spill] sm:$0xff] %v4866_v2  ;;  %v4872_v8 = vcombine.high %v909_v59, %v913_v62  ;;  %v921_v10 = vld [vmem:[#allocation13 + $0x2e0] sm:$0xff]  ;;  %v4880_v14 = vcombine.low %v909_v59, %v913_v62 }
  0x6b   :  { %v925_v17 = vld [vmem:[#allocation13 + $0x300] sm:$0xff]  ;;  %v4896_v26 = vcombine.low %v854_v11, %v858_v13  ;;  %7151 = vst [vmem:[#allocation55_spill] sm:$0xff] %v4909_v42  ;;  %7157 = vst [vmem:[#allocation61_spill] sm:$0xff] %v4929_v63 }
  0x6c   :  { %7140 = vst [vmem:[#allocation44_spill] sm:$0xff] %v4872_v8  ;;  %7142 = vst [vmem:[#allocation46_spill] sm:$0xff] %v4880_v14  ;;  %v929_v18 = vld [vmem:[#allocation13 + $0x320] sm:$0xff] }
  0x6d   :  { %658 = vmatpush1.bf16.msra.mxu1 %v4022_v0  ;;  %v4888_v0 = vcombine.high %v854_v11, %v858_v13  ;;  %7147 = vst [vmem:[#allocation51_spill] sm:$0xff] %v4896_v26  ;;  %v4900_v29 = vcombine.high %v925_v17, %v929_v18  ;;  %v933_v33 = vld [vmem:[#allocation13 + $0x340] sm:$0xff]  ;;  %v4907_v40 = vcombine.low %v925_v17, %v929_v18 }
  0x6e   :  { %1638 = vmatprep.subr.bf16.mxu1 %v4775_v5  ;;  %v937_v34 = vld [vmem:[#allocation13 + $0x360] sm:$0xff]  ;;  %v4936_v13 = vcombine.low %v878_v52, %v882_v53  ;;  %v902_v52 = vld [vmem:[#allocation13 + $0x248] sm:$0xff] }
  0x6f   :  { %7145 = vst [vmem:[#allocation49_spill] sm:$0xff] %v4888_v0  ;;  %7148 = vst [vmem:[#allocation52_spill] sm:$0xff] %v4900_v29  ;;  %v4913_v43 = vcombine.high %v933_v33, %v937_v34  ;;  %v941_v47 = vld [vmem:[#allocation13 + $0x380] sm:$0xff]  ;;  %v4921_v54 = vcombine.low %v933_v33, %v937_v34  ;;  %v831_v33 = vld [vmem:[#allocation13 + $0x10] sm:$0xff] }
  0x70   :  { %4030 = vmatmul.mubr.msk.bf16.gmra.mrb[12].mxu1 %vm390_vm2, %v4736_v60  ;;  %4034 = vmatmul.mubr.msk.bf16.vlgmr.msra.gmra.mrb[12].mxu0 %vm390_vm2, %v4702_v35  ;;  %7150 = vst [vmem:[#allocation54_spill] sm:$0xff] %v4907_v40  ;;  %v945_v50 = vld [vmem:[#allocation13 + $0x3a0] sm:$0xff]  ;;  %7159 = vst [vmem:[#allocation63_spill] sm:$0xff] %v4936_v13  ;;  %v835_v34 = vld [vmem:[#allocation13 + $0x30] sm:$0xff] }
  0x71   :  { %1598 = vmatpush1.bf16.msra.mxu0 %v4777_v19  ;;  %541 = vmatprep.mubr.bf16.mxu1 %v6860_v3  ;;  %7152 = vst [vmem:[#allocation56_spill] sm:$0xff] %v4913_v43  ;;  %7154 = vst [vmem:[#allocation58_spill] sm:$0xff] %v4921_v54  ;;  %v4927_v62 = vcombine.high %v941_v47, %v945_v50  ;;  %v949_v1 = vld [vmem:[#allocation13 + $0x3c0] sm:$0xff]  ;;  %v4934_v11 = vcombine.low %v941_v47, %v945_v50  ;;  %v906_v53 = vld [vmem:[#allocation13 + $0x268] sm:$0xff] }
  0x72   :  { %1599 = vmatprep.subr.bf16.mxu0 %v4779_v20  ;;  %614 = vmatprep.mubr.bf16.mxu0 %v6860_v3  ;;  %v4954_v47 = vcombine.high %v894_v21, %v898_v22  ;;  %v4956_v50 = vcombine.high %v831_v33, %v835_v34 }
  0x73   :  { %7156 = vst [vmem:[#allocation60_spill] sm:$0xff] %v4927_v62  ;;  %7158 = vst [vmem:[#allocation62_spill] sm:$0xff] %v4934_v11 }
  0x74   :  { %7164 = vst [vmem:[#allocation68_spill] sm:$0xff] %v4954_v47  ;;  %7165 = vst [vmem:[#allocation69_spill] sm:$0xff] %v4956_v50 }
  0x75   :  { %1600 = vmatpush1.bf16.msra.mxu0 %v4787_v23 }
  0x76   :  { %1601 = vmatprep.subr.bf16.mxu0 %v4791_v24 }
  0x78   :  { %4031 = vmatmul.mubr.msk.bf16.gmra.mrb[16].mxu1 %vm390_vm2, %v4761_v12  ;;  %4035 = vmatmul.mubr.msk.bf16.gmra.mrb[16].mxu0 %vm390_vm2, %v4736_v60 }
  0x79   :  { %1602 = vmatpush1.bf16.msra.mxu0 %v4795_v27  ;;  %551 = vmatprep.mubr.bf16.mxu1 %v6860_v3 }
  0x7a   :  { %1603 = vmatprep.subr.bf16.mxu0 %v4798_v28  ;;  %624 = vmatprep.mubr.bf16.mxu0 %v6860_v3 }
  0x7d   :  { %1604 = vmatpush1.bf16.msra.mxu0 %v4805_v31 }
  0x7e   :  { %1605 = vmatprep.subr.bf16.mxu0 %v4809_v32 }
  0x80   :  { %4032 = vmatmul.mubr.msk.bf16.gmra.mrb[20].mxu1 %vm390_vm2, %v4704_v36  ;;  %4036 = vmatmul.mubr.msk.bf16.gmra.mrb[20].mxu0 %vm390_vm2, %v4761_v12 }
  0x81   :  { %1606 = vmatpush1.bf16.msra.mxu0 %v4813_v37  ;;  %561 = vmatprep.mubr.bf16.mxu1 %v6860_v3 }
  0x82   :  { %1607 = vmatprep.subr.bf16.mxu0 %v4816_v39  ;;  %634 = vmatprep.mubr.bf16.mxu0 %v6860_v3 }
  0x85   :  { %1608 = vmatpush1.bf16.msra.mxu0 %v4823_v41 }
  0x86   :  { %1609 = vmatprep.subr.bf16.mxu0 %v4827_v44 }
  0x88   :  { %4033 = vmatmul.mubr.msk.bf16.gmra.mrb[24].mxu1 %vm390_vm2, %v4738_v61  ;;  %4037 = vmatmul.mubr.msk.bf16.gmra.mrb[24].mxu0 %vm390_vm2, %v4704_v36 }
  0x89   :  { %1610 = vmatpush1.bf16.msra.mxu0 %v4831_v45  ;;  %687 = vmatprep.mubr.bf16.mxu1 %v6860_v3 }
  0x8a   :  { %1611 = vmatprep.subr.bf16.mxu0 %v4834_v48  ;;  %644 = vmatprep.mubr.bf16.mxu0 %v6860_v3 }
  0x8d   :  { %1612 = vmatpush1.bf16.msra.mxu0 %v4841_v49 }
  0x8e   :  { %1613 = vmatprep.subr.bf16.mxu0 %v4845_v51 }
  0x90   :  { %4039 = vmatmul.mubr.msk.bf16.vlgmr.msra.gmra.mrb[28].mxu1 %vm390_vm2, %v4702_v35  ;;  %4038 = vmatmul.mubr.msk.bf16.gmra.mrb[28].mxu0 %vm390_vm2, %v4738_v61  ;;  %v917_v35 = vld [vmem:[#allocation13 + $0x2c0] sm:$0xff] }
  0x91   :  { %1614 = vmatpush1.bf16.msra.mxu0 %v4849_v55  ;;  %1639 = vmatpush1.bf16.msra.mxu1 %v4853_v56  ;;  %v4886_v16 = vcombine.high %v917_v35, %v921_v10  ;;  %v4894_v25 = vcombine.low %v917_v35, %v921_v10  ;;  %v953_v35 = vld [vmem:[#allocation13 + $0x3e0] sm:$0xff]  ;;  %v886_v10 = vld [vmem:[#allocation13 + $0x1c8] sm:$0xff] }
  0x92   :  { %1615 = vmatprep.subr.bf16.mxu0 %v4856_v57  ;;  %1640 = vmatprep.subr.bf16.mxu1 %v4858_v58  ;;  %v4940_v17 = vcombine.high %v949_v1, %v953_v35 }
  0x93   :  { %697 = vmatprep.mubr.bf16.mxu1 %v6860_v3  ;;  %1629 = vmatprep.mubr.bf16.mxu0 %v6860_v3  ;;  %7144 = vst [vmem:[#allocation48_spill] sm:$0xff] %v4886_v16  ;;  %7146 = vst [vmem:[#allocation50_spill] sm:$0xff] %v4894_v25 }
  0x94   :  { %7160 = vst [vmem:[#allocation64_spill] sm:$0xff] %v4940_v17 }
  0x95   :  { %1616 = vmatpush1.bf16.msra.mxu0 %v4866_v2  ;;  %1641 = vmatpush1.bf16.msra.mxu1 %v4868_v6 }
  0x96   :  { %1617 = vmatprep.subr.bf16.mxu0 %v4872_v8  ;;  %1642 = vmatprep.subr.bf16.mxu1 %v4874_v9 }
  0x98   :  { %4040 = vmatmul.mubr.msk.bf16.gmra.mrb[32].mxu1 %vm390_vm2, %v4736_v60  ;;  %v874_v60 = vld [vmem:[#allocation13 + $0x168] sm:$0xff] }
  0x99   :  { %1618 = vmatpush1.bf16.msra.mxu0 %v4880_v14  ;;  %1643 = vmatpush1.bf16.msra.mxu1 %v4882_v15  ;;  %v4915_v46 = vcombine.high %v870_v38, %v874_v60  ;;  %v4923_v59 = vcombine.low %v870_v38, %v874_v60  ;;  %v4948_v38 = vcombine.low %v949_v1, %v953_v35 }
  0x9a   :  { %1619 = vmatprep.subr.bf16.mxu0 %v4886_v16  ;;  %1644 = vmatprep.subr.bf16.mxu1 %v4888_v0  ;;  %v4961_v1 = vcombine.low %v894_v21, %v898_v22  ;;  %v4963_v35 = vcombine.low %v831_v33, %v835_v34  ;;  %v4976_v21 = vcombine.low %v902_v52, %v906_v53 }
  0x9b   :  { %707 = vmatprep.mubr.bf16.mxu1 %v6860_v3  ;;  %7153 = vst [vmem:[#allocation57_spill] sm:$0xff] %v4915_v46  ;;  %7155 = vst [vmem:[#allocation59_spill] sm:$0xff] %v4923_v59 }
  0x9c   :  { %7162 = vst [vmem:[#allocation66_spill] sm:$0xff] %v4948_v38  ;;  %7167 = vst [vmem:[#allocation70_spill] sm:$0xff] %v4961_v1 }
  0x9d   :  { %1620 = vmatpush1.bf16.msra.mxu0 %v4894_v25  ;;  %1645 = vmatpush1.bf16.msra.mxu1 %v4896_v26  ;;  %7168 = vst [vmem:[#allocation71_spill] sm:$0xff] %v4963_v35  ;;  %7171 = vst [vmem:[#allocation74_spill] sm:$0xff] %v4976_v21 }
  0x9e   :  { %1621 = vmatprep.subr.bf16.mxu0 %v4900_v29  ;;  %1646 = vmatprep.subr.bf16.mxu1 %v4902_v30 }
  0xa0   :  { %4041 = vmatmul.mubr.msk.bf16.gmra.mrb[36].mxu1 %vm390_vm2, %v4761_v12  ;;  %v890_v12 = vld [vmem:[#allocation13 + $0x1e8] sm:$0xff] }
  0xa1   :  { %1622 = vmatpush1.bf16.msra.mxu0 %v4907_v40  ;;  %1647 = vmatpush1.bf16.msra.mxu1 %v4909_v42  ;;  %v4942_v18 = vcombine.high %v886_v10, %v890_v12  ;;  %v4950_v60 = vcombine.low %v886_v10, %v890_v12  ;;  %v4967_v10 = vcombine.high %v902_v52, %v906_v53 }
  0xa2   :  { %1623 = vmatprep.subr.bf16.mxu0 %v4913_v43  ;;  %1648 = vmatprep.subr.bf16.mxu1 %v4915_v46 }
  0xa3   :  { %717 = vmatprep.mubr.bf16.mxu1 %v6860_v3  ;;  %7161 = vst [vmem:[#allocation65_spill] sm:$0xff] %v4942_v18  ;;  %7163 = vst [vmem:[#allocation67_spill] sm:$0xff] %v4950_v60  ;;  %v839_v3 = vld [vmem:[#allocation13 + $0x50] sm:$0xff] }
  0xa4   :  { %7169 = vst [vmem:[#allocation72_spill] sm:$0xff] %v4967_v10 }
  0xa5   :  { %1624 = vmatpush1.bf16.msra.mxu0 %v4921_v54  ;;  %1649 = vmatpush1.bf16.msra.mxu1 %v4923_v59 }
  0xa6   :  { %1625 = vmatprep.subr.bf16.mxu0 %v4927_v62  ;;  %1650 = vmatprep.subr.bf16.mxu1 %v4929_v63  ;;  %v7166_v62 = vmov 0  }
  0xa8   :  { %4042 = vmatmul.mubr.msk.bf16.gmra.mrb[40].mxu1 %vm390_vm2, %v4704_v36  ;;  %v843_v36 = vld [vmem:[#allocation13 + $0x70] sm:$0xff] }
  0xa9   :  { %1626 = vmatpush1.bf16.msra.mxu0 %v4934_v11  ;;  %1651 = vmatpush1.bf16.msra.mxu1 %v4936_v13  ;;  %v4969_v12 = vcombine.high %v839_v3, %v843_v36  ;;  %v847_v11 = vld [vmem:[#allocation13 + $0x90] sm:$0xff]  ;;  %v4978_v22 = vcombine.low %v839_v3, %v843_v36 }
  0xaa   :  { %1627 = vmatprep.subr.bf16.mxu0 %v4940_v17  ;;  %1652 = vmatprep.subr.bf16.mxu1 %v4942_v18  ;;  %v910_v17 = vld [vmem:[#allocation13 + $0x288] sm:$0xff]  ;;  %v851_v13 = vld [vmem:[#allocation13 + $0xb0] sm:$0xff] }
  0xab   :  { %727 = vmatprep.mubr.bf16.mxu1 %v7166_v62  ;;  %7170 = vst [vmem:[#allocation73_spill] sm:$0xff] %v4969_v12  ;;  %v914_v18 = vld [vmem:[#allocation13 + $0x2a8] sm:$0xff]  ;;  %7172 = vst [vmem:[#allocation75_spill] sm:$0xff] %v4978_v22  ;;  %v4984_v34 = vcombine.high %v847_v11, %v851_v13  ;;  %v4992_v52 = vcombine.low %v847_v11, %v851_v13 }
  0xac   :  { %v4982_v33 = vcombine.high %v910_v17, %v914_v18  ;;  %v4990_v3 = vcombine.low %v910_v17, %v914_v18 }
  0xad   :  { %1628 = vmatpush1.bf16.msra.mxu0 %v4948_v38  ;;  %1653 = vmatpush1.bf16.msra.mxu1 %v4950_v60  ;;  %7174 = vst [vmem:[#allocation77_spill] sm:$0xff] %v4984_v34  ;;  %v855_v38 = vld [vmem:[#allocation13 + $0xd0] sm:$0xff]  ;;  %7176 = vst [vmem:[#allocation79_spill] sm:$0xff] %v4992_v52 }
  0xae   :  { %1654 = vmatprep.subr.bf16.mxu1 %v4954_v47  ;;  %1679 = vmatprep.subr.bf16.mxu0 %v4956_v50  ;;  %7173 = vst [vmem:[#allocation76_spill] sm:$0xff] %v4982_v33  ;;  %v918_v50 = vld [vmem:[#allocation13 + $0x2c8] sm:$0xff]  ;;  %7175 = vst [vmem:[#allocation78_spill] sm:$0xff] %v4990_v3 }
  0xaf   :  { %v922_v47 = vld [vmem:[#allocation13 + $0x2e8] sm:$0xff] }
  0xb0   :  { %1630 = vmatmul.mubr.bf16.vlgmr.msra.gmra.mrb[32].mxu0 %v7166_v62  ;;  %4043 = vmatmul.mubr.msk.bf16.gmra.mrb[44].mxu1 %vm390_vm2, %v4738_v61  ;;  %v859_v61 = vld [vmem:[#allocation13 + $0xf0] sm:$0xff]  ;;  %v4996_v53 = vcombine.high %v918_v50, %v922_v47  ;;  %v5002_v17 = vcombine.low %v918_v50, %v922_v47 }
  0xb1   :  { %1655 = vmatpush1.bf16.msra.mxu1 %v4961_v1  ;;  %1680 = vmatpush1.bf16.msra.mxu0 %v4963_v35  ;;  %v4998_v36 = vcombine.high %v855_v38, %v859_v61  ;;  %v930_v35 = vld [vmem:[#allocation13 + $0x328] sm:$0xff]  ;;  %v867_v1 = vld [vmem:[#allocation13 + $0x130] sm:$0xff]  ;;  %v5004_v11 = vcombine.low %v855_v38, %v859_v61 }
  0xb2   :  { %1656 = vmatprep.subr.bf16.mxu1 %v4967_v10  ;;  %1681 = vmatprep.subr.bf16.mxu0 %v4969_v12  ;;  %7177 = vst [vmem:[#allocation80_spill] sm:$0xff] %v4996_v53  ;;  %v926_v12 = vld [vmem:[#allocation13 + $0x308] sm:$0xff]  ;;  %v863_v10 = vld [vmem:[#allocation13 + $0x110] sm:$0xff]  ;;  %7179 = vst [vmem:[#allocation82_spill] sm:$0xff] %v5002_v17 }
  0xb3   :  { %1670 = vmatprep.mubr.bf16.mxu1 %v7166_v62  ;;  %1711 = vmatprep.mubr.bf16.mxu0 %v7166_v62  ;;  %7178 = vst [vmem:[#allocation81_spill] sm:$0xff] %v4998_v36  ;;  %7180 = vst [vmem:[#allocation83_spill] sm:$0xff] %v5004_v11  ;;  %v5008_v13 = vcombine.high %v926_v12, %v930_v35  ;;  %v5010_v18 = vcombine.high %v863_v10, %v867_v1 }
  0xb4   :  { %v5014_v47 = vcombine.low %v926_v12, %v930_v35  ;;  %v5016_v38 = vcombine.low %v863_v10, %v867_v1 }
  0xb5   :  { %1657 = vmatpush1.bf16.msra.mxu1 %v4976_v21  ;;  %1682 = vmatpush1.bf16.msra.mxu0 %v4978_v22  ;;  %7181 = vst [vmem:[#allocation84_spill] sm:$0xff] %v5008_v13  ;;  %7182 = vst [vmem:[#allocation85_spill] sm:$0xff] %v5010_v18  ;;  %v938_v22 = vld [vmem:[#allocation13 + $0x368] sm:$0xff]  ;;  %v875_v21 = vld [vmem:[#allocation13 + $0x170] sm:$0xff] }
  0xb6   :  { %1658 = vmatprep.subr.bf16.mxu1 %v4982_v33  ;;  %1683 = vmatprep.subr.bf16.mxu0 %v4984_v34  ;;  %v934_v34 = vld [vmem:[#allocation13 + $0x348] sm:$0xff]  ;;  %v871_v33 = vld [vmem:[#allocation13 + $0x150] sm:$0xff]  ;;  %7183 = vst [vmem:[#allocation86_spill] sm:$0xff] %v5014_v47  ;;  %7184 = vst [vmem:[#allocation87_spill] sm:$0xff] %v5016_v38 }
  0xb7   :  { %v5020_v50 = vcombine.high %v934_v34, %v938_v22  ;;  %v5022_v61 = vcombine.high %v871_v33, %v875_v21  ;;  %v5026_v35 = vcombine.low %v934_v34, %v938_v22  ;;  %v5028_v1 = vcombine.low %v871_v33, %v875_v21 }
  0xb9   :  { %1659 = vmatpush1.bf16.msra.mxu1 %v4990_v3  ;;  %1684 = vmatpush1.bf16.msra.mxu0 %v4992_v52  ;;  %7185 = vst [vmem:[#allocation88_spill] sm:$0xff] %v5020_v50  ;;  %7186 = vst [vmem:[#allocation89_spill] sm:$0xff] %v5022_v61  ;;  %v946_v52 = vld [vmem:[#allocation13 + $0x3a8] sm:$0xff]  ;;  %v883_v3 = vld [vmem:[#allocation13 + $0x1b0] sm:$0xff] }
  0xba   :  { %1660 = vmatprep.subr.bf16.mxu1 %v4996_v53  ;;  %1685 = vmatprep.subr.bf16.mxu0 %v4998_v36  ;;  %v942_v36 = vld [vmem:[#allocation13 + $0x388] sm:$0xff]  ;;  %v879_v53 = vld [vmem:[#allocation13 + $0x190] sm:$0xff]  ;;  %7187 = vst [vmem:[#allocation90_spill] sm:$0xff] %v5026_v35  ;;  %7188 = vst [vmem:[#allocation91_spill] sm:$0xff] %v5028_v1 }
  0xbb   :  { %v5032_v10 = vcombine.high %v942_v36, %v946_v52  ;;  %v5034_v12 = vcombine.high %v879_v53, %v883_v3  ;;  %v5038_v22 = vcombine.low %v942_v36, %v946_v52  ;;  %v5040_v21 = vcombine.low %v879_v53, %v883_v3 }
  0xbd   :  { %1661 = vmatpush1.bf16.msra.mxu1 %v5002_v17  ;;  %1686 = vmatpush1.bf16.msra.mxu0 %v5004_v11  ;;  %7189 = vst [vmem:[#allocation92_spill] sm:$0xff] %v5032_v10  ;;  %7190 = vst [vmem:[#allocation93_spill] sm:$0xff] %v5034_v12  ;;  %v954_v11 = vld [vmem:[#allocation13 + $0x3e8] sm:$0xff]  ;;  %v891_v17 = vld [vmem:[#allocation13 + $0x1f0] sm:$0xff] }
  0xbe   :  { %1662 = vmatprep.subr.bf16.mxu1 %v5008_v13  ;;  %1687 = vmatprep.subr.bf16.mxu0 %v5010_v18  ;;  %v950_v18 = vld [vmem:[#allocation13 + $0x3c8] sm:$0xff]  ;;  %v887_v13 = vld [vmem:[#allocation13 + $0x1d0] sm:$0xff]  ;;  %7191 = vst [vmem:[#allocation94_spill] sm:$0xff] %v5038_v22  ;;  %7192 = vst [vmem:[#allocation95_spill] sm:$0xff] %v5040_v21 }
  0xbf   :  { %v5044_v33 = vcombine.high %v950_v18, %v954_v11  ;;  %v5046_v34 = vcombine.high %v887_v13, %v891_v17  ;;  %v5050_v52 = vcombine.low %v950_v18, %v954_v11  ;;  %v5052_v3 = vcombine.low %v887_v13, %v891_v17 }
  0xc1   :  { %1663 = vmatpush1.bf16.msra.mxu1 %v5014_v47  ;;  %1688 = vmatpush1.bf16.msra.mxu0 %v5016_v38  ;;  %7193 = vst [vmem:[#allocation96_spill] sm:$0xff] %v5044_v33  ;;  %7194 = vst [vmem:[#allocation97_spill] sm:$0xff] %v5046_v34  ;;  %v899_v38 = vld [vmem:[#allocation13 + $0x230] sm:$0xff]  ;;  %v836_v47 = vld [vmem:[#allocation13 + $0x38] sm:$0xff] }
  0xc2   :  { %1664 = vmatprep.subr.bf16.mxu1 %v5020_v50  ;;  %1689 = vmatprep.subr.bf16.mxu0 %v5022_v61  ;;  %v895_v61 = vld [vmem:[#allocation13 + $0x210] sm:$0xff]  ;;  %v832_v50 = vld [vmem:[#allocation13 + $0x18] sm:$0xff]  ;;  %7195 = vst [vmem:[#allocation98_spill] sm:$0xff] %v5050_v52  ;;  %7196 = vst [vmem:[#allocation99_spill] sm:$0xff] %v5052_v3 }
  0xc3   :  { %v5056_v53 = vcombine.high %v895_v61, %v899_v38  ;;  %v5058_v36 = vcombine.high %v832_v50, %v836_v47  ;;  %v5062_v11 = vcombine.low %v895_v61, %v899_v38  ;;  %v5064_v17 = vcombine.low %v832_v50, %v836_v47 }
  0xc5   :  { %1665 = vmatpush1.bf16.msra.mxu1 %v5026_v35  ;;  %1690 = vmatpush1.bf16.msra.mxu0 %v5028_v1  ;;  %7197 = vst [vmem:[#allocation100_spill] sm:$0xff] %v5056_v53  ;;  %7198 = vst [vmem:[#allocation101_spill] sm:$0xff] %v5058_v36  ;;  %v907_v1 = vld [vmem:[#allocation13 + $0x270] sm:$0xff]  ;;  %v844_v35 = vld [vmem:[#allocation13 + $0x78] sm:$0xff] }
  0xc6   :  { %1666 = vmatprep.subr.bf16.mxu1 %v5032_v10  ;;  %1691 = vmatprep.subr.bf16.mxu0 %v5034_v12  ;;  %v903_v12 = vld [vmem:[#allocation13 + $0x250] sm:$0xff]  ;;  %v840_v10 = vld [vmem:[#allocation13 + $0x58] sm:$0xff]  ;;  %7199 = vst [vmem:[#allocation102_spill] sm:$0xff] %v5062_v11  ;;  %7200 = vst [vmem:[#allocation103_spill] sm:$0xff] %v5064_v17 }
  0xc7   :  { %v5068_v13 = vcombine.high %v903_v12, %v907_v1  ;;  %v5070_v18 = vcombine.high %v840_v10, %v844_v35  ;;  %v5075_v47 = vcombine.low %v903_v12, %v907_v1  ;;  %v5077_v38 = vcombine.low %v840_v10, %v844_v35 }
  0xc9   :  { %1667 = vmatpush1.bf16.msra.mxu1 %v5038_v22  ;;  %1692 = vmatpush1.bf16.msra.mxu0 %v5040_v21  ;;  %7201 = vst [vmem:[#allocation104_spill] sm:$0xff] %v5068_v13  ;;  %7202 = vst [vmem:[#allocation105_spill] sm:$0xff] %v5070_v18  ;;  %v915_v21 = vld [vmem:[#allocation13 + $0x2b0] sm:$0xff]  ;;  %v852_v22 = vld [vmem:[#allocation13 + $0xb8] sm:$0xff] }
  0xca   :  { %1668 = vmatprep.subr.bf16.mxu1 %v5044_v33  ;;  %1693 = vmatprep.subr.bf16.mxu0 %v5046_v34  ;;  %v911_v34 = vld [vmem:[#allocation13 + $0x290] sm:$0xff]  ;;  %v848_v33 = vld [vmem:[#allocation13 + $0x98] sm:$0xff]  ;;  %7203 = vst [vmem:[#allocation106_spill] sm:$0xff] %v5075_v47  ;;  %7204 = vst [vmem:[#allocation107_spill] sm:$0xff] %v5077_v38 }
  0xcb   :  { %v5081_v50 = vcombine.high %v911_v34, %v915_v21  ;;  %v5083_v61 = vcombine.high %v848_v33, %v852_v22  ;;  %v5088_v35 = vcombine.low %v911_v34, %v915_v21  ;;  %v5090_v1 = vcombine.low %v848_v33, %v852_v22 }
  0xcd   :  { %1669 = vmatpush1.bf16.msra.mxu1 %v5050_v52  ;;  %1694 = vmatpush1.bf16.msra.mxu0 %v5052_v3  ;;  %7205 = vst [vmem:[#allocation108_spill] sm:$0xff] %v5081_v50  ;;  %7206 = vst [vmem:[#allocation109_spill] sm:$0xff] %v5083_v61  ;;  %v923_v3 = vld [vmem:[#allocation13 + $0x2f0] sm:$0xff]  ;;  %v860_v52 = vld [vmem:[#allocation13 + $0xf8] sm:$0xff] }
  0xce   :  { %1695 = vmatprep.subr.bf16.mxu0 %v5056_v53  ;;  %1720 = vmatprep.subr.bf16.mxu1 %v5058_v36  ;;  %v919_v53 = vld [vmem:[#allocation13 + $0x2d0] sm:$0xff]  ;;  %v856_v36 = vld [vmem:[#allocation13 + $0xd8] sm:$0xff]  ;;  %7207 = vst [vmem:[#allocation110_spill] sm:$0xff] %v5088_v35  ;;  %7208 = vst [vmem:[#allocation111_spill] sm:$0xff] %v5090_v1 }
  0xcf   :  { %v5094_v10 = vcombine.high %v919_v53, %v923_v3  ;;  %v5096_v12 = vcombine.high %v856_v36, %v860_v52  ;;  %v5100_v21 = vcombine.low %v919_v53, %v923_v3  ;;  %v5102_v22 = vcombine.low %v856_v36, %v860_v52 }
  0xd0   :  { %1671 = vmatmul.mubr.bf16.vlgmr.msra.gmra.mrb[48].mxu1 %v7166_v62 }
  0xd1   :  { %1696 = vmatpush1.bf16.msra.mxu0 %v5062_v11  ;;  %1721 = vmatpush1.bf16.msra.mxu1 %v5064_v17  ;;  %7209 = vst [vmem:[#allocation112_spill] sm:$0xff] %v5094_v10  ;;  %7210 = vst [vmem:[#allocation113_spill] sm:$0xff] %v5096_v12  ;;  %v931_v11 = vld [vmem:[#allocation13 + $0x330] sm:$0xff]  ;;  %v868_v17 = vld [vmem:[#allocation13 + $0x138] sm:$0xff] }
  0xd2   :  { %1697 = vmatprep.subr.bf16.mxu0 %v5068_v13  ;;  %1722 = vmatprep.subr.bf16.mxu1 %v5070_v18  ;;  %v927_v13 = vld [vmem:[#allocation13 + $0x310] sm:$0xff]  ;;  %v864_v18 = vld [vmem:[#allocation13 + $0x118] sm:$0xff]  ;;  %7211 = vst [vmem:[#allocation114_spill] sm:$0xff] %v5100_v21  ;;  %7212 = vst [vmem:[#allocation115_spill] sm:$0xff] %v5102_v22 }
  0xd3   :  { %1752 = vmatprep.mubr.bf16.mxu1 %v7166_v62  ;;  %v5106_v33 = vcombine.high %v927_v13, %v931_v11  ;;  %v5108_v34 = vcombine.high %v864_v18, %v868_v17  ;;  %v5112_v3 = vcombine.low %v927_v13, %v931_v11  ;;  %v5114_v52 = vcombine.low %v864_v18, %v868_v17 }
  0xd5   :  { %1698 = vmatpush1.bf16.msra.mxu0 %v5075_v47  ;;  %1723 = vmatpush1.bf16.msra.mxu1 %v5077_v38  ;;  %7213 = vst [vmem:[#allocation116_spill] sm:$0xff] %v5106_v33  ;;  %7214 = vst [vmem:[#allocation117_spill] sm:$0xff] %v5108_v34  ;;  %v939_v47 = vld [vmem:[#allocation13 + $0x370] sm:$0xff]  ;;  %v876_v38 = vld [vmem:[#allocation13 + $0x178] sm:$0xff] }
  0xd6   :  { %1699 = vmatprep.subr.bf16.mxu0 %v5081_v50  ;;  %1724 = vmatprep.subr.bf16.mxu1 %v5083_v61  ;;  %v935_v50 = vld [vmem:[#allocation13 + $0x350] sm:$0xff]  ;;  %v872_v61 = vld [vmem:[#allocation13 + $0x158] sm:$0xff]  ;;  %7215 = vst [vmem:[#allocation118_spill] sm:$0xff] %v5112_v3 }
  0xd7   :  { %v5118_v53 = vcombine.high %v935_v50, %v939_v47  ;;  %v5120_v36 = vcombine.high %v872_v61, %v876_v38  ;;  %v5124_v11 = vcombine.low %v935_v50, %v939_v47  ;;  %v5126_v17 = vcombine.low %v872_v61, %v876_v38 }
  0xd9   :  { %1700 = vmatpush1.bf16.msra.mxu0 %v5088_v35  ;;  %1725 = vmatpush1.bf16.msra.mxu1 %v5090_v1  ;;  %7216 = vst [vmem:[#allocation119_spill] sm:$0xff] %v5118_v53  ;;  %v947_v35 = vld [vmem:[#allocation13 + $0x3b0] sm:$0xff]  ;;  %v884_v1 = vld [vmem:[#allocation13 + $0x1b8] sm:$0xff]  ;;  %7217 = vst [vmem:[#allocation120_spill] sm:$0xff] %v5124_v11 }
  0xda   :  { %1701 = vmatprep.subr.bf16.mxu0 %v5094_v10  ;;  %1726 = vmatprep.subr.bf16.mxu1 %v5096_v12  ;;  %v943_v10 = vld [vmem:[#allocation13 + $0x390] sm:$0xff]  ;;  %v880_v12 = vld [vmem:[#allocation13 + $0x198] sm:$0xff] }
  0xdb   :  { %v5130_v13 = vcombine.high %v943_v10, %v947_v35  ;;  %v5132_v18 = vcombine.high %v880_v12, %v884_v1  ;;  %v5136_v47 = vcombine.low %v943_v10, %v947_v35  ;;  %v5138_v38 = vcombine.low %v880_v12, %v884_v1  ;;  %v904_v10 = vld [vmem:[#allocation13 + $0x258] sm:$0xff] }
  0xdc   :  { %v908_v12 = vld [vmem:[#allocation13 + $0x278] sm:$0xff] }
  0xdd   :  { %1702 = vmatpush1.bf16.msra.mxu0 %v5100_v21  ;;  %1727 = vmatpush1.bf16.msra.mxu1 %v5102_v22  ;;  %7218 = vst [vmem:[#allocation121_spill] sm:$0xff] %v5130_v13  ;;  %v955_v21 = vld [vmem:[#allocation13 + $0x3f0] sm:$0xff]  ;;  %v892_v22 = vld [vmem:[#allocation13 + $0x1f8] sm:$0xff]  ;;  %7219 = vst [vmem:[#allocation122_spill] sm:$0xff] %v5136_v47 }
  0xde   :  { %1703 = vmatprep.subr.bf16.mxu0 %v5106_v33  ;;  %1728 = vmatprep.subr.bf16.mxu1 %v5108_v34  ;;  %v951_v33 = vld [vmem:[#allocation13 + $0x3d0] sm:$0xff]  ;;  %v888_v34 = vld [vmem:[#allocation13 + $0x1d8] sm:$0xff]  ;;  %7220 = vst [vmem:[#allocation123_spill] sm:$0xff] %v5138_v38 }
  0xdf   :  { %v5142_v50 = vcombine.high %v951_v33, %v955_v21  ;;  %v5144_v61 = vcombine.high %v888_v34, %v892_v22  ;;  %v5150_v35 = vcombine.low %v888_v34, %v892_v22  ;;  %v912_v22 = vld [vmem:[#allocation13 + $0x298] sm:$0xff]  ;;  %v5166_v34 = vcombine.low %v904_v10, %v908_v12 }
  0xe1   :  { %1704 = vmatpush1.bf16.msra.mxu0 %v5112_v3  ;;  %1729 = vmatpush1.bf16.msra.mxu1 %v5114_v52  ;;  %7221 = vst [vmem:[#allocation124_spill] sm:$0xff] %v5142_v50  ;;  %7222 = vst [vmem:[#allocation125_spill] sm:$0xff] %v5144_v61  ;;  %v900_v3 = vld [vmem:[#allocation13 + $0x238] sm:$0xff] }
  0xe2   :  { %1705 = vmatprep.subr.bf16.mxu0 %v5118_v53  ;;  %1730 = vmatprep.subr.bf16.mxu1 %v5120_v36  ;;  %v896_v53 = vld [vmem:[#allocation13 + $0x218] sm:$0xff]  ;;  %7224 = vst [vmem:[#allocation127_spill] sm:$0xff] %v5150_v35  ;;  %7228 = vst [vmem:[#allocation131_spill] sm:$0xff] %v5166_v34 }
  0xe3   :  { %v5154_v1 = vcombine.high %v896_v53, %v900_v3 }
  0xe5   :  { %1706 = vmatpush1.bf16.msra.mxu0 %v5124_v11  ;;  %1731 = vmatpush1.bf16.msra.mxu1 %v5126_v17  ;;  %v5148_v11 = vcombine.low %v951_v33, %v955_v21  ;;  %7225 = vst [vmem:[#allocation128_spill] sm:$0xff] %v5154_v1  ;;  %v5161_v21 = vcombine.high %v904_v10, %v908_v12  ;;  %v916_v33 = vld [vmem:[#allocation13 + $0x2b8] sm:$0xff] }
  0xe6   :  { %1707 = vmatprep.subr.bf16.mxu0 %v5130_v13  ;;  %1732 = vmatprep.subr.bf16.mxu1 %v5132_v18  ;;  %v5158_v13 = vcombine.low %v896_v53, %v900_v3  ;;  %v5170_v3 = vcombine.high %v912_v22, %v916_v33  ;;  %v920_v53 = vld [vmem:[#allocation13 + $0x2d8] sm:$0xff] }
  0xe7   :  { %7223 = vst [vmem:[#allocation126_spill] sm:$0xff] %v5148_v11  ;;  %7227 = vst [vmem:[#allocation130_spill] sm:$0xff] %v5161_v21  ;;  %v928_v12 = vld [vmem:[#allocation13 + $0x318] sm:$0xff] }
  0xe8   :  { %7226 = vst [vmem:[#allocation129_spill] sm:$0xff] %v5158_v13  ;;  %7229 = vst [vmem:[#allocation132_spill] sm:$0xff] %v5170_v3 }
  0xe9   :  { %1708 = vmatpush1.bf16.msra.mxu0 %v5136_v47  ;;  %1733 = vmatpush1.bf16.msra.mxu1 %v5138_v38 }
  0xea   :  { %1709 = vmatprep.subr.bf16.mxu0 %v5142_v50  ;;  %1734 = vmatprep.subr.bf16.mxu1 %v5144_v61 }
  0xed   :  { %1710 = vmatpush1.bf16.msra.mxu0 %v5148_v11  ;;  %1735 = vmatpush1.bf16.msra.mxu1 %v5150_v35  ;;  %v924_v11 = vld [vmem:[#allocation13 + $0x2f8] sm:$0xff] }
  0xee   :  { %1736 = vmatprep.subr.bf16.mxu1 %v5154_v1  ;;  %1818 = vmatprep.subr.bf16.mxu0 %v4746_v7  ;;  %v5174_v7 = vcombine.low %v912_v22, %v916_v33  ;;  %v5178_v10 = vcombine.high %v920_v53, %v924_v11  ;;  %v5182_v50 = vcombine.low %v920_v53, %v924_v11  ;;  %v936_v33 = vld [vmem:[#allocation13 + $0x358] sm:$0xff] }
  0xef   :  { %v944_v53 = vld [vmem:[#allocation13 + $0x398] sm:$0xff] }
  0xf0   :  { %1712 = vmatmul.mubr.bf16.vlgmr.msra.gmra.mrb[36].mxu0 %v7166_v62  ;;  %7230 = vst [vmem:[#allocation133_spill] sm:$0xff] %v5174_v7  ;;  %7231 = vst [vmem:[#allocation134_spill] sm:$0xff] %v5178_v10 }
  0xf1   :  { %1737 = vmatpush1.bf16.msra.mxu1 %v5158_v13  ;;  %1819 = vmatpush1.bf16.msra.mxu0 %v4777_v19  ;;  %v932_v19 = vld [vmem:[#allocation13 + $0x338] sm:$0xff]  ;;  %7232 = vst [vmem:[#allocation135_spill] sm:$0xff] %v5182_v50 }
  0xf2   :  { %1738 = vmatprep.subr.bf16.mxu1 %v5161_v21  ;;  %1820 = vmatprep.subr.bf16.mxu0 %v4779_v20  ;;  %v5186_v22 = vcombine.high %v928_v12, %v932_v19  ;;  %v5190_v20 = vcombine.low %v928_v12, %v932_v19  ;;  %v952_v12 = vld [vmem:[#allocation13 + $0x3d8] sm:$0xff] }
  0xf4   :  { %7233 = vst [vmem:[#allocation136_spill] sm:$0xff] %v5186_v22  ;;  %7234 = vst [vmem:[#allocation137_spill] sm:$0xff] %v5190_v20 }
  0xf5   :  { %1739 = vmatpush1.bf16.msra.mxu1 %v5166_v34  ;;  %1821 = vmatpush1.bf16.msra.mxu0 %v4787_v23  ;;  %v940_v23 = vld [vmem:[#allocation13 + $0x378] sm:$0xff] }
  0xf6   :  { %1740 = vmatprep.subr.bf16.mxu1 %v5170_v3  ;;  %1822 = vmatprep.subr.bf16.mxu0 %v4791_v24  ;;  %v5194_v11 = vcombine.high %v936_v33, %v940_v23  ;;  %v5198_v24 = vcombine.low %v936_v33, %v940_v23 }
  0xf8   :  { %7235 = vst [vmem:[#allocation138_spill] sm:$0xff] %v5194_v11  ;;  %7236 = vst [vmem:[#allocation139_spill] sm:$0xff] %v5198_v24 }
  0xf9   :  { %1741 = vmatpush1.bf16.msra.mxu1 %v5174_v7  ;;  %1823 = vmatpush1.bf16.msra.mxu0 %v4795_v27  ;;  %v948_v27 = vld [vmem:[#allocation13 + $0x3b8] sm:$0xff] }
  0xfa   :  { %1742 = vmatprep.subr.bf16.mxu1 %v5178_v10  ;;  %1824 = vmatprep.subr.bf16.mxu0 %v4798_v28  ;;  %v5202_v19 = vcombine.high %v944_v53, %v948_v27  ;;  %v5206_v28 = vcombine.low %v944_v53, %v948_v27  ;;  %v272_v27 = vsub.s32 0, %v4672_v4  ;;  %v7241_v53 = vld [vmem:[#allocation60_spill] sm:$0xff] }
  0xfc   :  { %7237 = vst [vmem:[#allocation140_spill] sm:$0xff] %v5202_v19  ;;  %7238 = vst [vmem:[#allocation141_spill] sm:$0xff] %v5206_v28 }
  0xfd   :  { %1743 = vmatpush1.bf16.msra.mxu1 %v5182_v50  ;;  %1825 = vmatpush1.bf16.msra.mxu0 %v4805_v31  ;;  %v956_v31 = vld [vmem:[#allocation13 + $0x3f8] sm:$0xff] }
  0xfe   :  { %1744 = vmatprep.subr.bf16.mxu1 %v5186_v22  ;;  %1826 = vmatprep.subr.bf16.mxu0 %v4809_v32  ;;  %v5210_v23 = vcombine.high %v952_v12, %v956_v31  ;;  %v5214_v33 = vcombine.low %v952_v12, %v956_v31  ;;  %v5248_v31 = vld [vmem:[%s6852_s2] sm:$0xff] }
  0xff   :  { %v5256_v12 = vrot.slane %v5248_v31, %v272_v27 }
 0x100   :  { %7239 = vst [vmem:[#allocation142_spill] sm:$0xff] %v5210_v23  ;;  %7240 = vst [vmem:[#allocation143_spill] sm:$0xff] %v5214_v33 }
 0x101   :  { %1745 = vmatpush1.bf16.msra.mxu1 %v5190_v20  ;;  %1827 = vmatpush1.bf16.msra.mxu0 %v4813_v37 }
 0x102   :  { %1746 = vmatprep.subr.bf16.mxu1 %v5194_v11  ;;  %1828 = vmatprep.subr.bf16.mxu0 %v4816_v39 }
 0x105   :  { %1747 = vmatpush1.bf16.msra.mxu1 %v5198_v24  ;;  %1829 = vmatpush1.bf16.msra.mxu0 %v4823_v41  ;;  %v7288_v41 = vld [vmem:[#allocation96_spill] sm:$0xff] }
 0x106   :  { %1748 = vmatprep.subr.bf16.mxu1 %v5202_v19  ;;  %1830 = vmatprep.subr.bf16.mxu0 %v4827_v44 }
 0x109   :  { %1749 = vmatpush1.bf16.msra.mxu1 %v5206_v28  ;;  %1831 = vmatpush1.bf16.msra.mxu0 %v4831_v45  ;;  %v7274_v45 = vld [vmem:[#allocation84_spill] sm:$0xff] }
 0x10a   :  { %1750 = vmatprep.subr.bf16.mxu1 %v5210_v23  ;;  %1832 = vmatprep.subr.bf16.mxu0 %v4834_v48 }
 0x10d   :  { %1751 = vmatpush1.bf16.msra.mxu1 %v5214_v33  ;;  %1833 = vmatpush1.bf16.msra.mxu0 %v4841_v49  ;;  %v7252_v49 = vld [vmem:[#allocation69_spill] sm:$0xff] }
 0x10e   :  { %1859 = vmatprep.subr.bf16.mxu1 %v4775_v5  ;;  %1834 = vmatprep.subr.bf16.mxu0 %v4845_v51 }
 0x110   :  { %1753 = vmatmul.mubr.bf16.vlgmr.msra.gmra.mrb[52].mxu1 %v7166_v62  ;;  %v276_v62 = vsub.s32 1, %v4672_v4 }
 0x111   :  { %1860 = vmatpush1.bf16.msra.mxu1 %v4853_v56  ;;  %1835 = vmatpush1.bf16.msra.mxu0 %v4849_v55 }
 0x112   :  { %1861 = vmatprep.subr.bf16.mxu1 %v4858_v58  ;;  %1836 = vmatprep.subr.bf16.mxu0 %v4856_v57 }
 0x115   :  { %1862 = vmatpush1.bf16.msra.mxu1 %v4868_v6  ;;  %1837 = vmatpush1.bf16.msra.mxu0 %v4866_v2 }
 0x116   :  { %1863 = vmatprep.subr.bf16.mxu1 %v4874_v9  ;;  %1838 = vmatprep.subr.bf16.mxu0 %v4872_v8 }
 0x119   :  { %1864 = vmatpush1.bf16.msra.mxu1 %v4882_v15  ;;  %1839 = vmatpush1.bf16.msra.mxu0 %v4880_v14 }
 0x11a   :  { %1865 = vmatprep.subr.bf16.mxu1 %v4888_v0  ;;  %1840 = vmatprep.subr.bf16.mxu0 %v4886_v16  ;;  %v7245_v16 = vld [vmem:[#allocation64_spill] sm:$0xff] }
 0x11d   :  { %1866 = vmatpush1.bf16.msra.mxu1 %v4896_v26  ;;  %1841 = vmatpush1.bf16.msra.mxu0 %v4894_v25  ;;  %v7244_v25 = vld [vmem:[#allocation65_spill] sm:$0xff] }
 0x11e   :  { %1867 = vmatprep.subr.bf16.mxu1 %v4902_v30  ;;  %1842 = vmatprep.subr.bf16.mxu0 %v4900_v29  ;;  %v7243_v29 = vld [vmem:[#allocation62_spill] sm:$0xff] }
 0x121   :  { %1868 = vmatpush1.bf16.msra.mxu1 %v4909_v42  ;;  %1843 = vmatpush1.bf16.msra.mxu0 %v4907_v40  ;;  %v7242_v40 = vld [vmem:[#allocation63_spill] sm:$0xff] }
 0x122   :  { %1869 = vmatprep.subr.bf16.mxu1 %v4915_v46  ;;  %1844 = vmatprep.subr.bf16.mxu0 %v4913_v43  ;;  %v5259_v43 = vrot.slane %v5248_v31, %v276_v62 }
 0x125   :  { %1870 = vmatpush1.bf16.msra.mxu1 %v4923_v59  ;;  %1845 = vmatpush1.bf16.msra.mxu0 %v4921_v54 }
 0x126   :  { %1871 = vmatprep.subr.bf16.mxu1 %v4929_v63  ;;  %1846 = vmatprep.subr.bf16.mxu0 %v7241_v53  ;;  %v7281_v63 = vld [vmem:[#allocation90_spill] sm:$0xff] }
 0x129   :  { %1872 = vmatpush1.bf16.msra.mxu1 %v7242_v40  ;;  %1847 = vmatpush1.bf16.msra.mxu0 %v7243_v29  ;;  %v7248_v29 = vld [vmem:[#allocation66_spill] sm:$0xff] }
 0x12a   :  { %1873 = vmatprep.subr.bf16.mxu1 %v7244_v25  ;;  %1848 = vmatprep.subr.bf16.mxu0 %v7245_v16  ;;  %v7271_v25 = vld [vmem:[#allocation82_spill] sm:$0xff] }
 0x12b   :  { %v470_v14 = vpop.f32.mrb[0].mxu1  ;;  %v5265_v54 = vpop.f32.mrb[0].mxu0 }
 0x12c   :  { %v5268_v8 = vadd.f32 %v470_v14, %v5256_v12  ;;  %v472_v53 = vpop.f32.mrb[1].mxu1  ;;  %v5270_v27 = vpop.f32.mrb[1].mxu0 }
 0x12d   :  { %v5273_v62 = vadd.f32 %v472_v53, %v5259_v43  ;;  %v474_v2 = vpop.f32.mrb[2].mxu1  ;;  %v444_v57 = vpop.f32.mrb[2].mxu0  ;;  %1874 = vmatpush1.bf16.msra.mxu1 %v4950_v60  ;;  %1849 = vmatpush1.bf16.msra.mxu0 %v7248_v29  ;;  %v7255_v60 = vld [vmem:[#allocation70_spill] sm:$0xff]  ;;  %v7256_v29 = vld [vmem:[#allocation72_spill] sm:$0xff] }
 0x12e   :  { %7246 = vst [vmem:[#allocation144_spill] sm:$0xff] %v5268_v8  ;;  %v5278_v16 = vadd.f32 %v474_v2, %v5256_v12  ;;  %v476_v55 = vpop.f32.mrb[3].mxu1  ;;  %v5281_v51 = vadd.f32 %v444_v57, %v5256_v12  ;;  %v446_v14 = vpop.f32.mrb[3].mxu0  ;;  %v7251_v8 = vld [vmem:[#allocation68_spill] sm:$0xff]  ;;  %1900 = vmatprep.subr.bf16.mxu0 %v7252_v49 }
 0x12f   :  { %7247 = vst [vmem:[#allocation145_spill] sm:$0xff] %v5273_v62  ;;  %1875 = vmatprep.subr.bf16.mxu1 %v7251_v8  ;;  %v5286_v53 = vadd.f32 %v476_v55, %v5259_v43  ;;  %v5289_v62 = vadd.f32 %v446_v14, %v5259_v43 }
 0x130   :  { %7249 = vst [vmem:[#allocation146_spill] sm:$0xff] %v5278_v16  ;;  %7250 = vst [vmem:[#allocation147_spill] sm:$0xff] %v5281_v51 }
 0x131   :  { %7253 = vst [vmem:[#allocation148_spill] sm:$0xff] %v5286_v53  ;;  %7254 = vst [vmem:[#allocation149_spill] sm:$0xff] %v5289_v62  ;;  %1876 = vmatpush1.bf16.msra.mxu1 %v7255_v60  ;;  %v7261_v60 = vld [vmem:[#allocation74_spill] sm:$0xff] }
 0x132   :  { %1877 = vmatprep.subr.bf16.mxu1 %v7256_v29 }
 0x133   :  { %v480_v2 = vpop.f32.mrb[4].mxu1  ;;  %v450_v16 = vpop.f32.mrb[4].mxu0 }
 0x134   :  { %v5294_v57 = vadd.f32 %v480_v2, %v5256_v12  ;;  %v482_v51 = vpop.f32.mrb[5].mxu1  ;;  %v5297_v8 = vadd.f32 %v450_v16, %v5256_v12  ;;  %v452_v49 = vpop.f32.mrb[5].mxu0 }
 0x135   :  { %v5300_v55 = vadd.f32 %v482_v51, %v5259_v43  ;;  %v484_v53 = vpop.f32.mrb[6].mxu1  ;;  %v5303_v14 = vadd.f32 %v452_v49, %v5259_v43  ;;  %v454_v62 = vpop.f32.mrb[6].mxu0  ;;  %1878 = vmatpush1.bf16.msra.mxu1 %v7261_v60  ;;  %v280_v49 = vsub.s32 2, %v4672_v4  ;;  %v7267_v60 = vld [vmem:[#allocation78_spill] sm:$0xff] }
 0x136   :  { %7257 = vst [vmem:[#allocation150_spill] sm:$0xff] %v5294_v57  ;;  %7258 = vst [vmem:[#allocation151_spill] sm:$0xff] %v5297_v8  ;;  %v5307_v29 = vadd.f32 %v484_v53, %v5256_v12  ;;  %v486_v2 = vpop.f32.mrb[7].mxu1  ;;  %v5310_v57 = vadd.f32 %v454_v62, %v5256_v12  ;;  %v456_v16 = vpop.f32.mrb[7].mxu0  ;;  %v7264_v8 = vld [vmem:[#allocation76_spill] sm:$0xff] }
 0x137   :  { %7259 = vst [vmem:[#allocation152_spill] sm:$0xff] %v5300_v55  ;;  %7260 = vst [vmem:[#allocation153_spill] sm:$0xff] %v5303_v14  ;;  %1879 = vmatprep.subr.bf16.mxu1 %v7264_v8  ;;  %v5314_v51 = vadd.f32 %v486_v2, %v5259_v43  ;;  %v5317_v55 = vadd.f32 %v456_v16, %v5259_v43  ;;  %v284_v14 = vsub.s32 3, %v4672_v4  ;;  %v7268_v53 = vld [vmem:[#allocation80_spill] sm:$0xff] }
 0x138   :  { %7262 = vst [vmem:[#allocation154_spill] sm:$0xff] %v5307_v29  ;;  %7263 = vst [vmem:[#allocation155_spill] sm:$0xff] %v5310_v57  ;;  %v5326_v57 = vrot.slane %v5248_v31, %v280_v49 }
 0x139   :  { %7265 = vst [vmem:[#allocation156_spill] sm:$0xff] %v5314_v51  ;;  %7266 = vst [vmem:[#allocation157_spill] sm:$0xff] %v5317_v55  ;;  %1880 = vmatpush1.bf16.msra.mxu1 %v7267_v60  ;;  %v5334_v51 = vrot.slane %v5248_v31, %v284_v14 }
 0x13a   :  { %1881 = vmatprep.subr.bf16.mxu1 %v7268_v53 }
 0x13b   :  { %v5323_v29 = vpop.f32.mrb[8].mxu1  ;;  %v460_v62 = vpop.f32.mrb[8].mxu0 }
 0x13c   :  { %v5328_v8 = vpop.f32.mrb[9].mxu1  ;;  %v5331_v2 = vadd.f32 %v460_v62, %v5256_v12  ;;  %v462_v16 = vpop.f32.mrb[9].mxu0 }
 0x13d   :  { %v527_v55 = vpop.f32.mrb[10].mxu1  ;;  %v5337_v60 = vadd.f32 %v462_v16, %v5259_v43  ;;  %v464_v53 = vpop.f32.mrb[10].mxu0  ;;  %1882 = vmatpush1.bf16.msra.mxu1 %v7271_v25  ;;  %v7277_v25 = vld [vmem:[#allocation86_spill] sm:$0xff] }
 0x13e   :  { %7269 = vst [vmem:[#allocation158_spill] sm:$0xff] %v5331_v2  ;;  %v5341_v48 = vadd.f32 %v527_v55, %v5326_v57  ;;  %v529_v49 = vpop.f32.mrb[11].mxu1  ;;  %v5344_v40 = vadd.f32 %v464_v53, %v5256_v12  ;;  %v466_v62 = vpop.f32.mrb[11].mxu0  ;;  %v288_v2 = vsub.s32 4, %v4672_v4  ;;  %1883 = vmatprep.subr.bf16.mxu1 %v7274_v45  ;;  %v7278_v53 = vld [vmem:[#allocation88_spill] sm:$0xff] }
 0x13f   :  { %7270 = vst [vmem:[#allocation159_spill] sm:$0xff] %v5337_v60  ;;  %v5349_v14 = vadd.f32 %v529_v49, %v5334_v51  ;;  %v5352_v16 = vadd.f32 %v466_v62, %v5259_v43  ;;  %v292_v60 = vsub.s32 5, %v4672_v4 }
 0x140   :  { %7272 = vst [vmem:[#allocation160_spill] sm:$0xff] %v5341_v48  ;;  %7273 = vst [vmem:[#allocation161_spill] sm:$0xff] %v5344_v40  ;;  %v5357_v55 = vrot.slane %v5248_v31, %v288_v2 }
 0x141   :  { %7275 = vst [vmem:[#allocation162_spill] sm:$0xff] %v5349_v14  ;;  %7276 = vst [vmem:[#allocation163_spill] sm:$0xff] %v5352_v16  ;;  %1884 = vmatpush1.bf16.msra.mxu1 %v7277_v25  ;;  %v5363_v45 = vrot.slane %v5248_v31, %v292_v60 }
 0x142   :  { %1885 = vmatprep.subr.bf16.mxu1 %v7278_v53 }
 0x143   :  { %v533_v40 = vpop.f32.mrb[12].mxu1  ;;  %v5360_v48 = vpop.f32.mrb[12].mxu0 }
 0x144   :  { %v5366_v49 = vadd.f32 %v533_v40, %v5326_v57  ;;  %v535_v62 = vpop.f32.mrb[13].mxu1  ;;  %v5368_v16 = vpop.f32.mrb[13].mxu0  ;;  %v7284_v40 = vld [vmem:[#allocation92_spill] sm:$0xff] }
 0x145   :  { %v5371_v14 = vadd.f32 %v535_v62, %v5334_v51  ;;  %v537_v25 = vpop.f32.mrb[14].mxu1  ;;  %v610_v2 = vpop.f32.mrb[14].mxu0  ;;  %1886 = vmatpush1.bf16.msra.mxu1 %v7281_v63 }
 0x146   :  { %7279 = vst [vmem:[#allocation164_spill] sm:$0xff] %v5366_v49  ;;  %v5375_v53 = vadd.f32 %v537_v25, %v5326_v57  ;;  %v539_v44 = vpop.f32.mrb[15].mxu1  ;;  %v5378_v60 = vadd.f32 %v610_v2, %v5357_v55  ;;  %v612_v59 = vpop.f32.mrb[15].mxu0  ;;  %1887 = vmatprep.subr.bf16.mxu1 %v7284_v40 }
 0x147   :  { %7280 = vst [vmem:[#allocation165_spill] sm:$0xff] %v5371_v14  ;;  %v5382_v49 = vadd.f32 %v539_v44, %v5334_v51  ;;  %v5385_v62 = vadd.f32 %v612_v59, %v5363_v45  ;;  %v7287_v14 = vld [vmem:[#allocation94_spill] sm:$0xff] }
 0x148   :  { %7282 = vst [vmem:[#allocation166_spill] sm:$0xff] %v5375_v53  ;;  %7283 = vst [vmem:[#allocation167_spill] sm:$0xff] %v5378_v60 }
 0x149   :  { %7285 = vst [vmem:[#allocation168_spill] sm:$0xff] %v5382_v49  ;;  %7286 = vst [vmem:[#allocation169_spill] sm:$0xff] %v5385_v62  ;;  %1888 = vmatpush1.bf16.msra.mxu1 %v7287_v14  ;;  %v7293_v14 = vld [vmem:[#allocation98_spill] sm:$0xff] }
 0x14a   :  { %1889 = vmatprep.subr.bf16.mxu1 %v7288_v41 }
 0x14b   :  { %v543_v63 = vpop.f32.mrb[16].mxu1  ;;  %v616_v25 = vpop.f32.mrb[16].mxu0 }
 0x14c   :  { %v5390_v53 = vadd.f32 %v543_v63, %v5326_v57  ;;  %v545_v2 = vpop.f32.mrb[17].mxu1  ;;  %v5393_v60 = vadd.f32 %v616_v25, %v5357_v55  ;;  %v618_v40 = vpop.f32.mrb[17].mxu0 }
 0x14d   :  { %v5396_v44 = vadd.f32 %v545_v2, %v5334_v51  ;;  %v547_v49 = vpop.f32.mrb[18].mxu1  ;;  %v5399_v59 = vadd.f32 %v618_v40, %v5363_v45  ;;  %v620_v62 = vpop.f32.mrb[18].mxu0  ;;  %1890 = vmatpush1.bf16.msra.mxu1 %v7293_v14 }
 0x14e   :  { %7289 = vst [vmem:[#allocation170_spill] sm:$0xff] %v5390_v53  ;;  %7290 = vst [vmem:[#allocation171_spill] sm:$0xff] %v5393_v60  ;;  %v5403_v41 = vadd.f32 %v547_v49, %v5326_v57  ;;  %v549_v63 = vpop.f32.mrb[19].mxu1  ;;  %v5406_v53 = vadd.f32 %v620_v62, %v5357_v55  ;;  %v622_v25 = vpop.f32.mrb[19].mxu0  ;;  %v7296_v60 = vld [vmem:[#allocation101_spill] sm:$0xff] }
 0x14f   :  { %7291 = vst [vmem:[#allocation172_spill] sm:$0xff] %v5396_v44  ;;  %7292 = vst [vmem:[#allocation173_spill] sm:$0xff] %v5399_v59  ;;  %1941 = vmatprep.subr.bf16.mxu1 %v7296_v60  ;;  %v5410_v2 = vadd.f32 %v549_v63, %v5334_v51  ;;  %v5413_v44 = vadd.f32 %v622_v25, %v5363_v45 }
 0x150   :  { %7294 = vst [vmem:[#allocation174_spill] sm:$0xff] %v5403_v41  ;;  %7295 = vst [vmem:[#allocation175_spill] sm:$0xff] %v5406_v53 }
 0x151   :  { %7297 = vst [vmem:[#allocation176_spill] sm:$0xff] %v5410_v2  ;;  %7298 = vst [vmem:[#allocation177_spill] sm:$0xff] %v5413_v44 }
 0x153   :  { %v553_v40 = vpop.f32.mrb[20].mxu1  ;;  %v626_v59 = vpop.f32.mrb[20].mxu0 }
 0x154   :  { %v5416_v14 = vadd.f32 %v553_v40, %v5326_v57  ;;  %v555_v49 = vpop.f32.mrb[21].mxu1  ;;  %v5419_v41 = vadd.f32 %v626_v59, %v5357_v55  ;;  %v628_v62 = vpop.f32.mrb[21].mxu0 }
 0x155   :  { %v5422_v53 = vadd.f32 %v555_v49, %v5334_v51  ;;  %v557_v60 = vpop.f32.mrb[22].mxu1  ;;  %v5425_v63 = vadd.f32 %v628_v62, %v5363_v45  ;;  %v630_v2 = vpop.f32.mrb[22].mxu0 }
 0x156   :  { %7299 = vst [vmem:[#allocation178_spill] sm:$0xff] %v5416_v14  ;;  %7300 = vst [vmem:[#allocation179_spill] sm:$0xff] %v5419_v41  ;;  %v5428_v25 = vadd.f32 %v557_v60, %v5326_v57  ;;  %v559_v44 = vpop.f32.mrb[23].mxu1  ;;  %v5431_v40 = vadd.f32 %v630_v2, %v5357_v55  ;;  %v632_v14 = vpop.f32.mrb[23].mxu0 }
 0x157   :  { %7301 = vst [vmem:[#allocation180_spill] sm:$0xff] %v5422_v53  ;;  %7302 = vst [vmem:[#allocation181_spill] sm:$0xff] %v5425_v63  ;;  %v5434_v59 = vadd.f32 %v559_v44, %v5334_v51  ;;  %v5437_v41 = vadd.f32 %v632_v14, %v5363_v45 }
 0x158   :  { %7303 = vst [vmem:[#allocation182_spill] sm:$0xff] %v5428_v25  ;;  %7304 = vst [vmem:[#allocation183_spill] sm:$0xff] %v5431_v40 }
 0x159   :  { %7305 = vst [vmem:[#allocation184_spill] sm:$0xff] %v5434_v59  ;;  %7306 = vst [vmem:[#allocation185_spill] sm:$0xff] %v5437_v41 }
 0x15b   :  { %v563_v49 = vpop.f32.mrb[24].mxu1  ;;  %v636_v53 = vpop.f32.mrb[24].mxu0 }
 0x15c   :  { %v5440_v62 = vadd.f32 %v563_v49, %v5326_v57  ;;  %v565_v63 = vpop.f32.mrb[25].mxu1  ;;  %v5443_v60 = vadd.f32 %v636_v53, %v5357_v55  ;;  %v638_v25 = vpop.f32.mrb[25].mxu0 }
 0x15d   :  { %v5446_v2 = vadd.f32 %v565_v63, %v5334_v51  ;;  %v567_v40 = vpop.f32.mrb[26].mxu1  ;;  %v5449_v44 = vadd.f32 %v638_v25, %v5363_v45  ;;  %v640_v59 = vpop.f32.mrb[26].mxu0  ;;  %v296_v63 = vsub.s32 6, %v4672_v4  ;;  %v300_v25 = vsub.s32 7, %v4672_v4 }
 0x15e   :  { %7307 = vst [vmem:[#allocation186_spill] sm:$0xff] %v5440_v62  ;;  %7308 = vst [vmem:[#allocation187_spill] sm:$0xff] %v5443_v60  ;;  %v5452_v14 = vadd.f32 %v567_v40, %v5326_v57  ;;  %v569_v41 = vpop.f32.mrb[27].mxu1  ;;  %v5455_v49 = vadd.f32 %v640_v59, %v5357_v55  ;;  %v642_v62 = vpop.f32.mrb[27].mxu0 }
 0x15f   :  { %7309 = vst [vmem:[#allocation188_spill] sm:$0xff] %v5446_v2  ;;  %7310 = vst [vmem:[#allocation189_spill] sm:$0xff] %v5449_v44  ;;  %v5458_v53 = vadd.f32 %v569_v41, %v5334_v51  ;;  %v5461_v60 = vadd.f32 %v642_v62, %v5363_v45  ;;  %v5468_v40 = vrot.slane %v5248_v31, %v296_v63 }
 0x160   :  { %7311 = vst [vmem:[#allocation190_spill] sm:$0xff] %v5452_v14  ;;  %7312 = vst [vmem:[#allocation191_spill] sm:$0xff] %v5455_v49 }
 0x161   :  { %7313 = vst [vmem:[#allocation192_spill] sm:$0xff] %v5458_v53  ;;  %7314 = vst [vmem:[#allocation193_spill] sm:$0xff] %v5461_v60  ;;  %v5476_v53 = vrot.slane %v5248_v31, %v300_v25 }
 0x163   :  { %v5465_v2 = vpop.f32.mrb[28].mxu1  ;;  %v646_v44 = vpop.f32.mrb[28].mxu0 }
 0x164   :  { %v5470_v14 = vpop.f32.mrb[29].mxu1  ;;  %v5473_v59 = vadd.f32 %v646_v44, %v5357_v55  ;;  %v648_v41 = vpop.f32.mrb[29].mxu0 }
 0x165   :  { %v693_v62 = vpop.f32.mrb[30].mxu1  ;;  %v5479_v60 = vadd.f32 %v648_v41, %v5363_v45  ;;  %v650_v4 = vpop.f32.mrb[30].mxu0 }
 0x166   :  { %7315 = vst [vmem:[#allocation194_spill] sm:$0xff] %v5473_v59  ;;  %v5482_v49 = vadd.f32 %v693_v62, %v5468_v40  ;;  %v695_v46 = vpop.f32.mrb[31].mxu1  ;;  %v5485_v63 = vadd.f32 %v650_v4, %v5357_v55  ;;  %v652_v39 = vpop.f32.mrb[31].mxu0 }
 0x167   :  { %7316 = vst [vmem:[#allocation195_spill] sm:$0xff] %v5479_v60  ;;  %v5488_v44 = vadd.f32 %v695_v46, %v5476_v53  ;;  %v5491_v59 = vadd.f32 %v652_v39, %v5363_v45 }
 0x168   :  { %7317 = vst [vmem:[#allocation196_spill] sm:$0xff] %v5482_v49  ;;  %7318 = vst [vmem:[#allocation197_spill] sm:$0xff] %v5485_v63 }
 0x169   :  { %7319 = vst [vmem:[#allocation198_spill] sm:$0xff] %v5488_v44  ;;  %7320 = vst [vmem:[#allocation199_spill] sm:$0xff] %v5491_v59 }
 0x16b   :  { %v699_v31 = vpop.f32.mrb[32].mxu1 }
 0x16c   :  { %v5494_v25 = vadd.f32 %v699_v31, %v5468_v40  ;;  %v701_v41 = vpop.f32.mrb[33].mxu1 }
 0x16d   :  { %v5497_v60 = vadd.f32 %v701_v41, %v5476_v53  ;;  %v703_v62 = vpop.f32.mrb[34].mxu1 }
 0x16e   :  { %7321 = vst [vmem:[#allocation200_spill] sm:$0xff] %v5494_v25  ;;  %v5500_v49 = vadd.f32 %v703_v62, %v5468_v40  ;;  %v705_v4 = vpop.f32.mrb[35].mxu1 }
 0x16f   :  { %7322 = vst [vmem:[#allocation201_spill] sm:$0xff] %v5497_v60  ;;  %v5503_v63 = vadd.f32 %v705_v4, %v5476_v53 }
 0x170   :  { %7323 = vst [vmem:[#allocation202_spill] sm:$0xff] %v5500_v49 }
 0x171   :  { %7324 = vst [vmem:[#allocation203_spill] sm:$0xff] %v5503_v63 }
 0x173   :  { %v709_v46 = vpop.f32.mrb[36].mxu1 }
 0x174   :  { %v5506_v39 = vadd.f32 %v709_v46, %v5468_v40  ;;  %v711_v59 = vpop.f32.mrb[37].mxu1 }
 0x175   :  { %v5509_v31 = vadd.f32 %v711_v59, %v5476_v53  ;;  %v713_v25 = vpop.f32.mrb[38].mxu1 }
 0x176   :  { %7325 = vst [vmem:[#allocation204_spill] sm:$0xff] %v5506_v39  ;;  %v5512_v41 = vadd.f32 %v713_v25, %v5468_v40  ;;  %v715_v60 = vpop.f32.mrb[39].mxu1 }
 0x177   :  { %7326 = vst [vmem:[#allocation205_spill] sm:$0xff] %v5509_v31  ;;  %v5515_v62 = vadd.f32 %v715_v60, %v5476_v53  ;;  %v441_v60 = vadd.f32 %v5265_v54, %v5256_v12 }
 0x178   :  { %7327 = vst [vmem:[#allocation206_spill] sm:$0xff] %v5512_v41 }
 0x179   :  { %7328 = vst [vmem:[#allocation207_spill] sm:$0xff] %v5515_v62  ;;  %v443_v62 = vadd.f32 %v5270_v27, %v5259_v43  ;;  %v524_v27 = vadd.f32 %v5323_v29, %v5326_v57 }
 0x17b   :  { %v719_v49 = vpop.f32.mrb[40].mxu1 }
 0x17c   :  { %v5518_v4 = vadd.f32 %v719_v49, %v5468_v40  ;;  %v721_v63 = vpop.f32.mrb[41].mxu1 }
 0x17d   :  { %v5521_v46 = vadd.f32 %v721_v63, %v5476_v53  ;;  %v723_v39 = vpop.f32.mrb[42].mxu1 }
 0x17e   :  { %7329 = vst [vmem:[#allocation208_spill] sm:$0xff] %v5518_v4  ;;  %v5524_v59 = vadd.f32 %v723_v39, %v5468_v40  ;;  %v725_v31 = vpop.f32.mrb[43].mxu1 }
 0x17f   :  { %7330 = vst [vmem:[#allocation209_spill] sm:$0xff] %v5521_v46  ;;  %v5527_v25 = vadd.f32 %v725_v31, %v5476_v53 }
 0x180   :  { %7331 = vst [vmem:[#allocation210_spill] sm:$0xff] %v5524_v59 }
 0x181   :  { %7332 = vst [vmem:[#allocation211_spill] sm:$0xff] %v5527_v25 }
 0x183   :  { %v1631_v49 = vpop.f32.mrb[32].mxu0  ;;  %v729_v4 = vpop.f32.mrb[44].mxu1 }
 0x184   :  { %v1761_v41 = vadd.f32 %v1631_v49, %v441_v60  ;;  %v1633_v44 = vpop.f32.mrb[33].mxu0  ;;  %v5534_v63 = vadd.f32 %v729_v4, %v5468_v40  ;;  %v731_v46 = vpop.f32.mrb[45].mxu1  ;;  %v526_v4 = vadd.f32 %v5328_v8, %v5334_v51 }
 0x185   :  { %v1762_v39 = vadd.f32 %v1633_v44, %v443_v62  ;;  %v5537_v59 = vadd.f32 %v731_v46, %v5476_v53  ;;  %v733_v31 = vpop.f32.mrb[46].mxu1  ;;  %v1635_v25 = vpop.f32.mrb[34].mxu0 }
 0x186   :  { %7333 = vst [vmem:[#allocation212_spill] sm:$0xff] %v5534_v63  ;;  %v5540_v42 = vadd.f32 %v733_v31, %v5468_v40  ;;  %v735_v54 = vpop.f32.mrb[47].mxu1  ;;  %v1636_v12 = vpop.f32.mrb[35].mxu0  ;;  %v607_v31 = vadd.f32 %v5360_v48, %v5357_v55  ;;  %v1769_v51 = vmul.f32 0.5, %v1761_v41  ;;  %v690_v48 = vadd.f32 %v5465_v2, %v5468_v40 }
 0x187   :  { %7334 = vst [vmem:[#allocation213_spill] sm:$0xff] %v5537_v59  ;;  %v5543_v43 = vadd.f32 %v735_v54, %v5476_v53  ;;  %v609_v12 = vadd.f32 %v5368_v16, %v5363_v45  ;;  %v692_v45 = vadd.f32 %v5470_v14, %v5476_v53 }
 0x188   :  { %7335 = vst [vmem:[#allocation214_spill] sm:$0xff] %v5540_v42 }
 0x189   :  { %7336 = vst [vmem:[#allocation215_spill] sm:$0xff] %v5543_v43 }
 0x1a3   :  { %v1672_v44 = vpop.f32.mrb[48].mxu1 }
 0x1a4   :  { %v1763_v62 = vadd.f32 %v1672_v44, %v524_v27  ;;  %v1674_v46 = vpop.f32.mrb[49].mxu1  ;;  %v1770_v27 = vmul.f32 0.5, %v1762_v39 }
 0x1a5   :  { %v1764_v60 = vadd.f32 %v1674_v46, %v526_v4  ;;  %v1676_v49 = vpop.f32.mrb[50].mxu1 }
 0x1a6   :  { %v1677_v25 = vpop.f32.mrb[51].mxu1  ;;  %v1771_v63 = vmul.f32 0.5, %v1763_v62 }
 0x1a7   :  { %v1772_v8 = vmul.f32 0.5, %v1764_v60 }
 0x1a8   :  { %4242 = vtanh.f32 %v1771_v63 }
 0x1a9   :  { %4244 = vtanh.f32 %v1772_v8 }
 0x1aa   :  { %4246 = vtanh.f32 %v1769_v51 }
 0x1ab   :  { %4248 = vtanh.f32 %v1770_v27 }
 0x1b2   :  { %v4243_v46 = vpop.eup %4242 }
 0x1b3   :  { %v4245_v41 = vpop.eup %4244  ;;  %v1783_v60 = vmul.f32 0.5, %v4243_v46 }
 0x1b4   :  { %v4247_v63 = vpop.eup %4246  ;;  %v1784_v25 = vmul.f32 0.5, %v4245_v41 }
 0x1b5   :  { %v4249_v39 = vpop.eup %4248  ;;  %v1781_v2 = vmul.f32 0.5, %v4247_v63 }
 0x1b6   :  { %v1782_v40 = vmul.f32 0.5, %v4249_v39  ;;  %v1790_v14 = vadd.f32 0.5, %v1784_v25  ;;  %v7338_v25 = vld [vmem:[#allocation103_spill] sm:$0xff] }
 0x1b7   :  { %v1787_v53 = vadd.f32 0.5, %v1781_v2  ;;  %v7340_v2 = vld [vmem:[#allocation105_spill] sm:$0xff] }
 0x1b8   :  { %v1796_v27 = vmul.f32 0.0, %v1790_v14  ;;  %v7343_v14 = vld [vmem:[#allocation77_spill] sm:$0xff] }
 0x1c3   :  { %v1713_v54 = vpop.f32.mrb[36].mxu0 }
 0x1c4   :  { %v1765_v43 = vadd.f32 %v1713_v54, %v607_v31  ;;  %v1715_v42 = vpop.f32.mrb[37].mxu0 }
 0x1c5   :  { %v1766_v59 = vadd.f32 %v1715_v42, %v609_v12  ;;  %v1717_v29 = vpop.f32.mrb[38].mxu0  ;;  %v1789_v12 = vadd.f32 0.5, %v1783_v60 }
 0x1c6   :  { %v1718_v57 = vpop.f32.mrb[39].mxu0  ;;  %v1773_v49 = vmul.f32 0.5, %v1765_v43  ;;  %v1788_v29 = vadd.f32 0.5, %v1782_v40  ;;  %v7341_v40 = vld [vmem:[#allocation75_spill] sm:$0xff] }
 0x1c7   :  { %v1774_v31 = vmul.f32 0.5, %v1766_v59  ;;  %v1795_v8 = vmul.f32 0.0, %v1789_v12  ;;  %v7342_v12 = vld [vmem:[#allocation107_spill] sm:$0xff] }
 0x1e3   :  { %v1754_v16 = vpop.f32.mrb[52].mxu1 }
 0x1e4   :  { %v1767_v55 = vadd.f32 %v1754_v16, %v690_v48  ;;  %v1756_v4 = vpop.f32.mrb[53].mxu1 }
 0x1e5   :  { %v1768_v42 = vadd.f32 %v1756_v4, %v692_v45  ;;  %v1758_v44 = vpop.f32.mrb[54].mxu1 }
 0x1e6   :  { %4250 = vtanh.f32 %v1767_v55  ;;  %v1759_v62 = vpop.f32.mrb[55].mxu1 }
 0x1e7   :  { %4252 = vtanh.f32 %v1768_v42 }
 0x1e8   :  { %4254 = vtanh.f32 %v1773_v49  ;;  %v7337_v49 = vld [vmem:[#allocation71_spill] sm:$0xff] }
 0x1e9   :  { %4256 = vtanh.f32 %v1774_v31  ;;  %v7339_v31 = vld [vmem:[#allocation73_spill] sm:$0xff] }
 0x1f0   :  { %v4251_v54 = vpop.eup %4250 }
 0x1f1   :  { %v4253_v57 = vpop.eup %4252  ;;  %v1797_v51 = vmul.f32 %v4251_v54, %v1787_v53  ;;  %v7344_v53 = vld [vmem:[#allocation109_spill] sm:$0xff]  ;;  %v7345_v54 = vld [vmem:[#allocation79_spill] sm:$0xff] }
 0x1f2   :  { %v1798_v48 = vmul.f32 %v4253_v57, %v1788_v29  ;;  %v4255_v59 = vpop.eup %4254  ;;  %v7346_v29 = vld [vmem:[#allocation111_spill] sm:$0xff]  ;;  %v7347_v57 = vld [vmem:[#allocation81_spill] sm:$0xff] }
 0x1f3   :  { %v5557_v45 = vadd.f32 %v1797_v51, %v1795_v8  ;;  %v4257_v43 = vpop.eup %4256  ;;  %v1785_v55 = vmul.f32 0.5, %v4255_v59  ;;  %v7348_v8 = vld [vmem:[#allocation113_spill] sm:$0xff]  ;;  %v7349_v51 = vld [vmem:[#allocation83_spill] sm:$0xff] }
 0x1f4   :  { %v5559_v16 = vadd.f32 %v1798_v48, %v1796_v27  ;;  %v1786_v4 = vmul.f32 0.5, %v4257_v43  ;;  %v7350_v27 = vld [vmem:[#allocation115_spill] sm:$0xff]  ;;  %v7351_v48 = vld [vmem:[#allocation85_spill] sm:$0xff] }
 0x1f5   :  { %4258 = vtanh.f32 %v5557_v45  ;;  %v1791_v42 = vadd.f32 0.5, %v1785_v55  ;;  %v7352_v59 = vld [vmem:[#allocation117_spill] sm:$0xff]  ;;  %v7353_v43 = vld [vmem:[#allocation87_spill] sm:$0xff] }
 0x1f6   :  { %4260 = vtanh.f32 %v5559_v16  ;;  %v1792_v46 = vadd.f32 0.5, %v1786_v4  ;;  %v7354_v55 = vld [vmem:[#allocation89_spill] sm:$0xff]  ;;  %v7355_v4 = vld [vmem:[#allocation91_spill] sm:$0xff] }
 0x1ff   :  { %v4259_v44 = vpop.eup %4258 }
 0x200   :  { %v4261_v62 = vpop.eup %4260  ;;  %v1803_v41 = vmul.f32 %v4259_v44, %v1791_v42  ;;  %v7356_v42 = vld [vmem:[#allocation93_spill] sm:$0xff]  ;;  %v7357_v44 = vld [vmem:[#allocation95_spill] sm:$0xff] }
 0x201   :  { %v1804_v63 = vmul.f32 %v4261_v62, %v1792_v46  ;;  %v7358_v46 = vld [vmem:[#allocation97_spill] sm:$0xff]  ;;  %v7359_v62 = vld [vmem:[#allocation99_spill] sm:$0xff] }
 0x202   :  { %v5563_v60 = vpack.c.bf16 %v1803_v41, %v1803_v41  ;;  %v7360_v41 = vld [vmem:[#allocation100_spill] sm:$0xff] }
 0x203   :  { %v1817_v39 = vpack.c.bf16 %v1804_v63, %v1804_v63  ;;  %v7361_v63 = vld [vmem:[#allocation102_spill] sm:$0xff] }
 0x205   :  { %1850 = vmatprep.mubr.bf16.mxu0 %v1817_v39  ;;  %1891 = vmatprep.mubr.bf16.mxu1 %v1817_v39 }
 0x206   :  { %1851 = vmatmul.mubr.bf16.vlgmr.msra.gmra.mrb[40].mxu0 %v5563_v60  ;;  %1892 = vmatmul.mubr.bf16.vlgmr.msra.gmra.mrb[56].mxu1 %v5563_v60 }
 0x207   :  { %1901 = vmatpush1.bf16.msra.mxu0 %v7337_v49  ;;  %1942 = vmatpush1.bf16.msra.mxu1 %v7338_v25 }
 0x208   :  { %1932 = vmatprep.mubr.bf16.mxu0 %v1817_v39  ;;  %1973 = vmatprep.mubr.bf16.mxu1 %v1817_v39  ;;  %v7362_v39 = vld [vmem:[#allocation104_spill] sm:$0xff] }
 0x209   :  { %1902 = vmatprep.subr.bf16.mxu0 %v7339_v31  ;;  %1943 = vmatprep.subr.bf16.mxu1 %v7340_v2 }
 0x20b   :  { %1903 = vmatpush1.bf16.msra.mxu0 %v7341_v40  ;;  %1944 = vmatpush1.bf16.msra.mxu1 %v7342_v12 }
 0x20c   :  { %1904 = vmatprep.subr.bf16.mxu0 %v7343_v14  ;;  %1945 = vmatprep.subr.bf16.mxu1 %v7344_v53 }
 0x20f   :  { %1905 = vmatpush1.bf16.msra.mxu0 %v7345_v54  ;;  %1946 = vmatpush1.bf16.msra.mxu1 %v7346_v29 }
 0x210   :  { %1906 = vmatprep.subr.bf16.mxu0 %v7347_v57  ;;  %1947 = vmatprep.subr.bf16.mxu1 %v7348_v8 }
 0x213   :  { %1907 = vmatpush1.bf16.msra.mxu0 %v7349_v51  ;;  %1948 = vmatpush1.bf16.msra.mxu1 %v7350_v27 }
 0x214   :  { %1908 = vmatprep.subr.bf16.mxu0 %v7351_v48  ;;  %1949 = vmatprep.subr.bf16.mxu1 %v7352_v59 }
 0x217   :  { %1909 = vmatpush1.bf16.msra.mxu0 %v7353_v43  ;;  %1950 = vmatpush1.bf16.msra.mxu1 %v5114_v52 }
 0x218   :  { %1910 = vmatprep.subr.bf16.mxu0 %v7354_v55  ;;  %1951 = vmatprep.subr.bf16.mxu1 %v5120_v36 }
 0x21b   :  { %1911 = vmatpush1.bf16.msra.mxu0 %v7355_v4  ;;  %1952 = vmatpush1.bf16.msra.mxu1 %v5126_v17 }
 0x21c   :  { %1912 = vmatprep.subr.bf16.mxu0 %v7356_v42  ;;  %1953 = vmatprep.subr.bf16.mxu1 %v5132_v18 }
 0x21f   :  { %1913 = vmatpush1.bf16.msra.mxu0 %v7357_v44  ;;  %1954 = vmatpush1.bf16.msra.mxu1 %v5138_v38  ;;  %v7363_v38 = vld [vmem:[#allocation106_spill] sm:$0xff] }
 0x220   :  { %1914 = vmatprep.subr.bf16.mxu0 %v7358_v46  ;;  %1955 = vmatprep.subr.bf16.mxu1 %v5144_v61  ;;  %v7364_v61 = vld [vmem:[#allocation108_spill] sm:$0xff] }
 0x223   :  { %1915 = vmatpush1.bf16.msra.mxu0 %v7359_v62  ;;  %1956 = vmatpush1.bf16.msra.mxu1 %v5150_v35  ;;  %v7365_v35 = vld [vmem:[#allocation110_spill] sm:$0xff] }
 0x224   :  { %1916 = vmatprep.subr.bf16.mxu0 %v7360_v41  ;;  %1957 = vmatprep.subr.bf16.mxu1 %v5154_v1  ;;  %v7366_v1 = vld [vmem:[#allocation112_spill] sm:$0xff] }
 0x227   :  { %1917 = vmatpush1.bf16.msra.mxu0 %v7361_v63  ;;  %1958 = vmatpush1.bf16.msra.mxu1 %v5158_v13  ;;  %v7367_v13 = vld [vmem:[#allocation114_spill] sm:$0xff] }
 0x228   :  { %1918 = vmatprep.subr.bf16.mxu0 %v7362_v39  ;;  %1959 = vmatprep.subr.bf16.mxu1 %v5161_v21  ;;  %v7368_v21 = vld [vmem:[#allocation116_spill] sm:$0xff] }
 0x22b   :  { %1919 = vmatpush1.bf16.msra.mxu0 %v7363_v38  ;;  %1960 = vmatpush1.bf16.msra.mxu1 %v5166_v34  ;;  %v7369_v34 = vld [vmem:[#allocation118_spill] sm:$0xff] }
 0x22c   :  { %1920 = vmatprep.subr.bf16.mxu0 %v7364_v61  ;;  %1961 = vmatprep.subr.bf16.mxu1 %v5170_v3  ;;  %v7370_v3 = vld [vmem:[#allocation119_spill] sm:$0xff] }
 0x22f   :  { %1921 = vmatpush1.bf16.msra.mxu0 %v7365_v35  ;;  %1962 = vmatpush1.bf16.msra.mxu1 %v5174_v7  ;;  %v7371_v7 = vld [vmem:[#allocation120_spill] sm:$0xff] }
 0x230   :  { %1922 = vmatprep.subr.bf16.mxu0 %v7366_v1  ;;  %1963 = vmatprep.subr.bf16.mxu1 %v5178_v10  ;;  %v7372_v10 = vld [vmem:[#allocation121_spill] sm:$0xff] }
 0x233   :  { %1923 = vmatpush1.bf16.msra.mxu0 %v7367_v13  ;;  %1964 = vmatpush1.bf16.msra.mxu1 %v5182_v50 }
 0x234   :  { %1924 = vmatprep.subr.bf16.mxu0 %v7368_v21  ;;  %1965 = vmatprep.subr.bf16.mxu1 %v5186_v22  ;;  %v7373_v22 = vld [vmem:[#allocation124_spill] sm:$0xff] }
 0x237   :  { %1925 = vmatpush1.bf16.msra.mxu0 %v7369_v34  ;;  %1966 = vmatpush1.bf16.msra.mxu1 %v5190_v20  ;;  %v7374_v20 = vld [vmem:[#allocation126_spill] sm:$0xff] }
 0x238   :  { %1926 = vmatprep.subr.bf16.mxu0 %v7370_v3  ;;  %1967 = vmatprep.subr.bf16.mxu1 %v5194_v11  ;;  %v7375_v11 = vld [vmem:[#allocation20_spill] sm:$0xff] }
 0x23b   :  { %1927 = vmatpush1.bf16.msra.mxu0 %v7371_v7  ;;  %1968 = vmatpush1.bf16.msra.mxu1 %v5198_v24 }
 0x23c   :  { %1928 = vmatprep.subr.bf16.mxu0 %v7372_v10  ;;  %1969 = vmatprep.subr.bf16.mxu1 %v5202_v19  ;;  %v7376_v19 = vld [vmem:[#allocation22_spill] sm:$0xff]  ;;  %v7435_v10 = vld [vmem:[#allocation196_spill] sm:$0xff] }
 0x23f   :  { %1929 = vmatpush1.bf16.msra.mxu0 %v5136_v47  ;;  %1970 = vmatpush1.bf16.msra.mxu1 %v5206_v28  ;;  %v7377_v28 = vld [vmem:[#allocation23_spill] sm:$0xff] }
 0x240   :  { %1930 = vmatprep.subr.bf16.mxu0 %v7373_v22  ;;  %1971 = vmatprep.subr.bf16.mxu1 %v5210_v23  ;;  %v7378_v23 = vld [vmem:[#allocation24_spill] sm:$0xff] }
 0x243   :  { %1931 = vmatpush1.bf16.msra.mxu0 %v7374_v20  ;;  %1972 = vmatpush1.bf16.msra.mxu1 %v5214_v33  ;;  %v7379_v33 = vld [vmem:[#allocation25_spill] sm:$0xff] }
 0x244   :  { %2039 = vmatprep.subr.bf16.mxu0 %v7375_v11  ;;  %2080 = vmatprep.subr.bf16.mxu1 %v4775_v5  ;;  %v7380_v5 = vld [vmem:[#allocation26_spill] sm:$0xff] }
 0x246   :  { %1933 = vmatmul.mubr.bf16.vlgmr.msra.gmra.mrb[44].mxu0 %v5563_v60  ;;  %1974 = vmatmul.mubr.bf16.vlgmr.msra.gmra.mrb[60].mxu1 %v5563_v60  ;;  %v7381_v60 = vld [vmem:[#allocation27_spill] sm:$0xff] }
 0x247   :  { %2040 = vmatpush1.bf16.msra.mxu0 %v7376_v19  ;;  %2081 = vmatpush1.bf16.msra.mxu1 %v4853_v56  ;;  %v7382_v56 = vld [vmem:[#allocation28_spill] sm:$0xff]  ;;  %v7433_v19 = vld [vmem:[#allocation162_spill] sm:$0xff] }
 0x248   :  { %2041 = vmatprep.subr.bf16.mxu0 %v7377_v28  ;;  %2082 = vmatprep.subr.bf16.mxu1 %v4858_v58  ;;  %v7432_v28 = vld [vmem:[#allocation149_spill] sm:$0xff] }
 0x24b   :  { %2042 = vmatpush1.bf16.msra.mxu0 %v7378_v23  ;;  %2083 = vmatpush1.bf16.msra.mxu1 %v4868_v6  ;;  %v7430_v6 = vld [vmem:[#allocation147_spill] sm:$0xff]  ;;  %v7431_v23 = vld [vmem:[#allocation160_spill] sm:$0xff] }
 0x24c   :  { %2043 = vmatprep.subr.bf16.mxu0 %v7379_v33  ;;  %2084 = vmatprep.subr.bf16.mxu1 %v4874_v9  ;;  %v7383_v33 = vld [vmem:[#allocation55_spill] sm:$0xff] }
 0x24d   :  { %v7384_v9 = vld [vmem:[#allocation31_spill] sm:$0xff] }
 0x24f   :  { %2044 = vmatpush1.bf16.msra.mxu0 %v7380_v5  ;;  %2085 = vmatpush1.bf16.msra.mxu1 %v4882_v15  ;;  %v7385_v5 = vld [vmem:[#allocation57_spill] sm:$0xff]  ;;  %v7386_v15 = vld [vmem:[#allocation32_spill] sm:$0xff] }
 0x250   :  { %2045 = vmatprep.subr.bf16.mxu0 %v7381_v60  ;;  %2086 = vmatprep.subr.bf16.mxu1 %v4888_v0  ;;  %v7387_v60 = vld [vmem:[#allocation59_spill] sm:$0xff]  ;;  %v7388_v0 = vld [vmem:[#allocation33_spill] sm:$0xff] }
 0x253   :  { %2046 = vmatpush1.bf16.msra.mxu0 %v7382_v56  ;;  %2087 = vmatpush1.bf16.msra.mxu1 %v4896_v26  ;;  %v7389_v56 = vld [vmem:[#allocation61_spill] sm:$0xff]  ;;  %v7390_v26 = vld [vmem:[#allocation34_spill] sm:$0xff] }
 0x254   :  { %2047 = vmatprep.subr.bf16.mxu0 %v4809_v32  ;;  %2088 = vmatprep.subr.bf16.mxu1 %v4902_v30  ;;  %v7391_v32 = vld [vmem:[#allocation63_spill] sm:$0xff] }
 0x255   :  { %v7392_v30 = vld [vmem:[#allocation35_spill] sm:$0xff] }
 0x257   :  { %2048 = vmatpush1.bf16.msra.mxu0 %v4813_v37  ;;  %2089 = vmatpush1.bf16.msra.mxu1 %v7383_v33  ;;  %v7393_v37 = vld [vmem:[#allocation65_spill] sm:$0xff]  ;;  %v7394_v33 = vld [vmem:[#allocation36_spill] sm:$0xff] }
 0x258   :  { %2049 = vmatprep.subr.bf16.mxu0 %v7384_v9  ;;  %2090 = vmatprep.subr.bf16.mxu1 %v7385_v5  ;;  %v7395_v9 = vld [vmem:[#allocation67_spill] sm:$0xff]  ;;  %v7396_v5 = vld [vmem:[#allocation37_spill] sm:$0xff] }
 0x25b   :  { %2050 = vmatpush1.bf16.msra.mxu0 %v7386_v15  ;;  %2091 = vmatpush1.bf16.msra.mxu1 %v7387_v60  ;;  %v7397_v15 = vld [vmem:[#allocation68_spill] sm:$0xff]  ;;  %v7398_v60 = vld [vmem:[#allocation38_spill] sm:$0xff] }
 0x25c   :  { %2051 = vmatprep.subr.bf16.mxu0 %v7388_v0  ;;  %2092 = vmatprep.subr.bf16.mxu1 %v7389_v56  ;;  %v7399_v0 = vld [vmem:[#allocation70_spill] sm:$0xff]  ;;  %v7400_v56 = vld [vmem:[#allocation40_spill] sm:$0xff] }
 0x25f   :  { %2052 = vmatpush1.bf16.msra.mxu0 %v7390_v26  ;;  %2093 = vmatpush1.bf16.msra.mxu1 %v7391_v32  ;;  %v7401_v26 = vld [vmem:[#allocation72_spill] sm:$0xff]  ;;  %v7402_v32 = vld [vmem:[#allocation42_spill] sm:$0xff] }
 0x260   :  { %2053 = vmatprep.subr.bf16.mxu0 %v7392_v30  ;;  %2094 = vmatprep.subr.bf16.mxu1 %v7393_v37  ;;  %v7403_v30 = vld [vmem:[#allocation74_spill] sm:$0xff]  ;;  %v7404_v37 = vld [vmem:[#allocation44_spill] sm:$0xff] }
 0x263   :  { %2054 = vmatpush1.bf16.msra.mxu0 %v7394_v33  ;;  %2095 = vmatpush1.bf16.msra.mxu1 %v7395_v9  ;;  %v7405_v33 = vld [vmem:[#allocation76_spill] sm:$0xff]  ;;  %v7406_v9 = vld [vmem:[#allocation46_spill] sm:$0xff] }
 0x264   :  { %2055 = vmatprep.subr.bf16.mxu0 %v7396_v5  ;;  %2096 = vmatprep.subr.bf16.mxu1 %v7397_v15  ;;  %v7407_v5 = vld [vmem:[#allocation78_spill] sm:$0xff]  ;;  %v7408_v15 = vld [vmem:[#allocation48_spill] sm:$0xff] }
 0x267   :  { %2056 = vmatpush1.bf16.msra.mxu0 %v7398_v60  ;;  %2097 = vmatpush1.bf16.msra.mxu1 %v7399_v0  ;;  %v7409_v60 = vld [vmem:[#allocation80_spill] sm:$0xff]  ;;  %v7410_v0 = vld [vmem:[#allocation50_spill] sm:$0xff] }
 0x268   :  { %2057 = vmatprep.subr.bf16.mxu0 %v7400_v56  ;;  %2098 = vmatprep.subr.bf16.mxu1 %v7401_v26  ;;  %v7411_v56 = vld [vmem:[#allocation82_spill] sm:$0xff]  ;;  %v7412_v26 = vld [vmem:[#allocation52_spill] sm:$0xff] }
 0x26b   :  { %2058 = vmatpush1.bf16.msra.mxu0 %v7402_v32  ;;  %2099 = vmatpush1.bf16.msra.mxu1 %v7403_v30  ;;  %v7413_v32 = vld [vmem:[#allocation84_spill] sm:$0xff]  ;;  %v7414_v30 = vld [vmem:[#allocation54_spill] sm:$0xff] }
 0x26c   :  { %2059 = vmatprep.subr.bf16.mxu0 %v7404_v37  ;;  %2100 = vmatprep.subr.bf16.mxu1 %v7405_v33  ;;  %v7415_v37 = vld [vmem:[#allocation86_spill] sm:$0xff]  ;;  %v7416_v33 = vld [vmem:[#allocation56_spill] sm:$0xff] }
 0x26f   :  { %2060 = vmatpush1.bf16.msra.mxu0 %v7406_v9  ;;  %2101 = vmatpush1.bf16.msra.mxu1 %v7407_v5  ;;  %v7417_v9 = vld [vmem:[#allocation88_spill] sm:$0xff]  ;;  %v7418_v5 = vld [vmem:[#allocation58_spill] sm:$0xff] }
 0x270   :  { %2061 = vmatprep.subr.bf16.mxu0 %v7408_v15  ;;  %2102 = vmatprep.subr.bf16.mxu1 %v7409_v60  ;;  %v7419_v15 = vld [vmem:[#allocation90_spill] sm:$0xff]  ;;  %v7420_v60 = vld [vmem:[#allocation60_spill] sm:$0xff] }
 0x273   :  { %2062 = vmatpush1.bf16.msra.mxu0 %v7410_v0  ;;  %2103 = vmatpush1.bf16.msra.mxu1 %v7411_v56  ;;  %v7421_v0 = vld [vmem:[#allocation92_spill] sm:$0xff]  ;;  %v7422_v56 = vld [vmem:[#allocation62_spill] sm:$0xff] }
 0x274   :  { %2063 = vmatprep.subr.bf16.mxu0 %v7412_v26  ;;  %2104 = vmatprep.subr.bf16.mxu1 %v7413_v32  ;;  %v7423_v26 = vld [vmem:[#allocation94_spill] sm:$0xff]  ;;  %v7424_v32 = vld [vmem:[#allocation64_spill] sm:$0xff] }
 0x277   :  { %2064 = vmatpush1.bf16.msra.mxu0 %v7414_v30  ;;  %2105 = vmatpush1.bf16.msra.mxu1 %v7415_v37  ;;  %v7425_v30 = vld [vmem:[#allocation96_spill] sm:$0xff]  ;;  %v7426_v37 = vld [vmem:[#allocation66_spill] sm:$0xff] }
 0x278   :  { %2065 = vmatprep.subr.bf16.mxu0 %v7416_v33  ;;  %2106 = vmatprep.subr.bf16.mxu1 %v7417_v9  ;;  %v7427_v33 = vld [vmem:[#allocation98_spill] sm:$0xff]  ;;  %v7428_v9 = vld [vmem:[#allocation69_spill] sm:$0xff] }
 0x27b   :  { %2066 = vmatpush1.bf16.msra.mxu0 %v7418_v5  ;;  %2107 = vmatpush1.bf16.msra.mxu1 %v7419_v15  ;;  %v7429_v5 = vld [vmem:[#allocation101_spill] sm:$0xff] }
 0x27c   :  { %2067 = vmatprep.subr.bf16.mxu0 %v7420_v60  ;;  %2108 = vmatprep.subr.bf16.mxu1 %v7421_v0 }
 0x27f   :  { %2068 = vmatpush1.bf16.msra.mxu0 %v7422_v56  ;;  %2109 = vmatpush1.bf16.msra.mxu1 %v7423_v26 }
 0x280   :  { %2069 = vmatprep.subr.bf16.mxu0 %v7424_v32  ;;  %2110 = vmatprep.subr.bf16.mxu1 %v7425_v30 }
 0x283   :  { %2070 = vmatpush1.bf16.msra.mxu0 %v7426_v37  ;;  %2111 = vmatpush1.bf16.msra.mxu1 %v7427_v33 }
 0x284   :  { %2121 = vmatprep.subr.bf16.mxu0 %v7428_v9  ;;  %2162 = vmatprep.subr.bf16.mxu1 %v7429_v5 }
 0x2d9   :  { %v1852_v15 = vpop.f32.mrb[40].mxu0  ;;  %v1893_v60 = vpop.f32.mrb[56].mxu1 }
 0x2da   :  { %v1982_v0 = vadd.f32 %v1852_v15, %v7430_v6  ;;  %v1984_v56 = vadd.f32 %v1893_v60, %v7431_v23  ;;  %v1854_v58 = vpop.f32.mrb[41].mxu0  ;;  %v1895_v26 = vpop.f32.mrb[57].mxu1  ;;  %v7434_v23 = vld [vmem:[#allocation167_spill] sm:$0xff] }
 0x2db   :  { %v1983_v32 = vadd.f32 %v1854_v58, %v7432_v28  ;;  %v1985_v30 = vadd.f32 %v1895_v26, %v7433_v19  ;;  %v1856_v11 = vpop.f32.mrb[42].mxu0  ;;  %v1897_v37 = vpop.f32.mrb[58].mxu1 }
 0x2dc   :  { %v1857_v20 = vpop.f32.mrb[43].mxu0  ;;  %v1898_v33 = vpop.f32.mrb[59].mxu1  ;;  %v1992_v22 = vmul.f32 0.5, %v1984_v56  ;;  %v1990_v47 = vmul.f32 0.5, %v1982_v0  ;;  %v7436_v11 = vld [vmem:[#allocation169_spill] sm:$0xff] }
 0x2dd   :  { %v1993_v9 = vmul.f32 0.5, %v1985_v30  ;;  %v1991_v5 = vmul.f32 0.5, %v1983_v32  ;;  %v7437_v20 = vld [vmem:[#allocation198_spill] sm:$0xff] }
 0x2de   :  { %4262 = vtanh.f32 %v1992_v22 }
 0x2df   :  { %4264 = vtanh.f32 %v1993_v9 }
 0x2e0   :  { %4266 = vtanh.f32 %v1990_v47 }
 0x2e1   :  { %4268 = vtanh.f32 %v1991_v5 }
 0x2e8   :  { %v4263_v0 = vpop.eup %4262 }
 0x2e9   :  { %v4265_v47 = vpop.eup %4264  ;;  %v2004_v33 = vmul.f32 0.5, %v4263_v0 }
 0x2ea   :  { %v4267_v5 = vpop.eup %4266 }
 0x2eb   :  { %v4269_v22 = vpop.eup %4268  ;;  %v2010_v7 = vadd.f32 0.5, %v2004_v33 }
 0x2ec   :  { %v2003_v24 = vmul.f32 0.5, %v4269_v22 }
 0x319   :  { %v1934_v6 = vpop.f32.mrb[44].mxu0  ;;  %v1975_v15 = vpop.f32.mrb[60].mxu1 }
 0x31a   :  { %v1986_v60 = vadd.f32 %v1934_v6, %v7434_v23  ;;  %v1988_v28 = vadd.f32 %v1975_v15, %v7435_v10  ;;  %v1936_v58 = vpop.f32.mrb[45].mxu0  ;;  %v1977_v26 = vpop.f32.mrb[61].mxu1  ;;  %v2005_v23 = vmul.f32 0.5, %v4265_v47  ;;  %v2002_v15 = vmul.f32 0.5, %v4267_v5 }
 0x31b   :  { %v1987_v37 = vadd.f32 %v1936_v58, %v7436_v11  ;;  %v1989_v19 = vadd.f32 %v1977_v26, %v7437_v20  ;;  %v1938_v56 = vpop.f32.mrb[46].mxu0  ;;  %v1979_v30 = vpop.f32.mrb[62].mxu1  ;;  %v2009_v20 = vadd.f32 0.5, %v2003_v24 }
 0x31c   :  { %4270 = vtanh.f32 %v1988_v28  ;;  %v1939_v32 = vpop.f32.mrb[47].mxu0  ;;  %v1980_v9 = vpop.f32.mrb[63].mxu1  ;;  %v1994_v6 = vmul.f32 0.5, %v1986_v60  ;;  %v2011_v58 = vadd.f32 0.5, %v2005_v23  ;;  %v2008_v26 = vadd.f32 0.5, %v2002_v15  ;;  %v7439_v15 = vld [vmem:[#allocation125_spill] sm:$0xff] }
 0x31d   :  { %4272 = vtanh.f32 %v1989_v19  ;;  %v1995_v10 = vmul.f32 0.5, %v1987_v37  ;;  %v2016_v56 = vmul.f32 %v2010_v7, %v5557_v45 }
 0x31e   :  { %4274 = vtanh.f32 %v1994_v6  ;;  %v2017_v19 = vmul.f32 %v2011_v58, %v5559_v16  ;;  %v7440_v58 = vld [vmem:[#allocation127_spill] sm:$0xff] }
 0x31f   :  { %4276 = vtanh.f32 %v1995_v10  ;;  %v7438_v10 = vld [vmem:[#allocation123_spill] sm:$0xff] }
 0x326   :  { %v4271_v11 = vpop.eup %4270 }
 0x327   :  { %v4273_v28 = vpop.eup %4272  ;;  %v2018_v30 = vmul.f32 %v4271_v11, %v2008_v26  ;;  %v7441_v26 = vld [vmem:[#allocation128_spill] sm:$0xff]  ;;  %v7442_v11 = vld [vmem:[#allocation129_spill] sm:$0xff] }
 0x328   :  { %v2019_v32 = vmul.f32 %v4273_v28, %v2009_v20  ;;  %v4275_v37 = vpop.eup %4274  ;;  %v7443_v20 = vld [vmem:[#allocation130_spill] sm:$0xff]  ;;  %v7444_v28 = vld [vmem:[#allocation131_spill] sm:$0xff] }
 0x329   :  { %v5707_v0 = vadd.f32 %v2018_v30, %v2016_v56  ;;  %v4277_v9 = vpop.eup %4276  ;;  %v2006_v47 = vmul.f32 0.5, %v4275_v37  ;;  %v7445_v56 = vld [vmem:[#allocation132_spill] sm:$0xff]  ;;  %v7446_v30 = vld [vmem:[#allocation133_spill] sm:$0xff] }
 0x32a   :  { %v5709_v60 = vadd.f32 %v2019_v32, %v2017_v19  ;;  %v2007_v5 = vmul.f32 0.5, %v4277_v9  ;;  %v7447_v19 = vld [vmem:[#allocation134_spill] sm:$0xff]  ;;  %v7448_v32 = vld [vmem:[#allocation136_spill] sm:$0xff]  ;;  %v7449_v37 = vld [vmem:[#allocation137_spill] sm:$0xff] }
 0x32b   :  { %4278 = vtanh.f32 %v5707_v0  ;;  %v2012_v24 = vadd.f32 0.5, %v2006_v47  ;;  %v7450_v9 = vld [vmem:[#allocation138_spill] sm:$0xff]  ;;  %v7451_v47 = vld [vmem:[#allocation120_spill] sm:$0xff] }
 0x32c   :  { %4280 = vtanh.f32 %v5709_v60  ;;  %v2013_v33 = vadd.f32 0.5, %v2007_v5  ;;  %v7452_v5 = vld [vmem:[#allocation139_spill] sm:$0xff] }
 0x335   :  { %v4279_v22 = vpop.eup %4278 }
 0x336   :  { %v4281_v7 = vpop.eup %4280  ;;  %v2024_v45 = vmul.f32 %v4279_v22, %v2012_v24  ;;  %v7453_v24 = vld [vmem:[#allocation121_spill] sm:$0xff]  ;;  %v7454_v22 = vld [vmem:[#allocation140_spill] sm:$0xff] }
 0x337   :  { %v2025_v6 = vmul.f32 %v4281_v7, %v2013_v33  ;;  %v7455_v33 = vld [vmem:[#allocation122_spill] sm:$0xff]  ;;  %v7456_v7 = vld [vmem:[#allocation141_spill] sm:$0xff] }
 0x338   :  { %v5713_v23 = vpack.c.bf16 %v2024_v45, %v2024_v45  ;;  %v7457_v45 = vld [vmem:[#allocation124_spill] sm:$0xff] }
 0x339   :  { %v2038_v16 = vpack.c.bf16 %v2025_v6, %v2025_v6  ;;  %v7458_v6 = vld [vmem:[#allocation142_spill] sm:$0xff] }
 0x33b   :  { %2071 = vmatprep.mubr.bf16.mxu0 %v2038_v16  ;;  %2112 = vmatprep.mubr.bf16.mxu1 %v2038_v16 }
 0x33c   :  { %2072 = vmatmul.mubr.bf16.vlgmr.msra.gmra.mrb[48].mxu0 %v5713_v23  ;;  %2113 = vmatmul.mubr.bf16.vlgmr.msra.gmra.mrb[64].mxu1 %v5713_v23 }
 0x33d   :  { %2122 = vmatpush1.bf16.msra.mxu0 %v7337_v49  ;;  %2163 = vmatpush1.bf16.msra.mxu1 %v7338_v25 }
 0x33e   :  { %2153 = vmatprep.mubr.bf16.mxu0 %v2038_v16  ;;  %2194 = vmatprep.mubr.bf16.mxu1 %v2038_v16  ;;  %v7459_v16 = vld [vmem:[#allocation126_spill] sm:$0xff] }
 0x33f   :  { %2123 = vmatprep.subr.bf16.mxu0 %v7339_v31  ;;  %2164 = vmatprep.subr.bf16.mxu1 %v7340_v2 }
 0x341   :  { %2124 = vmatpush1.bf16.msra.mxu0 %v7341_v40  ;;  %2165 = vmatpush1.bf16.msra.mxu1 %v7342_v12 }
 0x342   :  { %2125 = vmatprep.subr.bf16.mxu0 %v7343_v14  ;;  %2166 = vmatprep.subr.bf16.mxu1 %v7344_v53 }
 0x345   :  { %2126 = vmatpush1.bf16.msra.mxu0 %v7345_v54  ;;  %2167 = vmatpush1.bf16.msra.mxu1 %v7346_v29 }
 0x346   :  { %2127 = vmatprep.subr.bf16.mxu0 %v7347_v57  ;;  %2168 = vmatprep.subr.bf16.mxu1 %v7348_v8 }
 0x349   :  { %2128 = vmatpush1.bf16.msra.mxu0 %v7349_v51  ;;  %2169 = vmatpush1.bf16.msra.mxu1 %v7350_v27 }
 0x34a   :  { %2129 = vmatprep.subr.bf16.mxu0 %v7351_v48  ;;  %2170 = vmatprep.subr.bf16.mxu1 %v7352_v59 }
 0x34d   :  { %2130 = vmatpush1.bf16.msra.mxu0 %v7353_v43  ;;  %2171 = vmatpush1.bf16.msra.mxu1 %v5114_v52 }
 0x34e   :  { %2131 = vmatprep.subr.bf16.mxu0 %v7354_v55  ;;  %2172 = vmatprep.subr.bf16.mxu1 %v5120_v36 }
 0x351   :  { %2132 = vmatpush1.bf16.msra.mxu0 %v7355_v4  ;;  %2173 = vmatpush1.bf16.msra.mxu1 %v5126_v17 }
 0x352   :  { %2133 = vmatprep.subr.bf16.mxu0 %v7356_v42  ;;  %2174 = vmatprep.subr.bf16.mxu1 %v5132_v18 }
 0x355   :  { %2134 = vmatpush1.bf16.msra.mxu0 %v7357_v44  ;;  %2175 = vmatpush1.bf16.msra.mxu1 %v7438_v10 }
 0x356   :  { %2135 = vmatprep.subr.bf16.mxu0 %v7358_v46  ;;  %2176 = vmatprep.subr.bf16.mxu1 %v7439_v15 }
 0x359   :  { %2136 = vmatpush1.bf16.msra.mxu0 %v7359_v62  ;;  %2177 = vmatpush1.bf16.msra.mxu1 %v7440_v58 }
 0x35a   :  { %2137 = vmatprep.subr.bf16.mxu0 %v7360_v41  ;;  %2178 = vmatprep.subr.bf16.mxu1 %v7441_v26 }
 0x35d   :  { %2138 = vmatpush1.bf16.msra.mxu0 %v7361_v63  ;;  %2179 = vmatpush1.bf16.msra.mxu1 %v7442_v11 }
 0x35e   :  { %2139 = vmatprep.subr.bf16.mxu0 %v7362_v39  ;;  %2180 = vmatprep.subr.bf16.mxu1 %v7443_v20 }
 0x361   :  { %2140 = vmatpush1.bf16.msra.mxu0 %v7363_v38  ;;  %2181 = vmatpush1.bf16.msra.mxu1 %v7444_v28 }
 0x362   :  { %2141 = vmatprep.subr.bf16.mxu0 %v7364_v61  ;;  %2182 = vmatprep.subr.bf16.mxu1 %v7445_v56 }
 0x365   :  { %2142 = vmatpush1.bf16.msra.mxu0 %v7365_v35  ;;  %2183 = vmatpush1.bf16.msra.mxu1 %v7446_v30  ;;  %v7532_v30 = vld [vmem:[#allocation200_spill] sm:$0xff] }
 0x366   :  { %2143 = vmatprep.subr.bf16.mxu0 %v7366_v1  ;;  %2184 = vmatprep.subr.bf16.mxu1 %v7447_v19 }
 0x369   :  { %2144 = vmatpush1.bf16.msra.mxu0 %v7367_v13  ;;  %2185 = vmatpush1.bf16.msra.mxu1 %v5182_v50 }
 0x36a   :  { %2145 = vmatprep.subr.bf16.mxu0 %v7368_v21  ;;  %2186 = vmatprep.subr.bf16.mxu1 %v7448_v32  ;;  %v7529_v32 = vld [vmem:[#allocation153_spill] sm:$0xff] }
 0x36b   :  { %v7530_v21 = vld [vmem:[#allocation165_spill] sm:$0xff] }
 0x36d   :  { %2146 = vmatpush1.bf16.msra.mxu0 %v7369_v34  ;;  %2187 = vmatpush1.bf16.msra.mxu1 %v7449_v37  ;;  %v7528_v37 = vld [vmem:[#allocation164_spill] sm:$0xff] }
 0x36e   :  { %2147 = vmatprep.subr.bf16.mxu0 %v7370_v3  ;;  %2188 = vmatprep.subr.bf16.mxu1 %v7450_v9  ;;  %v7460_v3 = vld [vmem:[#allocation143_spill] sm:$0xff]  ;;  %v7461_v9 = vld [vmem:[#allocation20_spill] sm:$0xff] }
 0x371   :  { %2148 = vmatpush1.bf16.msra.mxu0 %v7451_v47  ;;  %2189 = vmatpush1.bf16.msra.mxu1 %v7452_v5  ;;  %v7462_v47 = vld [vmem:[#allocation21_spill] sm:$0xff]  ;;  %v7527_v5 = vld [vmem:[#allocation151_spill] sm:$0xff] }
 0x372   :  { %2149 = vmatprep.subr.bf16.mxu0 %v7453_v24  ;;  %2190 = vmatprep.subr.bf16.mxu1 %v7454_v22  ;;  %v7463_v22 = vld [vmem:[#allocation22_spill] sm:$0xff]  ;;  %v7472_v24 = vld [vmem:[#allocation47_spill] sm:$0xff] }
 0x375   :  { %2150 = vmatpush1.bf16.msra.mxu0 %v7455_v33  ;;  %2191 = vmatpush1.bf16.msra.mxu1 %v7456_v7  ;;  %v7464_v33 = vld [vmem:[#allocation39_spill] sm:$0xff] }
 0x376   :  { %2151 = vmatprep.subr.bf16.mxu0 %v7457_v45  ;;  %2192 = vmatprep.subr.bf16.mxu1 %v7458_v6  ;;  %v7465_v7 = vld [vmem:[#allocation23_spill] sm:$0xff]  ;;  %v7466_v45 = vld [vmem:[#allocation41_spill] sm:$0xff]  ;;  %v7467_v6 = vld [vmem:[#allocation24_spill] sm:$0xff] }
 0x379   :  { %2152 = vmatpush1.bf16.msra.mxu0 %v7459_v16  ;;  %2193 = vmatpush1.bf16.msra.mxu1 %v7460_v3  ;;  %v7468_v16 = vld [vmem:[#allocation43_spill] sm:$0xff]  ;;  %v7469_v3 = vld [vmem:[#allocation25_spill] sm:$0xff] }
 0x37a   :  { %2260 = vmatprep.subr.bf16.mxu0 %v7461_v9  ;;  %2301 = vmatprep.subr.bf16.mxu1 %v7462_v47  ;;  %v7470_v9 = vld [vmem:[#allocation45_spill] sm:$0xff]  ;;  %v7471_v47 = vld [vmem:[#allocation26_spill] sm:$0xff] }
 0x37c   :  { %2154 = vmatmul.mubr.bf16.vlgmr.msra.gmra.mrb[52].mxu0 %v5713_v23  ;;  %2195 = vmatmul.mubr.bf16.vlgmr.msra.gmra.mrb[68].mxu1 %v5713_v23  ;;  %v7473_v23 = vld [vmem:[#allocation27_spill] sm:$0xff] }
 0x37d   :  { %2261 = vmatpush1.bf16.msra.mxu0 %v7463_v22  ;;  %2302 = vmatpush1.bf16.msra.mxu1 %v7464_v33  ;;  %v7474_v22 = vld [vmem:[#allocation49_spill] sm:$0xff]  ;;  %v7475_v33 = vld [vmem:[#allocation28_spill] sm:$0xff] }
 0x37e   :  { %2262 = vmatprep.subr.bf16.mxu0 %v7465_v7  ;;  %2303 = vmatprep.subr.bf16.mxu1 %v7466_v45  ;;  %v7476_v7 = vld [vmem:[#allocation51_spill] sm:$0xff]  ;;  %v7477_v45 = vld [vmem:[#allocation29_spill] sm:$0xff] }
 0x381   :  { %2263 = vmatpush1.bf16.msra.mxu0 %v7467_v6  ;;  %2304 = vmatpush1.bf16.msra.mxu1 %v7468_v16  ;;  %v7478_v6 = vld [vmem:[#allocation53_spill] sm:$0xff]  ;;  %v7479_v16 = vld [vmem:[#allocation30_spill] sm:$0xff] }
 0x382   :  { %2264 = vmatprep.subr.bf16.mxu0 %v7469_v3  ;;  %2305 = vmatprep.subr.bf16.mxu1 %v7470_v9  ;;  %v7480_v3 = vld [vmem:[#allocation55_spill] sm:$0xff] }
 0x383   :  { %v7481_v9 = vld [vmem:[#allocation31_spill] sm:$0xff] }
 0x385   :  { %2265 = vmatpush1.bf16.msra.mxu0 %v7471_v47  ;;  %2306 = vmatpush1.bf16.msra.mxu1 %v7472_v24  ;;  %v7482_v47 = vld [vmem:[#allocation57_spill] sm:$0xff]  ;;  %v7483_v24 = vld [vmem:[#allocation32_spill] sm:$0xff] }
 0x386   :  { %2266 = vmatprep.subr.bf16.mxu0 %v7473_v23  ;;  %2307 = vmatprep.subr.bf16.mxu1 %v7474_v22  ;;  %v7484_v23 = vld [vmem:[#allocation59_spill] sm:$0xff]  ;;  %v7485_v22 = vld [vmem:[#allocation33_spill] sm:$0xff] }
 0x389   :  { %2267 = vmatpush1.bf16.msra.mxu0 %v7475_v33  ;;  %2308 = vmatpush1.bf16.msra.mxu1 %v7476_v7  ;;  %v7486_v33 = vld [vmem:[#allocation61_spill] sm:$0xff]  ;;  %v7487_v7 = vld [vmem:[#allocation34_spill] sm:$0xff] }
 0x38a   :  { %2268 = vmatprep.subr.bf16.mxu0 %v7477_v45  ;;  %2309 = vmatprep.subr.bf16.mxu1 %v7478_v6  ;;  %v7488_v45 = vld [vmem:[#allocation63_spill] sm:$0xff] }
 0x38b   :  { %v7489_v6 = vld [vmem:[#allocation35_spill] sm:$0xff] }
 0x38d   :  { %2269 = vmatpush1.bf16.msra.mxu0 %v7479_v16  ;;  %2310 = vmatpush1.bf16.msra.mxu1 %v7480_v3  ;;  %v7490_v16 = vld [vmem:[#allocation65_spill] sm:$0xff]  ;;  %v7491_v3 = vld [vmem:[#allocation36_spill] sm:$0xff] }
 0x38e   :  { %2270 = vmatprep.subr.bf16.mxu0 %v7481_v9  ;;  %2311 = vmatprep.subr.bf16.mxu1 %v7482_v47  ;;  %v7492_v9 = vld [vmem:[#allocation67_spill] sm:$0xff]  ;;  %v7493_v47 = vld [vmem:[#allocation37_spill] sm:$0xff] }
 0x391   :  { %2271 = vmatpush1.bf16.msra.mxu0 %v7483_v24  ;;  %2312 = vmatpush1.bf16.msra.mxu1 %v7484_v23  ;;  %v7494_v24 = vld [vmem:[#allocation68_spill] sm:$0xff]  ;;  %v7495_v23 = vld [vmem:[#allocation38_spill] sm:$0xff] }
 0x392   :  { %2272 = vmatprep.subr.bf16.mxu0 %v7485_v22  ;;  %2313 = vmatprep.subr.bf16.mxu1 %v7486_v33  ;;  %v7496_v22 = vld [vmem:[#allocation70_spill] sm:$0xff]  ;;  %v7497_v33 = vld [vmem:[#allocation40_spill] sm:$0xff] }
 0x395   :  { %2273 = vmatpush1.bf16.msra.mxu0 %v7487_v7  ;;  %2314 = vmatpush1.bf16.msra.mxu1 %v7488_v45  ;;  %v7498_v7 = vld [vmem:[#allocation72_spill] sm:$0xff]  ;;  %v7499_v45 = vld [vmem:[#allocation42_spill] sm:$0xff] }
 0x396   :  { %2274 = vmatprep.subr.bf16.mxu0 %v7489_v6  ;;  %2315 = vmatprep.subr.bf16.mxu1 %v7490_v16  ;;  %v7500_v6 = vld [vmem:[#allocation74_spill] sm:$0xff]  ;;  %v7501_v16 = vld [vmem:[#allocation44_spill] sm:$0xff] }
 0x399   :  { %2275 = vmatpush1.bf16.msra.mxu0 %v7491_v3  ;;  %2316 = vmatpush1.bf16.msra.mxu1 %v7492_v9  ;;  %v7502_v3 = vld [vmem:[#allocation76_spill] sm:$0xff]  ;;  %v7503_v9 = vld [vmem:[#allocation46_spill] sm:$0xff] }
 0x39a   :  { %2276 = vmatprep.subr.bf16.mxu0 %v7493_v47  ;;  %2317 = vmatprep.subr.bf16.mxu1 %v7494_v24  ;;  %v7504_v47 = vld [vmem:[#allocation78_spill] sm:$0xff]  ;;  %v7505_v24 = vld [vmem:[#allocation48_spill] sm:$0xff] }
 0x39d   :  { %2277 = vmatpush1.bf16.msra.mxu0 %v7495_v23  ;;  %2318 = vmatpush1.bf16.msra.mxu1 %v7496_v22  ;;  %v7506_v23 = vld [vmem:[#allocation80_spill] sm:$0xff]  ;;  %v7507_v22 = vld [vmem:[#allocation50_spill] sm:$0xff] }
 0x39e   :  { %2278 = vmatprep.subr.bf16.mxu0 %v7497_v33  ;;  %2319 = vmatprep.subr.bf16.mxu1 %v7498_v7  ;;  %v7508_v33 = vld [vmem:[#allocation82_spill] sm:$0xff]  ;;  %v7509_v7 = vld [vmem:[#allocation52_spill] sm:$0xff] }
 0x3a1   :  { %2279 = vmatpush1.bf16.msra.mxu0 %v7499_v45  ;;  %2320 = vmatpush1.bf16.msra.mxu1 %v7500_v6  ;;  %v7510_v45 = vld [vmem:[#allocation84_spill] sm:$0xff]  ;;  %v7511_v6 = vld [vmem:[#allocation54_spill] sm:$0xff] }
 0x3a2   :  { %2280 = vmatprep.subr.bf16.mxu0 %v7501_v16  ;;  %2321 = vmatprep.subr.bf16.mxu1 %v7502_v3  ;;  %v7512_v16 = vld [vmem:[#allocation86_spill] sm:$0xff]  ;;  %v7513_v3 = vld [vmem:[#allocation56_spill] sm:$0xff] }
 0x3a5   :  { %2281 = vmatpush1.bf16.msra.mxu0 %v7503_v9  ;;  %2322 = vmatpush1.bf16.msra.mxu1 %v7504_v47  ;;  %v7514_v9 = vld [vmem:[#allocation88_spill] sm:$0xff]  ;;  %v7515_v47 = vld [vmem:[#allocation58_spill] sm:$0xff] }
 0x3a6   :  { %2282 = vmatprep.subr.bf16.mxu0 %v7505_v24  ;;  %2323 = vmatprep.subr.bf16.mxu1 %v7506_v23  ;;  %v7516_v24 = vld [vmem:[#allocation90_spill] sm:$0xff]  ;;  %v7517_v23 = vld [vmem:[#allocation60_spill] sm:$0xff] }
 0x3a9   :  { %2283 = vmatpush1.bf16.msra.mxu0 %v7507_v22  ;;  %2324 = vmatpush1.bf16.msra.mxu1 %v7508_v33  ;;  %v7518_v22 = vld [vmem:[#allocation92_spill] sm:$0xff]  ;;  %v7519_v33 = vld [vmem:[#allocation62_spill] sm:$0xff] }
 0x3aa   :  { %2284 = vmatprep.subr.bf16.mxu0 %v7509_v7  ;;  %2325 = vmatprep.subr.bf16.mxu1 %v7510_v45  ;;  %v7520_v7 = vld [vmem:[#allocation94_spill] sm:$0xff]  ;;  %v7521_v45 = vld [vmem:[#allocation64_spill] sm:$0xff] }
 0x3ad   :  { %2285 = vmatpush1.bf16.msra.mxu0 %v7511_v6  ;;  %2326 = vmatpush1.bf16.msra.mxu1 %v7512_v16  ;;  %v7522_v6 = vld [vmem:[#allocation96_spill] sm:$0xff]  ;;  %v7523_v16 = vld [vmem:[#allocation66_spill] sm:$0xff] }
 0x3ae   :  { %2286 = vmatprep.subr.bf16.mxu0 %v7513_v3  ;;  %2327 = vmatprep.subr.bf16.mxu1 %v7514_v9  ;;  %v7524_v3 = vld [vmem:[#allocation98_spill] sm:$0xff]  ;;  %v7525_v9 = vld [vmem:[#allocation69_spill] sm:$0xff] }
 0x3b1   :  { %2287 = vmatpush1.bf16.msra.mxu0 %v7515_v47  ;;  %2328 = vmatpush1.bf16.msra.mxu1 %v7516_v24  ;;  %v7526_v47 = vld [vmem:[#allocation101_spill] sm:$0xff] }
 0x3b2   :  { %2288 = vmatprep.subr.bf16.mxu0 %v7517_v23  ;;  %2329 = vmatprep.subr.bf16.mxu1 %v7518_v22 }
 0x3b5   :  { %2289 = vmatpush1.bf16.msra.mxu0 %v7519_v33  ;;  %2330 = vmatpush1.bf16.msra.mxu1 %v7520_v7 }
 0x3b6   :  { %2290 = vmatprep.subr.bf16.mxu0 %v7521_v45  ;;  %2331 = vmatprep.subr.bf16.mxu1 %v7522_v6 }
 0x3b9   :  { %2291 = vmatpush1.bf16.msra.mxu0 %v7523_v16  ;;  %2332 = vmatpush1.bf16.msra.mxu1 %v7524_v3 }
 0x3ba   :  { %2342 = vmatprep.subr.bf16.mxu0 %v7525_v9  ;;  %2383 = vmatprep.subr.bf16.mxu1 %v7526_v47 }
 0x40f   :  { %v2073_v24 = vpop.f32.mrb[48].mxu0  ;;  %v2114_v23 = vpop.f32.mrb[64].mxu1 }
 0x410   :  { %v2203_v22 = vadd.f32 %v2073_v24, %v7527_v5  ;;  %v2205_v33 = vadd.f32 %v2114_v23, %v7528_v37  ;;  %v2075_v34 = vpop.f32.mrb[49].mxu0  ;;  %v2116_v7 = vpop.f32.mrb[65].mxu1  ;;  %v7531_v24 = vld [vmem:[#allocation171_spill] sm:$0xff] }
 0x411   :  { %v2204_v45 = vadd.f32 %v2075_v34, %v7529_v32  ;;  %v2206_v6 = vadd.f32 %v2116_v7, %v7530_v21  ;;  %v2077_v50 = vpop.f32.mrb[50].mxu0  ;;  %v2118_v16 = vpop.f32.mrb[66].mxu1 }
 0x412   :  { %v2078_v13 = vpop.f32.mrb[51].mxu0  ;;  %v2119_v3 = vpop.f32.mrb[67].mxu1  ;;  %v2213_v19 = vmul.f32 0.5, %v2205_v33  ;;  %v2211_v1 = vmul.f32 0.5, %v2203_v22  ;;  %v7533_v50 = vld [vmem:[#allocation173_spill] sm:$0xff] }
 0x413   :  { %v2214_v9 = vmul.f32 0.5, %v2206_v6  ;;  %v2212_v47 = vmul.f32 0.5, %v2204_v45  ;;  %v7534_v13 = vld [vmem:[#allocation201_spill] sm:$0xff] }
 0x414   :  { %4282 = vtanh.f32 %v2213_v19 }
 0x415   :  { %4284 = vtanh.f32 %v2214_v9 }
 0x416   :  { %4286 = vtanh.f32 %v2211_v1 }
 0x417   :  { %4288 = vtanh.f32 %v2212_v47 }
 0x41e   :  { %v4283_v22 = vpop.eup %4282 }
 0x41f   :  { %v4285_v1 = vpop.eup %4284  ;;  %v2225_v16 = vmul.f32 0.5, %v4283_v22 }
 0x420   :  { %v4287_v47 = vpop.eup %4286 }
 0x421   :  { %v4289_v45 = vpop.eup %4288  ;;  %v2231_v56 = vadd.f32 0.5, %v2225_v16 }
 0x422   :  { %v2224_v35 = vmul.f32 0.5, %v4289_v45 }
 0x44f   :  { %v2155_v5 = vpop.f32.mrb[52].mxu0  ;;  %v2196_v37 = vpop.f32.mrb[68].mxu1 }
 0x450   :  { %v2207_v23 = vadd.f32 %v2155_v5, %v7531_v24  ;;  %v2209_v34 = vadd.f32 %v2196_v37, %v7532_v30  ;;  %v2157_v32 = vpop.f32.mrb[53].mxu0  ;;  %v2198_v21 = vpop.f32.mrb[69].mxu1  ;;  %v2226_v24 = vmul.f32 0.5, %v4285_v1  ;;  %v2223_v37 = vmul.f32 0.5, %v4287_v47 }
 0x451   :  { %v2208_v7 = vadd.f32 %v2157_v32, %v7533_v50  ;;  %v2210_v3 = vadd.f32 %v2198_v21, %v7534_v13  ;;  %v2159_v33 = vpop.f32.mrb[54].mxu0  ;;  %v2200_v6 = vpop.f32.mrb[70].mxu1  ;;  %v2230_v13 = vadd.f32 0.5, %v2224_v35 }
 0x452   :  { %4290 = vtanh.f32 %v2209_v34  ;;  %v2160_v19 = vpop.f32.mrb[55].mxu0  ;;  %v2201_v9 = vpop.f32.mrb[71].mxu1  ;;  %v2215_v5 = vmul.f32 0.5, %v2207_v23  ;;  %v2232_v32 = vadd.f32 0.5, %v2226_v24  ;;  %v2229_v21 = vadd.f32 0.5, %v2223_v37  ;;  %v7536_v37 = vld [vmem:[#allocation110_spill] sm:$0xff] }
 0x453   :  { %4292 = vtanh.f32 %v2210_v3  ;;  %v2216_v30 = vmul.f32 0.5, %v2208_v7  ;;  %v2237_v33 = vmul.f32 %v2231_v56, %v5707_v0 }
 0x454   :  { %4294 = vtanh.f32 %v2215_v5  ;;  %v2238_v3 = vmul.f32 %v2232_v32, %v5709_v60  ;;  %v7537_v32 = vld [vmem:[#allocation133_spill] sm:$0xff] }
 0x455   :  { %4296 = vtanh.f32 %v2216_v30  ;;  %v7535_v30 = vld [vmem:[#allocation132_spill] sm:$0xff] }
 0x45c   :  { %v4291_v50 = vpop.eup %4290 }
 0x45d   :  { %v4293_v34 = vpop.eup %4292  ;;  %v2239_v6 = vmul.f32 %v4291_v50, %v2229_v21  ;;  %v7538_v21 = vld [vmem:[#allocation112_spill] sm:$0xff]  ;;  %v7539_v50 = vld [vmem:[#allocation134_spill] sm:$0xff] }
 0x45e   :  { %v2240_v19 = vmul.f32 %v4293_v34, %v2230_v13  ;;  %v4295_v7 = vpop.eup %4294  ;;  %v7540_v13 = vld [vmem:[#allocation114_spill] sm:$0xff]  ;;  %v7541_v34 = vld [vmem:[#allocation135_spill] sm:$0xff] }
 0x45f   :  { %v5857_v22 = vadd.f32 %v2239_v6, %v2237_v33  ;;  %v4297_v9 = vpop.eup %4296  ;;  %v2227_v1 = vmul.f32 0.5, %v4295_v7  ;;  %v7542_v33 = vld [vmem:[#allocation116_spill] sm:$0xff]  ;;  %v7546_v7 = vld [vmem:[#allocation119_spill] sm:$0xff] }
 0x460   :  { %v5859_v23 = vadd.f32 %v2240_v19, %v2238_v3  ;;  %v2228_v47 = vmul.f32 0.5, %v4297_v9  ;;  %v7543_v6 = vld [vmem:[#allocation136_spill] sm:$0xff]  ;;  %v7544_v3 = vld [vmem:[#allocation118_spill] sm:$0xff]  ;;  %v7545_v19 = vld [vmem:[#allocation137_spill] sm:$0xff] }
 0x461   :  { %4298 = vtanh.f32 %v5857_v22  ;;  %v2233_v35 = vadd.f32 0.5, %v2227_v1  ;;  %v7547_v9 = vld [vmem:[#allocation138_spill] sm:$0xff]  ;;  %v7548_v1 = vld [vmem:[#allocation120_spill] sm:$0xff] }
 0x462   :  { %4300 = vtanh.f32 %v5859_v23  ;;  %v2234_v16 = vadd.f32 0.5, %v2228_v47  ;;  %v7549_v47 = vld [vmem:[#allocation139_spill] sm:$0xff] }
 0x46b   :  { %v4299_v45 = vpop.eup %4298 }
 0x46c   :  { %v4301_v0 = vpop.eup %4300  ;;  %v2245_v56 = vmul.f32 %v4299_v45, %v2233_v35  ;;  %v7550_v35 = vld [vmem:[#allocation121_spill] sm:$0xff]  ;;  %v7551_v45 = vld [vmem:[#allocation140_spill] sm:$0xff] }
 0x46d   :  { %v2246_v5 = vmul.f32 %v4301_v0, %v2234_v16  ;;  %v7552_v16 = vld [vmem:[#allocation122_spill] sm:$0xff]  ;;  %v7553_v0 = vld [vmem:[#allocation141_spill] sm:$0xff] }
 0x46e   :  { %v5863_v24 = vpack.c.bf16 %v2245_v56, %v2245_v56  ;;  %v7554_v56 = vld [vmem:[#allocation124_spill] sm:$0xff] }
 0x46f   :  { %v2259_v60 = vpack.c.bf16 %v2246_v5, %v2246_v5  ;;  %v7555_v5 = vld [vmem:[#allocation142_spill] sm:$0xff] }
 0x471   :  { %2292 = vmatprep.mubr.bf16.mxu0 %v2259_v60  ;;  %2333 = vmatprep.mubr.bf16.mxu1 %v2259_v60 }
 0x472   :  { %2293 = vmatmul.mubr.bf16.vlgmr.msra.gmra.mrb[56].mxu0 %v5863_v24  ;;  %2334 = vmatmul.mubr.bf16.vlgmr.msra.gmra.mrb[72].mxu1 %v5863_v24 }
 0x473   :  { %2343 = vmatpush1.bf16.msra.mxu0 %v7337_v49  ;;  %2384 = vmatpush1.bf16.msra.mxu1 %v7338_v25 }
 0x474   :  { %2374 = vmatprep.mubr.bf16.mxu0 %v2259_v60  ;;  %2415 = vmatprep.mubr.bf16.mxu1 %v2259_v60  ;;  %v7556_v60 = vld [vmem:[#allocation126_spill] sm:$0xff] }
 0x475   :  { %2344 = vmatprep.subr.bf16.mxu0 %v7339_v31  ;;  %2385 = vmatprep.subr.bf16.mxu1 %v7340_v2 }
 0x477   :  { %2345 = vmatpush1.bf16.msra.mxu0 %v7341_v40  ;;  %2386 = vmatpush1.bf16.msra.mxu1 %v7342_v12 }
 0x478   :  { %2346 = vmatprep.subr.bf16.mxu0 %v7343_v14  ;;  %2387 = vmatprep.subr.bf16.mxu1 %v7344_v53 }
 0x47b   :  { %2347 = vmatpush1.bf16.msra.mxu0 %v7345_v54  ;;  %2388 = vmatpush1.bf16.msra.mxu1 %v7346_v29 }
 0x47c   :  { %2348 = vmatprep.subr.bf16.mxu0 %v7347_v57  ;;  %2389 = vmatprep.subr.bf16.mxu1 %v7348_v8 }
 0x47f   :  { %2349 = vmatpush1.bf16.msra.mxu0 %v7349_v51  ;;  %2390 = vmatpush1.bf16.msra.mxu1 %v7350_v27 }
 0x480   :  { %2350 = vmatprep.subr.bf16.mxu0 %v7351_v48  ;;  %2391 = vmatprep.subr.bf16.mxu1 %v7352_v59 }
 0x483   :  { %2351 = vmatpush1.bf16.msra.mxu0 %v7353_v43  ;;  %2392 = vmatpush1.bf16.msra.mxu1 %v5114_v52 }
 0x484   :  { %2352 = vmatprep.subr.bf16.mxu0 %v7354_v55  ;;  %2393 = vmatprep.subr.bf16.mxu1 %v5120_v36 }
 0x487   :  { %2353 = vmatpush1.bf16.msra.mxu0 %v7355_v4  ;;  %2394 = vmatpush1.bf16.msra.mxu1 %v5126_v17 }
 0x488   :  { %2354 = vmatprep.subr.bf16.mxu0 %v7356_v42  ;;  %2395 = vmatprep.subr.bf16.mxu1 %v5132_v18 }
 0x48b   :  { %2355 = vmatpush1.bf16.msra.mxu0 %v7357_v44  ;;  %2396 = vmatpush1.bf16.msra.mxu1 %v7438_v10 }
 0x48c   :  { %2356 = vmatprep.subr.bf16.mxu0 %v7358_v46  ;;  %2397 = vmatprep.subr.bf16.mxu1 %v7439_v15 }
 0x48f   :  { %2357 = vmatpush1.bf16.msra.mxu0 %v7359_v62  ;;  %2398 = vmatpush1.bf16.msra.mxu1 %v7440_v58 }
 0x490   :  { %2358 = vmatprep.subr.bf16.mxu0 %v7360_v41  ;;  %2399 = vmatprep.subr.bf16.mxu1 %v7441_v26 }
 0x493   :  { %2359 = vmatpush1.bf16.msra.mxu0 %v7361_v63  ;;  %2400 = vmatpush1.bf16.msra.mxu1 %v7442_v11 }
 0x494   :  { %2360 = vmatprep.subr.bf16.mxu0 %v7362_v39  ;;  %2401 = vmatprep.subr.bf16.mxu1 %v7443_v20 }
 0x497   :  { %2361 = vmatpush1.bf16.msra.mxu0 %v7363_v38  ;;  %2402 = vmatpush1.bf16.msra.mxu1 %v7444_v28 }
 0x498   :  { %2362 = vmatprep.subr.bf16.mxu0 %v7364_v61  ;;  %2403 = vmatprep.subr.bf16.mxu1 %v7535_v30 }
 0x49b   :  { %2363 = vmatpush1.bf16.msra.mxu0 %v7536_v37  ;;  %2404 = vmatpush1.bf16.msra.mxu1 %v7537_v32  ;;  %v7629_v32 = vld [vmem:[#allocation202_spill] sm:$0xff] }
 0x49c   :  { %2364 = vmatprep.subr.bf16.mxu0 %v7538_v21  ;;  %2405 = vmatprep.subr.bf16.mxu1 %v7539_v50 }
 0x49f   :  { %2365 = vmatpush1.bf16.msra.mxu0 %v7540_v13  ;;  %2406 = vmatpush1.bf16.msra.mxu1 %v7541_v34 }
 0x4a0   :  { %2366 = vmatprep.subr.bf16.mxu0 %v7542_v33  ;;  %2407 = vmatprep.subr.bf16.mxu1 %v7543_v6  ;;  %v7626_v6 = vld [vmem:[#allocation157_spill] sm:$0xff]  ;;  %v7627_v33 = vld [vmem:[#allocation168_spill] sm:$0xff] }
 0x4a3   :  { %2367 = vmatpush1.bf16.msra.mxu0 %v7544_v3  ;;  %2408 = vmatpush1.bf16.msra.mxu1 %v7545_v19  ;;  %v7625_v19 = vld [vmem:[#allocation166_spill] sm:$0xff] }
 0x4a4   :  { %2368 = vmatprep.subr.bf16.mxu0 %v7546_v7  ;;  %2409 = vmatprep.subr.bf16.mxu1 %v7547_v9  ;;  %v7557_v7 = vld [vmem:[#allocation143_spill] sm:$0xff]  ;;  %v7558_v9 = vld [vmem:[#allocation20_spill] sm:$0xff] }
 0x4a7   :  { %2369 = vmatpush1.bf16.msra.mxu0 %v7548_v1  ;;  %2410 = vmatpush1.bf16.msra.mxu1 %v7549_v47  ;;  %v7559_v1 = vld [vmem:[#allocation21_spill] sm:$0xff]  ;;  %v7624_v47 = vld [vmem:[#allocation155_spill] sm:$0xff] }
 0x4a8   :  { %2370 = vmatprep.subr.bf16.mxu0 %v7550_v35  ;;  %2411 = vmatprep.subr.bf16.mxu1 %v7551_v45  ;;  %v7560_v45 = vld [vmem:[#allocation22_spill] sm:$0xff]  ;;  %v7569_v35 = vld [vmem:[#allocation47_spill] sm:$0xff] }
 0x4ab   :  { %2371 = vmatpush1.bf16.msra.mxu0 %v7552_v16  ;;  %2412 = vmatpush1.bf16.msra.mxu1 %v7553_v0  ;;  %v7561_v16 = vld [vmem:[#allocation39_spill] sm:$0xff] }
 0x4ac   :  { %2372 = vmatprep.subr.bf16.mxu0 %v7554_v56  ;;  %2413 = vmatprep.subr.bf16.mxu1 %v7555_v5  ;;  %v7562_v0 = vld [vmem:[#allocation23_spill] sm:$0xff]  ;;  %v7563_v56 = vld [vmem:[#allocation41_spill] sm:$0xff]  ;;  %v7564_v5 = vld [vmem:[#allocation24_spill] sm:$0xff] }
 0x4af   :  { %2373 = vmatpush1.bf16.msra.mxu0 %v7556_v60  ;;  %2414 = vmatpush1.bf16.msra.mxu1 %v7557_v7  ;;  %v7565_v60 = vld [vmem:[#allocation43_spill] sm:$0xff]  ;;  %v7566_v7 = vld [vmem:[#allocation25_spill] sm:$0xff] }
 0x4b0   :  { %2481 = vmatprep.subr.bf16.mxu0 %v7558_v9  ;;  %2522 = vmatprep.subr.bf16.mxu1 %v7559_v1  ;;  %v7567_v9 = vld [vmem:[#allocation45_spill] sm:$0xff]  ;;  %v7568_v1 = vld [vmem:[#allocation26_spill] sm:$0xff] }
 0x4b2   :  { %2375 = vmatmul.mubr.bf16.vlgmr.msra.gmra.mrb[60].mxu0 %v5863_v24  ;;  %2416 = vmatmul.mubr.bf16.vlgmr.msra.gmra.mrb[76].mxu1 %v5863_v24  ;;  %v7570_v24 = vld [vmem:[#allocation27_spill] sm:$0xff] }
 0x4b3   :  { %2482 = vmatpush1.bf16.msra.mxu0 %v7560_v45  ;;  %2523 = vmatpush1.bf16.msra.mxu1 %v7561_v16  ;;  %v7571_v45 = vld [vmem:[#allocation49_spill] sm:$0xff]  ;;  %v7572_v16 = vld [vmem:[#allocation28_spill] sm:$0xff] }
 0x4b4   :  { %2483 = vmatprep.subr.bf16.mxu0 %v7562_v0  ;;  %2524 = vmatprep.subr.bf16.mxu1 %v7563_v56  ;;  %v7573_v0 = vld [vmem:[#allocation51_spill] sm:$0xff]  ;;  %v7574_v56 = vld [vmem:[#allocation29_spill] sm:$0xff] }
 0x4b7   :  { %2484 = vmatpush1.bf16.msra.mxu0 %v7564_v5  ;;  %2525 = vmatpush1.bf16.msra.mxu1 %v7565_v60  ;;  %v7575_v5 = vld [vmem:[#allocation53_spill] sm:$0xff]  ;;  %v7576_v60 = vld [vmem:[#allocation30_spill] sm:$0xff] }
 0x4b8   :  { %2485 = vmatprep.subr.bf16.mxu0 %v7566_v7  ;;  %2526 = vmatprep.subr.bf16.mxu1 %v7567_v9  ;;  %v7577_v7 = vld [vmem:[#allocation55_spill] sm:$0xff] }
 0x4b9   :  { %v7578_v9 = vld [vmem:[#allocation31_spill] sm:$0xff] }
 0x4bb   :  { %2486 = vmatpush1.bf16.msra.mxu0 %v7568_v1  ;;  %2527 = vmatpush1.bf16.msra.mxu1 %v7569_v35  ;;  %v7579_v1 = vld [vmem:[#allocation57_spill] sm:$0xff]  ;;  %v7580_v35 = vld [vmem:[#allocation32_spill] sm:$0xff] }
 0x4bc   :  { %2487 = vmatprep.subr.bf16.mxu0 %v7570_v24  ;;  %2528 = vmatprep.subr.bf16.mxu1 %v7571_v45  ;;  %v7581_v24 = vld [vmem:[#allocation59_spill] sm:$0xff]  ;;  %v7582_v45 = vld [vmem:[#allocation33_spill] sm:$0xff] }
 0x4bf   :  { %2488 = vmatpush1.bf16.msra.mxu0 %v7572_v16  ;;  %2529 = vmatpush1.bf16.msra.mxu1 %v7573_v0  ;;  %v7583_v16 = vld [vmem:[#allocation61_spill] sm:$0xff]  ;;  %v7584_v0 = vld [vmem:[#allocation34_spill] sm:$0xff] }
 0x4c0   :  { %2489 = vmatprep.subr.bf16.mxu0 %v7574_v56  ;;  %2530 = vmatprep.subr.bf16.mxu1 %v7575_v5  ;;  %v7585_v56 = vld [vmem:[#allocation63_spill] sm:$0xff] }
 0x4c1   :  { %v7586_v5 = vld [vmem:[#allocation35_spill] sm:$0xff] }
 0x4c3   :  { %2490 = vmatpush1.bf16.msra.mxu0 %v7576_v60  ;;  %2531 = vmatpush1.bf16.msra.mxu1 %v7577_v7  ;;  %v7587_v60 = vld [vmem:[#allocation65_spill] sm:$0xff]  ;;  %v7588_v7 = vld [vmem:[#allocation36_spill] sm:$0xff] }
 0x4c4   :  { %2491 = vmatprep.subr.bf16.mxu0 %v7578_v9  ;;  %2532 = vmatprep.subr.bf16.mxu1 %v7579_v1  ;;  %v7589_v9 = vld [vmem:[#allocation67_spill] sm:$0xff]  ;;  %v7590_v1 = vld [vmem:[#allocation37_spill] sm:$0xff] }
 0x4c7   :  { %2492 = vmatpush1.bf16.msra.mxu0 %v7580_v35  ;;  %2533 = vmatpush1.bf16.msra.mxu1 %v7581_v24  ;;  %v7591_v35 = vld [vmem:[#allocation68_spill] sm:$0xff]  ;;  %v7592_v24 = vld [vmem:[#allocation38_spill] sm:$0xff] }
 0x4c8   :  { %2493 = vmatprep.subr.bf16.mxu0 %v7582_v45  ;;  %2534 = vmatprep.subr.bf16.mxu1 %v7583_v16  ;;  %v7593_v45 = vld [vmem:[#allocation70_spill] sm:$0xff]  ;;  %v7594_v16 = vld [vmem:[#allocation40_spill] sm:$0xff] }
 0x4cb   :  { %2494 = vmatpush1.bf16.msra.mxu0 %v7584_v0  ;;  %2535 = vmatpush1.bf16.msra.mxu1 %v7585_v56  ;;  %v7595_v0 = vld [vmem:[#allocation72_spill] sm:$0xff]  ;;  %v7596_v56 = vld [vmem:[#allocation42_spill] sm:$0xff] }
 0x4cc   :  { %2495 = vmatprep.subr.bf16.mxu0 %v7586_v5  ;;  %2536 = vmatprep.subr.bf16.mxu1 %v7587_v60  ;;  %v7597_v5 = vld [vmem:[#allocation74_spill] sm:$0xff]  ;;  %v7598_v60 = vld [vmem:[#allocation44_spill] sm:$0xff] }
 0x4cf   :  { %2496 = vmatpush1.bf16.msra.mxu0 %v7588_v7  ;;  %2537 = vmatpush1.bf16.msra.mxu1 %v7589_v9  ;;  %v7599_v7 = vld [vmem:[#allocation76_spill] sm:$0xff]  ;;  %v7600_v9 = vld [vmem:[#allocation46_spill] sm:$0xff] }
 0x4d0   :  { %2497 = vmatprep.subr.bf16.mxu0 %v7590_v1  ;;  %2538 = vmatprep.subr.bf16.mxu1 %v7591_v35  ;;  %v7601_v1 = vld [vmem:[#allocation78_spill] sm:$0xff]  ;;  %v7602_v35 = vld [vmem:[#allocation48_spill] sm:$0xff] }
 0x4d3   :  { %2498 = vmatpush1.bf16.msra.mxu0 %v7592_v24  ;;  %2539 = vmatpush1.bf16.msra.mxu1 %v7593_v45  ;;  %v7603_v24 = vld [vmem:[#allocation80_spill] sm:$0xff]  ;;  %v7604_v45 = vld [vmem:[#allocation50_spill] sm:$0xff] }
 0x4d4   :  { %2499 = vmatprep.subr.bf16.mxu0 %v7594_v16  ;;  %2540 = vmatprep.subr.bf16.mxu1 %v7595_v0  ;;  %v7605_v16 = vld [vmem:[#allocation82_spill] sm:$0xff]  ;;  %v7606_v0 = vld [vmem:[#allocation52_spill] sm:$0xff] }
 0x4d7   :  { %2500 = vmatpush1.bf16.msra.mxu0 %v7596_v56  ;;  %2541 = vmatpush1.bf16.msra.mxu1 %v7597_v5  ;;  %v7607_v56 = vld [vmem:[#allocation84_spill] sm:$0xff]  ;;  %v7608_v5 = vld [vmem:[#allocation54_spill] sm:$0xff] }
 0x4d8   :  { %2501 = vmatprep.subr.bf16.mxu0 %v7598_v60  ;;  %2542 = vmatprep.subr.bf16.mxu1 %v7599_v7  ;;  %v7609_v60 = vld [vmem:[#allocation86_spill] sm:$0xff]  ;;  %v7610_v7 = vld [vmem:[#allocation56_spill] sm:$0xff] }
 0x4db   :  { %2502 = vmatpush1.bf16.msra.mxu0 %v7600_v9  ;;  %2543 = vmatpush1.bf16.msra.mxu1 %v7601_v1  ;;  %v7611_v9 = vld [vmem:[#allocation88_spill] sm:$0xff]  ;;  %v7612_v1 = vld [vmem:[#allocation58_spill] sm:$0xff] }
 0x4dc   :  { %2503 = vmatprep.subr.bf16.mxu0 %v7602_v35  ;;  %2544 = vmatprep.subr.bf16.mxu1 %v7603_v24  ;;  %v7613_v35 = vld [vmem:[#allocation90_spill] sm:$0xff]  ;;  %v7614_v24 = vld [vmem:[#allocation60_spill] sm:$0xff] }
 0x4df   :  { %2504 = vmatpush1.bf16.msra.mxu0 %v7604_v45  ;;  %2545 = vmatpush1.bf16.msra.mxu1 %v7605_v16  ;;  %v7615_v45 = vld [vmem:[#allocation92_spill] sm:$0xff]  ;;  %v7616_v16 = vld [vmem:[#allocation62_spill] sm:$0xff] }
 0x4e0   :  { %2505 = vmatprep.subr.bf16.mxu0 %v7606_v0  ;;  %2546 = vmatprep.subr.bf16.mxu1 %v7607_v56  ;;  %v7617_v0 = vld [vmem:[#allocation94_spill] sm:$0xff]  ;;  %v7618_v56 = vld [vmem:[#allocation64_spill] sm:$0xff] }
 0x4e3   :  { %2506 = vmatpush1.bf16.msra.mxu0 %v7608_v5  ;;  %2547 = vmatpush1.bf16.msra.mxu1 %v7609_v60  ;;  %v7619_v5 = vld [vmem:[#allocation96_spill] sm:$0xff]  ;;  %v7620_v60 = vld [vmem:[#allocation66_spill] sm:$0xff] }
 0x4e4   :  { %2507 = vmatprep.subr.bf16.mxu0 %v7610_v7  ;;  %2548 = vmatprep.subr.bf16.mxu1 %v7611_v9  ;;  %v7621_v7 = vld [vmem:[#allocation98_spill] sm:$0xff]  ;;  %v7622_v9 = vld [vmem:[#allocation69_spill] sm:$0xff] }
 0x4e7   :  { %2508 = vmatpush1.bf16.msra.mxu0 %v7612_v1  ;;  %2549 = vmatpush1.bf16.msra.mxu1 %v7613_v35  ;;  %v7623_v1 = vld [vmem:[#allocation101_spill] sm:$0xff] }
 0x4e8   :  { %2509 = vmatprep.subr.bf16.mxu0 %v7614_v24  ;;  %2550 = vmatprep.subr.bf16.mxu1 %v7615_v45 }
 0x4eb   :  { %2510 = vmatpush1.bf16.msra.mxu0 %v7616_v16  ;;  %2551 = vmatpush1.bf16.msra.mxu1 %v7617_v0 }
 0x4ec   :  { %2511 = vmatprep.subr.bf16.mxu0 %v7618_v56  ;;  %2552 = vmatprep.subr.bf16.mxu1 %v7619_v5 }
 0x4ef   :  { %2512 = vmatpush1.bf16.msra.mxu0 %v7620_v60  ;;  %2553 = vmatpush1.bf16.msra.mxu1 %v7621_v7 }
 0x4f0   :  { %2563 = vmatprep.subr.bf16.mxu0 %v7622_v9  ;;  %2604 = vmatprep.subr.bf16.mxu1 %v7623_v1 }
 0x545   :  { %v2294_v35 = vpop.f32.mrb[56].mxu0  ;;  %v2335_v24 = vpop.f32.mrb[72].mxu1 }
 0x546   :  { %v2424_v45 = vadd.f32 %v2294_v35, %v7624_v47  ;;  %v2426_v16 = vadd.f32 %v2335_v24, %v7625_v19  ;;  %v2296_v3 = vpop.f32.mrb[57].mxu0  ;;  %v2337_v0 = vpop.f32.mrb[73].mxu1  ;;  %v7628_v35 = vld [vmem:[#allocation175_spill] sm:$0xff] }
 0x547   :  { %v2425_v56 = vadd.f32 %v2296_v3, %v7626_v6  ;;  %v2427_v5 = vadd.f32 %v2337_v0, %v7627_v33  ;;  %v2298_v34 = vpop.f32.mrb[58].mxu0  ;;  %v2339_v60 = vpop.f32.mrb[74].mxu1 }
 0x548   :  { %v2299_v13 = vpop.f32.mrb[59].mxu0  ;;  %v2340_v7 = vpop.f32.mrb[75].mxu1  ;;  %v2434_v50 = vmul.f32 0.5, %v2426_v16  ;;  %v2432_v21 = vmul.f32 0.5, %v2424_v45  ;;  %v7630_v34 = vld [vmem:[#allocation177_spill] sm:$0xff] }
 0x549   :  { %v2435_v9 = vmul.f32 0.5, %v2427_v5  ;;  %v2433_v1 = vmul.f32 0.5, %v2425_v56  ;;  %v7631_v13 = vld [vmem:[#allocation203_spill] sm:$0xff] }
 0x54a   :  { %4302 = vtanh.f32 %v2434_v50 }
 0x54b   :  { %4304 = vtanh.f32 %v2435_v9 }
 0x54c   :  { %4306 = vtanh.f32 %v2432_v21 }
 0x54d   :  { %4308 = vtanh.f32 %v2433_v1 }
 0x554   :  { %v4303_v45 = vpop.eup %4302 }
 0x555   :  { %v4305_v21 = vpop.eup %4304  ;;  %v2446_v60 = vmul.f32 0.5, %v4303_v45 }
 0x556   :  { %v4307_v1 = vpop.eup %4306 }
 0x557   :  { %v4309_v56 = vpop.eup %4308  ;;  %v2452_v30 = vadd.f32 0.5, %v2446_v60 }
 0x558   :  { %v2445_v37 = vmul.f32 0.5, %v4309_v56 }
 0x585   :  { %v2376_v47 = vpop.f32.mrb[60].mxu0  ;;  %v2417_v19 = vpop.f32.mrb[76].mxu1 }
 0x586   :  { %v2428_v24 = vadd.f32 %v2376_v47, %v7628_v35  ;;  %v2430_v6 = vadd.f32 %v2417_v19, %v7629_v32  ;;  %v2378_v3 = vpop.f32.mrb[61].mxu0  ;;  %v2419_v33 = vpop.f32.mrb[77].mxu1  ;;  %v2447_v35 = vmul.f32 0.5, %v4305_v21  ;;  %v2444_v19 = vmul.f32 0.5, %v4307_v1 }
 0x587   :  { %v2429_v0 = vadd.f32 %v2378_v3, %v7630_v34  ;;  %v2431_v7 = vadd.f32 %v2419_v33, %v7631_v13  ;;  %v2380_v16 = vpop.f32.mrb[62].mxu0  ;;  %v2421_v5 = vpop.f32.mrb[78].mxu1  ;;  %v2451_v13 = vadd.f32 0.5, %v2445_v37 }
 0x588   :  { %4310 = vtanh.f32 %v2430_v6  ;;  %v2381_v50 = vpop.f32.mrb[63].mxu0  ;;  %v2422_v9 = vpop.f32.mrb[79].mxu1  ;;  %v2436_v47 = vmul.f32 0.5, %v2428_v24  ;;  %v2453_v3 = vadd.f32 0.5, %v2447_v35  ;;  %v2450_v33 = vadd.f32 0.5, %v2444_v19  ;;  %v7633_v19 = vld [vmem:[#allocation110_spill] sm:$0xff] }
 0x589   :  { %4312 = vtanh.f32 %v2431_v7  ;;  %v2437_v32 = vmul.f32 0.5, %v2429_v0  ;;  %v2458_v16 = vmul.f32 %v2452_v30, %v5857_v22 }
 0x58a   :  { %4314 = vtanh.f32 %v2436_v47  ;;  %v2459_v7 = vmul.f32 %v2453_v3, %v5859_v23  ;;  %v7634_v3 = vld [vmem:[#allocation133_spill] sm:$0xff] }
 0x58b   :  { %4316 = vtanh.f32 %v2437_v32  ;;  %v7632_v32 = vld [vmem:[#allocation132_spill] sm:$0xff] }
 0x592   :  { %v4311_v34 = vpop.eup %4310 }
 0x593   :  { %v4313_v6 = vpop.eup %4312  ;;  %v2460_v5 = vmul.f32 %v4311_v34, %v2450_v33  ;;  %v7635_v33 = vld [vmem:[#allocation112_spill] sm:$0xff]  ;;  %v7636_v34 = vld [vmem:[#allocation134_spill] sm:$0xff] }
 0x594   :  { %v2461_v50 = vmul.f32 %v4313_v6, %v2451_v13  ;;  %v4315_v0 = vpop.eup %4314  ;;  %v7637_v13 = vld [vmem:[#allocation114_spill] sm:$0xff]  ;;  %v7638_v6 = vld [vmem:[#allocation135_spill] sm:$0xff] }
 0x595   :  { %v6007_v45 = vadd.f32 %v2460_v5, %v2458_v16  ;;  %v4317_v9 = vpop.eup %4316  ;;  %v2448_v21 = vmul.f32 0.5, %v4315_v0  ;;  %v7639_v16 = vld [vmem:[#allocation116_spill] sm:$0xff]  ;;  %v7643_v0 = vld [vmem:[#allocation119_spill] sm:$0xff] }
 0x596   :  { %v6009_v24 = vadd.f32 %v2461_v50, %v2459_v7  ;;  %v2449_v1 = vmul.f32 0.5, %v4317_v9  ;;  %v7640_v5 = vld [vmem:[#allocation136_spill] sm:$0xff]  ;;  %v7641_v7 = vld [vmem:[#allocation118_spill] sm:$0xff]  ;;  %v7642_v50 = vld [vmem:[#allocation137_spill] sm:$0xff] }
 0x597   :  { %4318 = vtanh.f32 %v6007_v45  ;;  %v2454_v37 = vadd.f32 0.5, %v2448_v21  ;;  %v7644_v9 = vld [vmem:[#allocation138_spill] sm:$0xff]  ;;  %v7645_v21 = vld [vmem:[#allocation120_spill] sm:$0xff] }
 0x598   :  { %4320 = vtanh.f32 %v6009_v24  ;;  %v2455_v60 = vadd.f32 0.5, %v2449_v1  ;;  %v7646_v1 = vld [vmem:[#allocation139_spill] sm:$0xff] }
 0x5a1   :  { %v4319_v56 = vpop.eup %4318 }
 0x5a2   :  { %v4321_v22 = vpop.eup %4320  ;;  %v2466_v30 = vmul.f32 %v4319_v56, %v2454_v37  ;;  %v7647_v37 = vld [vmem:[#allocation121_spill] sm:$0xff]  ;;  %v7648_v56 = vld [vmem:[#allocation140_spill] sm:$0xff] }
 0x5a3   :  { %v2467_v47 = vmul.f32 %v4321_v22, %v2455_v60  ;;  %v7649_v60 = vld [vmem:[#allocation122_spill] sm:$0xff]  ;;  %v7650_v22 = vld [vmem:[#allocation141_spill] sm:$0xff] }
 0x5a4   :  { %v6013_v35 = vpack.c.bf16 %v2466_v30, %v2466_v30  ;;  %v7651_v30 = vld [vmem:[#allocation124_spill] sm:$0xff] }
 0x5a5   :  { %v2480_v23 = vpack.c.bf16 %v2467_v47, %v2467_v47  ;;  %v7652_v47 = vld [vmem:[#allocation142_spill] sm:$0xff] }
 0x5a7   :  { %2513 = vmatprep.mubr.bf16.mxu0 %v2480_v23  ;;  %2554 = vmatprep.mubr.bf16.mxu1 %v2480_v23 }
 0x5a8   :  { %2514 = vmatmul.mubr.bf16.vlgmr.msra.gmra.mrb[64].mxu0 %v6013_v35  ;;  %2555 = vmatmul.mubr.bf16.vlgmr.msra.gmra.mrb[80].mxu1 %v6013_v35 }
 0x5a9   :  { %2564 = vmatpush1.bf16.msra.mxu0 %v7337_v49  ;;  %2605 = vmatpush1.bf16.msra.mxu1 %v7338_v25 }
 0x5aa   :  { %2595 = vmatprep.mubr.bf16.mxu0 %v2480_v23  ;;  %2636 = vmatprep.mubr.bf16.mxu1 %v2480_v23  ;;  %v7653_v23 = vld [vmem:[#allocation126_spill] sm:$0xff] }
 0x5ab   :  { %2565 = vmatprep.subr.bf16.mxu0 %v7339_v31  ;;  %2606 = vmatprep.subr.bf16.mxu1 %v7340_v2 }
 0x5ad   :  { %2566 = vmatpush1.bf16.msra.mxu0 %v7341_v40  ;;  %2607 = vmatpush1.bf16.msra.mxu1 %v7342_v12 }
 0x5ae   :  { %2567 = vmatprep.subr.bf16.mxu0 %v7343_v14  ;;  %2608 = vmatprep.subr.bf16.mxu1 %v7344_v53 }
 0x5b1   :  { %2568 = vmatpush1.bf16.msra.mxu0 %v7345_v54  ;;  %2609 = vmatpush1.bf16.msra.mxu1 %v7346_v29 }
 0x5b2   :  { %2569 = vmatprep.subr.bf16.mxu0 %v7347_v57  ;;  %2610 = vmatprep.subr.bf16.mxu1 %v7348_v8 }
 0x5b5   :  { %2570 = vmatpush1.bf16.msra.mxu0 %v7349_v51  ;;  %2611 = vmatpush1.bf16.msra.mxu1 %v7350_v27 }
 0x5b6   :  { %2571 = vmatprep.subr.bf16.mxu0 %v7351_v48  ;;  %2612 = vmatprep.subr.bf16.mxu1 %v7352_v59 }
 0x5b9   :  { %2572 = vmatpush1.bf16.msra.mxu0 %v7353_v43  ;;  %2613 = vmatpush1.bf16.msra.mxu1 %v5114_v52 }
 0x5ba   :  { %2573 = vmatprep.subr.bf16.mxu0 %v7354_v55  ;;  %2614 = vmatprep.subr.bf16.mxu1 %v5120_v36 }
 0x5bd   :  { %2574 = vmatpush1.bf16.msra.mxu0 %v7355_v4  ;;  %2615 = vmatpush1.bf16.msra.mxu1 %v5126_v17 }
 0x5be   :  { %2575 = vmatprep.subr.bf16.mxu0 %v7356_v42  ;;  %2616 = vmatprep.subr.bf16.mxu1 %v5132_v18 }
 0x5c1   :  { %2576 = vmatpush1.bf16.msra.mxu0 %v7357_v44  ;;  %2617 = vmatpush1.bf16.msra.mxu1 %v7438_v10 }
 0x5c2   :  { %2577 = vmatprep.subr.bf16.mxu0 %v7358_v46  ;;  %2618 = vmatprep.subr.bf16.mxu1 %v7439_v15 }
 0x5c5   :  { %2578 = vmatpush1.bf16.msra.mxu0 %v7359_v62  ;;  %2619 = vmatpush1.bf16.msra.mxu1 %v7440_v58 }
 0x5c6   :  { %2579 = vmatprep.subr.bf16.mxu0 %v7360_v41  ;;  %2620 = vmatprep.subr.bf16.mxu1 %v7441_v26 }
 0x5c9   :  { %2580 = vmatpush1.bf16.msra.mxu0 %v7361_v63  ;;  %2621 = vmatpush1.bf16.msra.mxu1 %v7442_v11 }
 0x5ca   :  { %2581 = vmatprep.subr.bf16.mxu0 %v7362_v39  ;;  %2622 = vmatprep.subr.bf16.mxu1 %v7443_v20 }
 0x5cd   :  { %2582 = vmatpush1.bf16.msra.mxu0 %v7363_v38  ;;  %2623 = vmatpush1.bf16.msra.mxu1 %v7444_v28 }
 0x5ce   :  { %2583 = vmatprep.subr.bf16.mxu0 %v7364_v61  ;;  %2624 = vmatprep.subr.bf16.mxu1 %v7632_v32 }
 0x5d1   :  { %2584 = vmatpush1.bf16.msra.mxu0 %v7633_v19  ;;  %2625 = vmatpush1.bf16.msra.mxu1 %v7634_v3  ;;  %v7726_v3 = vld [vmem:[#allocation204_spill] sm:$0xff] }
 0x5d2   :  { %2585 = vmatprep.subr.bf16.mxu0 %v7635_v33  ;;  %2626 = vmatprep.subr.bf16.mxu1 %v7636_v34 }
 0x5d5   :  { %2586 = vmatpush1.bf16.msra.mxu0 %v7637_v13  ;;  %2627 = vmatpush1.bf16.msra.mxu1 %v7638_v6 }
 0x5d6   :  { %2587 = vmatprep.subr.bf16.mxu0 %v7639_v16  ;;  %2628 = vmatprep.subr.bf16.mxu1 %v7640_v5  ;;  %v7723_v5 = vld [vmem:[#allocation159_spill] sm:$0xff]  ;;  %v7724_v16 = vld [vmem:[#allocation172_spill] sm:$0xff] }
 0x5d9   :  { %2588 = vmatpush1.bf16.msra.mxu0 %v7641_v7  ;;  %2629 = vmatpush1.bf16.msra.mxu1 %v7642_v50  ;;  %v7722_v50 = vld [vmem:[#allocation170_spill] sm:$0xff] }
 0x5da   :  { %2589 = vmatprep.subr.bf16.mxu0 %v7643_v0  ;;  %2630 = vmatprep.subr.bf16.mxu1 %v7644_v9  ;;  %v7654_v0 = vld [vmem:[#allocation143_spill] sm:$0xff]  ;;  %v7655_v9 = vld [vmem:[#allocation20_spill] sm:$0xff] }
 0x5dd   :  { %2590 = vmatpush1.bf16.msra.mxu0 %v7645_v21  ;;  %2631 = vmatpush1.bf16.msra.mxu1 %v7646_v1  ;;  %v7656_v21 = vld [vmem:[#allocation21_spill] sm:$0xff]  ;;  %v7721_v1 = vld [vmem:[#allocation158_spill] sm:$0xff] }
 0x5de   :  { %2591 = vmatprep.subr.bf16.mxu0 %v7647_v37  ;;  %2632 = vmatprep.subr.bf16.mxu1 %v7648_v56  ;;  %v7657_v56 = vld [vmem:[#allocation22_spill] sm:$0xff]  ;;  %v7666_v37 = vld [vmem:[#allocation47_spill] sm:$0xff] }
 0x5e1   :  { %2592 = vmatpush1.bf16.msra.mxu0 %v7649_v60  ;;  %2633 = vmatpush1.bf16.msra.mxu1 %v7650_v22  ;;  %v7658_v60 = vld [vmem:[#allocation39_spill] sm:$0xff] }
 0x5e2   :  { %2593 = vmatprep.subr.bf16.mxu0 %v7651_v30  ;;  %2634 = vmatprep.subr.bf16.mxu1 %v7652_v47  ;;  %v7659_v22 = vld [vmem:[#allocation23_spill] sm:$0xff]  ;;  %v7660_v30 = vld [vmem:[#allocation41_spill] sm:$0xff]  ;;  %v7661_v47 = vld [vmem:[#allocation24_spill] sm:$0xff] }
 0x5e5   :  { %2594 = vmatpush1.bf16.msra.mxu0 %v7653_v23  ;;  %2635 = vmatpush1.bf16.msra.mxu1 %v7654_v0  ;;  %v7662_v23 = vld [vmem:[#allocation43_spill] sm:$0xff]  ;;  %v7663_v0 = vld [vmem:[#allocation25_spill] sm:$0xff] }
 0x5e6   :  { %2702 = vmatprep.subr.bf16.mxu0 %v7655_v9  ;;  %2743 = vmatprep.subr.bf16.mxu1 %v7656_v21  ;;  %v7664_v9 = vld [vmem:[#allocation45_spill] sm:$0xff]  ;;  %v7665_v21 = vld [vmem:[#allocation26_spill] sm:$0xff] }
 0x5e8   :  { %2596 = vmatmul.mubr.bf16.vlgmr.msra.gmra.mrb[68].mxu0 %v6013_v35  ;;  %2637 = vmatmul.mubr.bf16.vlgmr.msra.gmra.mrb[84].mxu1 %v6013_v35  ;;  %v7667_v35 = vld [vmem:[#allocation27_spill] sm:$0xff] }
 0x5e9   :  { %2703 = vmatpush1.bf16.msra.mxu0 %v7657_v56  ;;  %2744 = vmatpush1.bf16.msra.mxu1 %v7658_v60  ;;  %v7668_v56 = vld [vmem:[#allocation49_spill] sm:$0xff]  ;;  %v7669_v60 = vld [vmem:[#allocation28_spill] sm:$0xff] }
 0x5ea   :  { %2704 = vmatprep.subr.bf16.mxu0 %v7659_v22  ;;  %2745 = vmatprep.subr.bf16.mxu1 %v7660_v30  ;;  %v7670_v22 = vld [vmem:[#allocation51_spill] sm:$0xff]  ;;  %v7671_v30 = vld [vmem:[#allocation29_spill] sm:$0xff] }
 0x5ed   :  { %2705 = vmatpush1.bf16.msra.mxu0 %v7661_v47  ;;  %2746 = vmatpush1.bf16.msra.mxu1 %v7662_v23  ;;  %v7672_v47 = vld [vmem:[#allocation53_spill] sm:$0xff]  ;;  %v7673_v23 = vld [vmem:[#allocation30_spill] sm:$0xff] }
 0x5ee   :  { %2706 = vmatprep.subr.bf16.mxu0 %v7663_v0  ;;  %2747 = vmatprep.subr.bf16.mxu1 %v7664_v9  ;;  %v7674_v0 = vld [vmem:[#allocation55_spill] sm:$0xff] }
 0x5ef   :  { %v7675_v9 = vld [vmem:[#allocation31_spill] sm:$0xff] }
 0x5f1   :  { %2707 = vmatpush1.bf16.msra.mxu0 %v7665_v21  ;;  %2748 = vmatpush1.bf16.msra.mxu1 %v7666_v37  ;;  %v7676_v21 = vld [vmem:[#allocation57_spill] sm:$0xff]  ;;  %v7677_v37 = vld [vmem:[#allocation32_spill] sm:$0xff] }
 0x5f2   :  { %2708 = vmatprep.subr.bf16.mxu0 %v7667_v35  ;;  %2749 = vmatprep.subr.bf16.mxu1 %v7668_v56  ;;  %v7678_v35 = vld [vmem:[#allocation59_spill] sm:$0xff]  ;;  %v7679_v56 = vld [vmem:[#allocation33_spill] sm:$0xff] }
 0x5f5   :  { %2709 = vmatpush1.bf16.msra.mxu0 %v7669_v60  ;;  %2750 = vmatpush1.bf16.msra.mxu1 %v7670_v22  ;;  %v7680_v60 = vld [vmem:[#allocation61_spill] sm:$0xff]  ;;  %v7681_v22 = vld [vmem:[#allocation34_spill] sm:$0xff] }
 0x5f6   :  { %2710 = vmatprep.subr.bf16.mxu0 %v7671_v30  ;;  %2751 = vmatprep.subr.bf16.mxu1 %v7672_v47  ;;  %v7682_v30 = vld [vmem:[#allocation63_spill] sm:$0xff] }
 0x5f7   :  { %v7683_v47 = vld [vmem:[#allocation35_spill] sm:$0xff] }
 0x5f9   :  { %2711 = vmatpush1.bf16.msra.mxu0 %v7673_v23  ;;  %2752 = vmatpush1.bf16.msra.mxu1 %v7674_v0  ;;  %v7684_v23 = vld [vmem:[#allocation65_spill] sm:$0xff]  ;;  %v7685_v0 = vld [vmem:[#allocation36_spill] sm:$0xff] }
 0x5fa   :  { %2712 = vmatprep.subr.bf16.mxu0 %v7675_v9  ;;  %2753 = vmatprep.subr.bf16.mxu1 %v7676_v21  ;;  %v7686_v9 = vld [vmem:[#allocation67_spill] sm:$0xff]  ;;  %v7687_v21 = vld [vmem:[#allocation37_spill] sm:$0xff] }
 0x5fd   :  { %2713 = vmatpush1.bf16.msra.mxu0 %v7677_v37  ;;  %2754 = vmatpush1.bf16.msra.mxu1 %v7678_v35  ;;  %v7688_v37 = vld [vmem:[#allocation68_spill] sm:$0xff]  ;;  %v7689_v35 = vld [vmem:[#allocation38_spill] sm:$0xff] }
 0x5fe   :  { %2714 = vmatprep.subr.bf16.mxu0 %v7679_v56  ;;  %2755 = vmatprep.subr.bf16.mxu1 %v7680_v60  ;;  %v7690_v56 = vld [vmem:[#allocation70_spill] sm:$0xff]  ;;  %v7691_v60 = vld [vmem:[#allocation40_spill] sm:$0xff] }
 0x601   :  { %2715 = vmatpush1.bf16.msra.mxu0 %v7681_v22  ;;  %2756 = vmatpush1.bf16.msra.mxu1 %v7682_v30  ;;  %v7692_v22 = vld [vmem:[#allocation72_spill] sm:$0xff]  ;;  %v7693_v30 = vld [vmem:[#allocation42_spill] sm:$0xff] }
 0x602   :  { %2716 = vmatprep.subr.bf16.mxu0 %v7683_v47  ;;  %2757 = vmatprep.subr.bf16.mxu1 %v7684_v23  ;;  %v7694_v47 = vld [vmem:[#allocation74_spill] sm:$0xff]  ;;  %v7695_v23 = vld [vmem:[#allocation44_spill] sm:$0xff] }
 0x605   :  { %2717 = vmatpush1.bf16.msra.mxu0 %v7685_v0  ;;  %2758 = vmatpush1.bf16.msra.mxu1 %v7686_v9  ;;  %v7696_v0 = vld [vmem:[#allocation76_spill] sm:$0xff]  ;;  %v7697_v9 = vld [vmem:[#allocation46_spill] sm:$0xff] }
 0x606   :  { %2718 = vmatprep.subr.bf16.mxu0 %v7687_v21  ;;  %2759 = vmatprep.subr.bf16.mxu1 %v7688_v37  ;;  %v7698_v21 = vld [vmem:[#allocation78_spill] sm:$0xff]  ;;  %v7699_v37 = vld [vmem:[#allocation48_spill] sm:$0xff] }
 0x609   :  { %2719 = vmatpush1.bf16.msra.mxu0 %v7689_v35  ;;  %2760 = vmatpush1.bf16.msra.mxu1 %v7690_v56  ;;  %v7700_v35 = vld [vmem:[#allocation80_spill] sm:$0xff]  ;;  %v7701_v56 = vld [vmem:[#allocation50_spill] sm:$0xff] }
 0x60a   :  { %2720 = vmatprep.subr.bf16.mxu0 %v7691_v60  ;;  %2761 = vmatprep.subr.bf16.mxu1 %v7692_v22  ;;  %v7702_v60 = vld [vmem:[#allocation82_spill] sm:$0xff]  ;;  %v7703_v22 = vld [vmem:[#allocation52_spill] sm:$0xff] }
 0x60d   :  { %2721 = vmatpush1.bf16.msra.mxu0 %v7693_v30  ;;  %2762 = vmatpush1.bf16.msra.mxu1 %v7694_v47  ;;  %v7704_v30 = vld [vmem:[#allocation84_spill] sm:$0xff]  ;;  %v7705_v47 = vld [vmem:[#allocation54_spill] sm:$0xff] }
 0x60e   :  { %2722 = vmatprep.subr.bf16.mxu0 %v7695_v23  ;;  %2763 = vmatprep.subr.bf16.mxu1 %v7696_v0  ;;  %v7706_v23 = vld [vmem:[#allocation86_spill] sm:$0xff]  ;;  %v7707_v0 = vld [vmem:[#allocation56_spill] sm:$0xff] }
 0x611   :  { %2723 = vmatpush1.bf16.msra.mxu0 %v7697_v9  ;;  %2764 = vmatpush1.bf16.msra.mxu1 %v7698_v21  ;;  %v7708_v9 = vld [vmem:[#allocation88_spill] sm:$0xff]  ;;  %v7709_v21 = vld [vmem:[#allocation58_spill] sm:$0xff] }
 0x612   :  { %2724 = vmatprep.subr.bf16.mxu0 %v7699_v37  ;;  %2765 = vmatprep.subr.bf16.mxu1 %v7700_v35  ;;  %v7710_v37 = vld [vmem:[#allocation90_spill] sm:$0xff]  ;;  %v7711_v35 = vld [vmem:[#allocation60_spill] sm:$0xff] }
 0x615   :  { %2725 = vmatpush1.bf16.msra.mxu0 %v7701_v56  ;;  %2766 = vmatpush1.bf16.msra.mxu1 %v7702_v60  ;;  %v7712_v56 = vld [vmem:[#allocation92_spill] sm:$0xff]  ;;  %v7713_v60 = vld [vmem:[#allocation62_spill] sm:$0xff] }
 0x616   :  { %2726 = vmatprep.subr.bf16.mxu0 %v7703_v22  ;;  %2767 = vmatprep.subr.bf16.mxu1 %v7704_v30  ;;  %v7714_v22 = vld [vmem:[#allocation94_spill] sm:$0xff]  ;;  %v7715_v30 = vld [vmem:[#allocation64_spill] sm:$0xff] }
 0x619   :  { %2727 = vmatpush1.bf16.msra.mxu0 %v7705_v47  ;;  %2768 = vmatpush1.bf16.msra.mxu1 %v7706_v23  ;;  %v7716_v47 = vld [vmem:[#allocation96_spill] sm:$0xff]  ;;  %v7717_v23 = vld [vmem:[#allocation66_spill] sm:$0xff] }
 0x61a   :  { %2728 = vmatprep.subr.bf16.mxu0 %v7707_v0  ;;  %2769 = vmatprep.subr.bf16.mxu1 %v7708_v9  ;;  %v7718_v0 = vld [vmem:[#allocation98_spill] sm:$0xff]  ;;  %v7719_v9 = vld [vmem:[#allocation69_spill] sm:$0xff] }
 0x61d   :  { %2729 = vmatpush1.bf16.msra.mxu0 %v7709_v21  ;;  %2770 = vmatpush1.bf16.msra.mxu1 %v7710_v37  ;;  %v7720_v21 = vld [vmem:[#allocation101_spill] sm:$0xff] }
 0x61e   :  { %2730 = vmatprep.subr.bf16.mxu0 %v7711_v35  ;;  %2771 = vmatprep.subr.bf16.mxu1 %v7712_v56 }
 0x621   :  { %2731 = vmatpush1.bf16.msra.mxu0 %v7713_v60  ;;  %2772 = vmatpush1.bf16.msra.mxu1 %v7714_v22 }
 0x622   :  { %2732 = vmatprep.subr.bf16.mxu0 %v7715_v30  ;;  %2773 = vmatprep.subr.bf16.mxu1 %v7716_v47 }
 0x625   :  { %2733 = vmatpush1.bf16.msra.mxu0 %v7717_v23  ;;  %2774 = vmatpush1.bf16.msra.mxu1 %v7718_v0 }
 0x626   :  { %2784 = vmatprep.subr.bf16.mxu0 %v7719_v9  ;;  %2825 = vmatprep.subr.bf16.mxu1 %v7720_v21 }
 0x67b   :  { %v2515_v37 = vpop.f32.mrb[64].mxu0  ;;  %v2556_v35 = vpop.f32.mrb[80].mxu1 }
 0x67c   :  { %v2645_v56 = vadd.f32 %v2515_v37, %v7721_v1  ;;  %v2647_v60 = vadd.f32 %v2556_v35, %v7722_v50  ;;  %v2517_v7 = vpop.f32.mrb[65].mxu0  ;;  %v2558_v22 = vpop.f32.mrb[81].mxu1  ;;  %v7725_v37 = vld [vmem:[#allocation179_spill] sm:$0xff] }
 0x67d   :  { %v2646_v30 = vadd.f32 %v2517_v7, %v7723_v5  ;;  %v2648_v47 = vadd.f32 %v2558_v22, %v7724_v16  ;;  %v2519_v6 = vpop.f32.mrb[66].mxu0  ;;  %v2560_v23 = vpop.f32.mrb[82].mxu1 }
 0x67e   :  { %v2520_v13 = vpop.f32.mrb[67].mxu0  ;;  %v2561_v0 = vpop.f32.mrb[83].mxu1  ;;  %v2655_v34 = vmul.f32 0.5, %v2647_v60  ;;  %v2653_v33 = vmul.f32 0.5, %v2645_v56  ;;  %v7727_v6 = vld [vmem:[#allocation181_spill] sm:$0xff] }
 0x67f   :  { %v2656_v9 = vmul.f32 0.5, %v2648_v47  ;;  %v2654_v21 = vmul.f32 0.5, %v2646_v30  ;;  %v7728_v13 = vld [vmem:[#allocation205_spill] sm:$0xff] }
 0x680   :  { %4322 = vtanh.f32 %v2655_v34 }
 0x681   :  { %4324 = vtanh.f32 %v2656_v9 }
 0x682   :  { %4326 = vtanh.f32 %v2653_v33 }
 0x683   :  { %4328 = vtanh.f32 %v2654_v21 }
 0x68a   :  { %v4323_v56 = vpop.eup %4322 }
 0x68b   :  { %v4325_v33 = vpop.eup %4324  ;;  %v2667_v23 = vmul.f32 0.5, %v4323_v56 }
 0x68c   :  { %v4327_v21 = vpop.eup %4326 }
 0x68d   :  { %v4329_v30 = vpop.eup %4328  ;;  %v2673_v32 = vadd.f32 0.5, %v2667_v23 }
 0x68e   :  { %v2666_v19 = vmul.f32 0.5, %v4329_v30 }
 0x6bb   :  { %v2597_v1 = vpop.f32.mrb[68].mxu0  ;;  %v2638_v50 = vpop.f32.mrb[84].mxu1 }
 0x6bc   :  { %v2649_v35 = vadd.f32 %v2597_v1, %v7725_v37  ;;  %v2651_v5 = vadd.f32 %v2638_v50, %v7726_v3  ;;  %v2599_v7 = vpop.f32.mrb[69].mxu0  ;;  %v2640_v16 = vpop.f32.mrb[85].mxu1  ;;  %v2668_v37 = vmul.f32 0.5, %v4325_v33  ;;  %v2665_v50 = vmul.f32 0.5, %v4327_v21 }
 0x6bd   :  { %v2650_v22 = vadd.f32 %v2599_v7, %v7727_v6  ;;  %v2652_v0 = vadd.f32 %v2640_v16, %v7728_v13  ;;  %v2601_v60 = vpop.f32.mrb[70].mxu0  ;;  %v2642_v47 = vpop.f32.mrb[86].mxu1  ;;  %v2672_v13 = vadd.f32 0.5, %v2666_v19 }
 0x6be   :  { %4330 = vtanh.f32 %v2651_v5  ;;  %v2602_v34 = vpop.f32.mrb[71].mxu0  ;;  %v2643_v9 = vpop.f32.mrb[87].mxu1  ;;  %v2657_v1 = vmul.f32 0.5, %v2649_v35  ;;  %v2674_v7 = vadd.f32 0.5, %v2668_v37  ;;  %v2671_v16 = vadd.f32 0.5, %v2665_v50  ;;  %v7730_v50 = vld [vmem:[#allocation110_spill] sm:$0xff] }
 0x6bf   :  { %4332 = vtanh.f32 %v2652_v0  ;;  %v2658_v3 = vmul.f32 0.5, %v2650_v22  ;;  %v2679_v60 = vmul.f32 %v2673_v32, %v6007_v45 }
 0x6c0   :  { %4334 = vtanh.f32 %v2657_v1  ;;  %v2680_v0 = vmul.f32 %v2674_v7, %v6009_v24  ;;  %v7731_v7 = vld [vmem:[#allocation133_spill] sm:$0xff] }
 0x6c1   :  { %4336 = vtanh.f32 %v2658_v3  ;;  %v7729_v3 = vld [vmem:[#allocation132_spill] sm:$0xff] }
 0x6c8   :  { %v4331_v6 = vpop.eup %4330 }
 0x6c9   :  { %v4333_v5 = vpop.eup %4332  ;;  %v2681_v47 = vmul.f32 %v4331_v6, %v2671_v16  ;;  %v7732_v16 = vld [vmem:[#allocation112_spill] sm:$0xff]  ;;  %v7733_v6 = vld [vmem:[#allocation134_spill] sm:$0xff] }
 0x6ca   :  { %v2682_v34 = vmul.f32 %v4333_v5, %v2672_v13  ;;  %v4335_v22 = vpop.eup %4334  ;;  %v7734_v13 = vld [vmem:[#allocation114_spill] sm:$0xff]  ;;  %v7735_v5 = vld [vmem:[#allocation135_spill] sm:$0xff] }
 0x6cb   :  { %v6157_v56 = vadd.f32 %v2681_v47, %v2679_v60  ;;  %v4337_v9 = vpop.eup %4336  ;;  %v2669_v33 = vmul.f32 0.5, %v4335_v22  ;;  %v7736_v60 = vld [vmem:[#allocation116_spill] sm:$0xff]  ;;  %v7740_v22 = vld [vmem:[#allocation119_spill] sm:$0xff] }
 0x6cc   :  { %v6159_v35 = vadd.f32 %v2682_v34, %v2680_v0  ;;  %v2670_v21 = vmul.f32 0.5, %v4337_v9  ;;  %v7737_v47 = vld [vmem:[#allocation136_spill] sm:$0xff]  ;;  %v7738_v0 = vld [vmem:[#allocation118_spill] sm:$0xff]  ;;  %v7739_v34 = vld [vmem:[#allocation137_spill] sm:$0xff] }
 0x6cd   :  { %4338 = vtanh.f32 %v6157_v56  ;;  %v2675_v19 = vadd.f32 0.5, %v2669_v33  ;;  %v7741_v9 = vld [vmem:[#allocation138_spill] sm:$0xff]  ;;  %v7742_v33 = vld [vmem:[#allocation120_spill] sm:$0xff] }
 0x6ce   :  { %4340 = vtanh.f32 %v6159_v35  ;;  %v2676_v23 = vadd.f32 0.5, %v2670_v21  ;;  %v7743_v21 = vld [vmem:[#allocation139_spill] sm:$0xff] }
 0x6d7   :  { %v4339_v30 = vpop.eup %4338 }
 0x6d8   :  { %v4341_v45 = vpop.eup %4340  ;;  %v2687_v32 = vmul.f32 %v4339_v30, %v2675_v19  ;;  %v7744_v19 = vld [vmem:[#allocation121_spill] sm:$0xff]  ;;  %v7745_v30 = vld [vmem:[#allocation140_spill] sm:$0xff] }
 0x6d9   :  { %v2688_v1 = vmul.f32 %v4341_v45, %v2676_v23  ;;  %v7746_v23 = vld [vmem:[#allocation122_spill] sm:$0xff]  ;;  %v7747_v45 = vld [vmem:[#allocation141_spill] sm:$0xff] }
 0x6da   :  { %v6163_v37 = vpack.c.bf16 %v2687_v32, %v2687_v32  ;;  %v7748_v32 = vld [vmem:[#allocation124_spill] sm:$0xff] }
 0x6db   :  { %v2701_v24 = vpack.c.bf16 %v2688_v1, %v2688_v1  ;;  %v7749_v1 = vld [vmem:[#allocation142_spill] sm:$0xff] }
 0x6dd   :  { %2734 = vmatprep.mubr.bf16.mxu0 %v2701_v24  ;;  %2775 = vmatprep.mubr.bf16.mxu1 %v2701_v24 }
 0x6de   :  { %2735 = vmatmul.mubr.bf16.vlgmr.msra.gmra.mrb[72].mxu0 %v6163_v37  ;;  %2776 = vmatmul.mubr.bf16.vlgmr.msra.gmra.mrb[88].mxu1 %v6163_v37 }
 0x6df   :  { %2785 = vmatpush1.bf16.msra.mxu0 %v7337_v49  ;;  %2826 = vmatpush1.bf16.msra.mxu1 %v7338_v25 }
 0x6e0   :  { %2816 = vmatprep.mubr.bf16.mxu0 %v2701_v24  ;;  %2857 = vmatprep.mubr.bf16.mxu1 %v2701_v24  ;;  %v7750_v24 = vld [vmem:[#allocation126_spill] sm:$0xff] }
 0x6e1   :  { %2786 = vmatprep.subr.bf16.mxu0 %v7339_v31  ;;  %2827 = vmatprep.subr.bf16.mxu1 %v7340_v2 }
 0x6e3   :  { %2787 = vmatpush1.bf16.msra.mxu0 %v7341_v40  ;;  %2828 = vmatpush1.bf16.msra.mxu1 %v7342_v12 }
 0x6e4   :  { %2788 = vmatprep.subr.bf16.mxu0 %v7343_v14  ;;  %2829 = vmatprep.subr.bf16.mxu1 %v7344_v53 }
 0x6e7   :  { %2789 = vmatpush1.bf16.msra.mxu0 %v7345_v54  ;;  %2830 = vmatpush1.bf16.msra.mxu1 %v7346_v29 }
 0x6e8   :  { %2790 = vmatprep.subr.bf16.mxu0 %v7347_v57  ;;  %2831 = vmatprep.subr.bf16.mxu1 %v7348_v8 }
 0x6eb   :  { %2791 = vmatpush1.bf16.msra.mxu0 %v7349_v51  ;;  %2832 = vmatpush1.bf16.msra.mxu1 %v7350_v27 }
 0x6ec   :  { %2792 = vmatprep.subr.bf16.mxu0 %v7351_v48  ;;  %2833 = vmatprep.subr.bf16.mxu1 %v7352_v59 }
 0x6ef   :  { %2793 = vmatpush1.bf16.msra.mxu0 %v7353_v43  ;;  %2834 = vmatpush1.bf16.msra.mxu1 %v5114_v52 }
 0x6f0   :  { %2794 = vmatprep.subr.bf16.mxu0 %v7354_v55  ;;  %2835 = vmatprep.subr.bf16.mxu1 %v5120_v36 }
 0x6f3   :  { %2795 = vmatpush1.bf16.msra.mxu0 %v7355_v4  ;;  %2836 = vmatpush1.bf16.msra.mxu1 %v5126_v17 }
 0x6f4   :  { %2796 = vmatprep.subr.bf16.mxu0 %v7356_v42  ;;  %2837 = vmatprep.subr.bf16.mxu1 %v5132_v18 }
 0x6f7   :  { %2797 = vmatpush1.bf16.msra.mxu0 %v7357_v44  ;;  %2838 = vmatpush1.bf16.msra.mxu1 %v7438_v10 }
 0x6f8   :  { %2798 = vmatprep.subr.bf16.mxu0 %v7358_v46  ;;  %2839 = vmatprep.subr.bf16.mxu1 %v7439_v15 }
 0x6fb   :  { %2799 = vmatpush1.bf16.msra.mxu0 %v7359_v62  ;;  %2840 = vmatpush1.bf16.msra.mxu1 %v7440_v58 }
 0x6fc   :  { %2800 = vmatprep.subr.bf16.mxu0 %v7360_v41  ;;  %2841 = vmatprep.subr.bf16.mxu1 %v7441_v26 }
 0x6ff   :  { %2801 = vmatpush1.bf16.msra.mxu0 %v7361_v63  ;;  %2842 = vmatpush1.bf16.msra.mxu1 %v7442_v11 }
 0x700   :  { %2802 = vmatprep.subr.bf16.mxu0 %v7362_v39  ;;  %2843 = vmatprep.subr.bf16.mxu1 %v7443_v20 }
 0x703   :  { %2803 = vmatpush1.bf16.msra.mxu0 %v7363_v38  ;;  %2844 = vmatpush1.bf16.msra.mxu1 %v7444_v28 }
 0x704   :  { %2804 = vmatprep.subr.bf16.mxu0 %v7364_v61  ;;  %2845 = vmatprep.subr.bf16.mxu1 %v7729_v3 }
 0x707   :  { %2805 = vmatpush1.bf16.msra.mxu0 %v7730_v50  ;;  %2846 = vmatpush1.bf16.msra.mxu1 %v7731_v7  ;;  %v7823_v7 = vld [vmem:[#allocation206_spill] sm:$0xff] }
 0x708   :  { %2806 = vmatprep.subr.bf16.mxu0 %v7732_v16  ;;  %2847 = vmatprep.subr.bf16.mxu1 %v7733_v6 }
 0x70b   :  { %2807 = vmatpush1.bf16.msra.mxu0 %v7734_v13  ;;  %2848 = vmatpush1.bf16.msra.mxu1 %v7735_v5 }
 0x70c   :  { %2808 = vmatprep.subr.bf16.mxu0 %v7736_v60  ;;  %2849 = vmatprep.subr.bf16.mxu1 %v7737_v47  ;;  %v7820_v47 = vld [vmem:[#allocation163_spill] sm:$0xff]  ;;  %v7821_v60 = vld [vmem:[#allocation176_spill] sm:$0xff] }
 0x70f   :  { %2809 = vmatpush1.bf16.msra.mxu0 %v7738_v0  ;;  %2850 = vmatpush1.bf16.msra.mxu1 %v7739_v34  ;;  %v7819_v34 = vld [vmem:[#allocation174_spill] sm:$0xff] }
 0x710   :  { %2810 = vmatprep.subr.bf16.mxu0 %v7740_v22  ;;  %2851 = vmatprep.subr.bf16.mxu1 %v7741_v9  ;;  %v7751_v22 = vld [vmem:[#allocation143_spill] sm:$0xff]  ;;  %v7752_v9 = vld [vmem:[#allocation20_spill] sm:$0xff] }
 0x713   :  { %2811 = vmatpush1.bf16.msra.mxu0 %v7742_v33  ;;  %2852 = vmatpush1.bf16.msra.mxu1 %v7743_v21  ;;  %v7753_v33 = vld [vmem:[#allocation21_spill] sm:$0xff] }
 0x714   :  { %2812 = vmatprep.subr.bf16.mxu0 %v7744_v19  ;;  %2853 = vmatprep.subr.bf16.mxu1 %v7745_v30  ;;  %v7754_v30 = vld [vmem:[#allocation22_spill] sm:$0xff]  ;;  %v7763_v19 = vld [vmem:[#allocation47_spill] sm:$0xff]  ;;  %v7818_v21 = vld [vmem:[#allocation161_spill] sm:$0xff] }
 0x717   :  { %2813 = vmatpush1.bf16.msra.mxu0 %v7746_v23  ;;  %2854 = vmatpush1.bf16.msra.mxu1 %v7747_v45  ;;  %v7755_v23 = vld [vmem:[#allocation39_spill] sm:$0xff] }
 0x718   :  { %2814 = vmatprep.subr.bf16.mxu0 %v7748_v32  ;;  %2855 = vmatprep.subr.bf16.mxu1 %v7749_v1  ;;  %v7756_v45 = vld [vmem:[#allocation23_spill] sm:$0xff]  ;;  %v7757_v32 = vld [vmem:[#allocation41_spill] sm:$0xff]  ;;  %v7758_v1 = vld [vmem:[#allocation24_spill] sm:$0xff] }
 0x71b   :  { %2815 = vmatpush1.bf16.msra.mxu0 %v7750_v24  ;;  %2856 = vmatpush1.bf16.msra.mxu1 %v7751_v22  ;;  %v7759_v24 = vld [vmem:[#allocation43_spill] sm:$0xff]  ;;  %v7760_v22 = vld [vmem:[#allocation25_spill] sm:$0xff] }
 0x71c   :  { %2923 = vmatprep.subr.bf16.mxu0 %v7752_v9  ;;  %2964 = vmatprep.subr.bf16.mxu1 %v7753_v33  ;;  %v7761_v9 = vld [vmem:[#allocation45_spill] sm:$0xff]  ;;  %v7762_v33 = vld [vmem:[#allocation26_spill] sm:$0xff] }
 0x71e   :  { %2817 = vmatmul.mubr.bf16.vlgmr.msra.gmra.mrb[76].mxu0 %v6163_v37  ;;  %2858 = vmatmul.mubr.bf16.vlgmr.msra.gmra.mrb[92].mxu1 %v6163_v37  ;;  %v7764_v37 = vld [vmem:[#allocation27_spill] sm:$0xff] }
 0x71f   :  { %2924 = vmatpush1.bf16.msra.mxu0 %v7754_v30  ;;  %2965 = vmatpush1.bf16.msra.mxu1 %v7755_v23  ;;  %v7765_v30 = vld [vmem:[#allocation49_spill] sm:$0xff]  ;;  %v7766_v23 = vld [vmem:[#allocation28_spill] sm:$0xff] }
 0x720   :  { %2925 = vmatprep.subr.bf16.mxu0 %v7756_v45  ;;  %2966 = vmatprep.subr.bf16.mxu1 %v7757_v32  ;;  %v7767_v45 = vld [vmem:[#allocation51_spill] sm:$0xff]  ;;  %v7768_v32 = vld [vmem:[#allocation29_spill] sm:$0xff] }
 0x723   :  { %2926 = vmatpush1.bf16.msra.mxu0 %v7758_v1  ;;  %2967 = vmatpush1.bf16.msra.mxu1 %v7759_v24  ;;  %v7769_v1 = vld [vmem:[#allocation53_spill] sm:$0xff]  ;;  %v7770_v24 = vld [vmem:[#allocation30_spill] sm:$0xff] }
 0x724   :  { %2927 = vmatprep.subr.bf16.mxu0 %v7760_v22  ;;  %2968 = vmatprep.subr.bf16.mxu1 %v7761_v9  ;;  %v7771_v22 = vld [vmem:[#allocation55_spill] sm:$0xff] }
 0x725   :  { %v7772_v9 = vld [vmem:[#allocation31_spill] sm:$0xff] }
 0x727   :  { %2928 = vmatpush1.bf16.msra.mxu0 %v7762_v33  ;;  %2969 = vmatpush1.bf16.msra.mxu1 %v7763_v19  ;;  %v7773_v33 = vld [vmem:[#allocation57_spill] sm:$0xff]  ;;  %v7774_v19 = vld [vmem:[#allocation32_spill] sm:$0xff] }
 0x728   :  { %2929 = vmatprep.subr.bf16.mxu0 %v7764_v37  ;;  %2970 = vmatprep.subr.bf16.mxu1 %v7765_v30  ;;  %v7775_v37 = vld [vmem:[#allocation59_spill] sm:$0xff]  ;;  %v7776_v30 = vld [vmem:[#allocation33_spill] sm:$0xff] }
 0x72b   :  { %2930 = vmatpush1.bf16.msra.mxu0 %v7766_v23  ;;  %2971 = vmatpush1.bf16.msra.mxu1 %v7767_v45  ;;  %v7777_v23 = vld [vmem:[#allocation61_spill] sm:$0xff]  ;;  %v7778_v45 = vld [vmem:[#allocation34_spill] sm:$0xff] }
 0x72c   :  { %2931 = vmatprep.subr.bf16.mxu0 %v7768_v32  ;;  %2972 = vmatprep.subr.bf16.mxu1 %v7769_v1  ;;  %v7779_v32 = vld [vmem:[#allocation63_spill] sm:$0xff] }
 0x72d   :  { %v7780_v1 = vld [vmem:[#allocation35_spill] sm:$0xff] }
 0x72f   :  { %2932 = vmatpush1.bf16.msra.mxu0 %v7770_v24  ;;  %2973 = vmatpush1.bf16.msra.mxu1 %v7771_v22  ;;  %v7781_v24 = vld [vmem:[#allocation65_spill] sm:$0xff]  ;;  %v7782_v22 = vld [vmem:[#allocation36_spill] sm:$0xff] }
 0x730   :  { %2933 = vmatprep.subr.bf16.mxu0 %v7772_v9  ;;  %2974 = vmatprep.subr.bf16.mxu1 %v7773_v33  ;;  %v7783_v9 = vld [vmem:[#allocation67_spill] sm:$0xff]  ;;  %v7784_v33 = vld [vmem:[#allocation37_spill] sm:$0xff] }
 0x733   :  { %2934 = vmatpush1.bf16.msra.mxu0 %v7774_v19  ;;  %2975 = vmatpush1.bf16.msra.mxu1 %v7775_v37  ;;  %v7785_v19 = vld [vmem:[#allocation68_spill] sm:$0xff]  ;;  %v7786_v37 = vld [vmem:[#allocation38_spill] sm:$0xff] }
 0x734   :  { %2935 = vmatprep.subr.bf16.mxu0 %v7776_v30  ;;  %2976 = vmatprep.subr.bf16.mxu1 %v7777_v23  ;;  %v7787_v30 = vld [vmem:[#allocation70_spill] sm:$0xff]  ;;  %v7788_v23 = vld [vmem:[#allocation40_spill] sm:$0xff] }
 0x737   :  { %2936 = vmatpush1.bf16.msra.mxu0 %v7778_v45  ;;  %2977 = vmatpush1.bf16.msra.mxu1 %v7779_v32  ;;  %v7789_v45 = vld [vmem:[#allocation72_spill] sm:$0xff]  ;;  %v7790_v32 = vld [vmem:[#allocation42_spill] sm:$0xff] }
 0x738   :  { %2937 = vmatprep.subr.bf16.mxu0 %v7780_v1  ;;  %2978 = vmatprep.subr.bf16.mxu1 %v7781_v24  ;;  %v7791_v1 = vld [vmem:[#allocation74_spill] sm:$0xff]  ;;  %v7792_v24 = vld [vmem:[#allocation44_spill] sm:$0xff] }
 0x73b   :  { %2938 = vmatpush1.bf16.msra.mxu0 %v7782_v22  ;;  %2979 = vmatpush1.bf16.msra.mxu1 %v7783_v9  ;;  %v7793_v22 = vld [vmem:[#allocation76_spill] sm:$0xff]  ;;  %v7794_v9 = vld [vmem:[#allocation46_spill] sm:$0xff] }
 0x73c   :  { %2939 = vmatprep.subr.bf16.mxu0 %v7784_v33  ;;  %2980 = vmatprep.subr.bf16.mxu1 %v7785_v19  ;;  %v7795_v33 = vld [vmem:[#allocation78_spill] sm:$0xff]  ;;  %v7796_v19 = vld [vmem:[#allocation48_spill] sm:$0xff] }
 0x73f   :  { %2940 = vmatpush1.bf16.msra.mxu0 %v7786_v37  ;;  %2981 = vmatpush1.bf16.msra.mxu1 %v7787_v30  ;;  %v7797_v37 = vld [vmem:[#allocation80_spill] sm:$0xff]  ;;  %v7798_v30 = vld [vmem:[#allocation50_spill] sm:$0xff] }
 0x740   :  { %2941 = vmatprep.subr.bf16.mxu0 %v7788_v23  ;;  %2982 = vmatprep.subr.bf16.mxu1 %v7789_v45  ;;  %v7799_v23 = vld [vmem:[#allocation82_spill] sm:$0xff]  ;;  %v7800_v45 = vld [vmem:[#allocation52_spill] sm:$0xff] }
 0x743   :  { %2942 = vmatpush1.bf16.msra.mxu0 %v7790_v32  ;;  %2983 = vmatpush1.bf16.msra.mxu1 %v7791_v1  ;;  %v7801_v32 = vld [vmem:[#allocation84_spill] sm:$0xff]  ;;  %v7802_v1 = vld [vmem:[#allocation54_spill] sm:$0xff] }
 0x744   :  { %2943 = vmatprep.subr.bf16.mxu0 %v7792_v24  ;;  %2984 = vmatprep.subr.bf16.mxu1 %v7793_v22  ;;  %v7803_v24 = vld [vmem:[#allocation86_spill] sm:$0xff]  ;;  %v7804_v22 = vld [vmem:[#allocation56_spill] sm:$0xff] }
 0x747   :  { %2944 = vmatpush1.bf16.msra.mxu0 %v7794_v9  ;;  %2985 = vmatpush1.bf16.msra.mxu1 %v7795_v33  ;;  %v7805_v9 = vld [vmem:[#allocation88_spill] sm:$0xff]  ;;  %v7806_v33 = vld [vmem:[#allocation58_spill] sm:$0xff] }
 0x748   :  { %2945 = vmatprep.subr.bf16.mxu0 %v7796_v19  ;;  %2986 = vmatprep.subr.bf16.mxu1 %v7797_v37  ;;  %v7807_v19 = vld [vmem:[#allocation90_spill] sm:$0xff]  ;;  %v7808_v37 = vld [vmem:[#allocation60_spill] sm:$0xff] }
 0x74b   :  { %2946 = vmatpush1.bf16.msra.mxu0 %v7798_v30  ;;  %2987 = vmatpush1.bf16.msra.mxu1 %v7799_v23  ;;  %v7809_v30 = vld [vmem:[#allocation92_spill] sm:$0xff]  ;;  %v7810_v23 = vld [vmem:[#allocation62_spill] sm:$0xff] }
 0x74c   :  { %2947 = vmatprep.subr.bf16.mxu0 %v7800_v45  ;;  %2988 = vmatprep.subr.bf16.mxu1 %v7801_v32  ;;  %v7811_v45 = vld [vmem:[#allocation94_spill] sm:$0xff]  ;;  %v7812_v32 = vld [vmem:[#allocation64_spill] sm:$0xff] }
 0x74f   :  { %2948 = vmatpush1.bf16.msra.mxu0 %v7802_v1  ;;  %2989 = vmatpush1.bf16.msra.mxu1 %v7803_v24  ;;  %v7813_v1 = vld [vmem:[#allocation96_spill] sm:$0xff]  ;;  %v7814_v24 = vld [vmem:[#allocation66_spill] sm:$0xff] }
 0x750   :  { %2949 = vmatprep.subr.bf16.mxu0 %v7804_v22  ;;  %2990 = vmatprep.subr.bf16.mxu1 %v7805_v9  ;;  %v7815_v22 = vld [vmem:[#allocation98_spill] sm:$0xff]  ;;  %v7816_v9 = vld [vmem:[#allocation69_spill] sm:$0xff] }
 0x753   :  { %2950 = vmatpush1.bf16.msra.mxu0 %v7806_v33  ;;  %2991 = vmatpush1.bf16.msra.mxu1 %v7807_v19  ;;  %v7817_v33 = vld [vmem:[#allocation101_spill] sm:$0xff] }
 0x754   :  { %2951 = vmatprep.subr.bf16.mxu0 %v7808_v37  ;;  %2992 = vmatprep.subr.bf16.mxu1 %v7809_v30 }
 0x757   :  { %2952 = vmatpush1.bf16.msra.mxu0 %v7810_v23  ;;  %2993 = vmatpush1.bf16.msra.mxu1 %v7811_v45 }
 0x758   :  { %2953 = vmatprep.subr.bf16.mxu0 %v7812_v32  ;;  %2994 = vmatprep.subr.bf16.mxu1 %v7813_v1 }
 0x75b   :  { %2954 = vmatpush1.bf16.msra.mxu0 %v7814_v24  ;;  %2995 = vmatpush1.bf16.msra.mxu1 %v7815_v22 }
 0x75c   :  { %3005 = vmatprep.subr.bf16.mxu0 %v7816_v9  ;;  %3046 = vmatprep.subr.bf16.mxu1 %v7817_v33 }
 0x7b1   :  { %v2736_v19 = vpop.f32.mrb[72].mxu0  ;;  %v2777_v37 = vpop.f32.mrb[88].mxu1 }
 0x7b2   :  { %v2866_v30 = vadd.f32 %v2736_v19, %v7818_v21  ;;  %v2868_v23 = vadd.f32 %v2777_v37, %v7819_v34  ;;  %v2738_v0 = vpop.f32.mrb[73].mxu0  ;;  %v2779_v45 = vpop.f32.mrb[89].mxu1  ;;  %v7822_v19 = vld [vmem:[#allocation183_spill] sm:$0xff] }
 0x7b3   :  { %v2867_v32 = vadd.f32 %v2738_v0, %v7820_v47  ;;  %v2869_v1 = vadd.f32 %v2779_v45, %v7821_v60  ;;  %v2740_v5 = vpop.f32.mrb[74].mxu0  ;;  %v2781_v24 = vpop.f32.mrb[90].mxu1 }
 0x7b4   :  { %v2741_v13 = vpop.f32.mrb[75].mxu0  ;;  %v2782_v22 = vpop.f32.mrb[91].mxu1  ;;  %v2876_v6 = vmul.f32 0.5, %v2868_v23  ;;  %v2874_v16 = vmul.f32 0.5, %v2866_v30  ;;  %v7824_v5 = vld [vmem:[#allocation185_spill] sm:$0xff] }
 0x7b5   :  { %v2877_v9 = vmul.f32 0.5, %v2869_v1  ;;  %v2875_v33 = vmul.f32 0.5, %v2867_v32  ;;  %v7825_v13 = vld [vmem:[#allocation207_spill] sm:$0xff] }
 0x7b6   :  { %4342 = vtanh.f32 %v2876_v6 }
 0x7b7   :  { %4344 = vtanh.f32 %v2877_v9 }
 0x7b8   :  { %4346 = vtanh.f32 %v2874_v16 }
 0x7b9   :  { %4348 = vtanh.f32 %v2875_v33 }
 0x7c0   :  { %v4343_v30 = vpop.eup %4342 }
 0x7c1   :  { %v4345_v16 = vpop.eup %4344  ;;  %v2888_v24 = vmul.f32 0.5, %v4343_v30 }
 0x7c2   :  { %v4347_v33 = vpop.eup %4346 }
 0x7c3   :  { %v4349_v32 = vpop.eup %4348  ;;  %v2894_v3 = vadd.f32 0.5, %v2888_v24 }
 0x7c4   :  { %v2887_v50 = vmul.f32 0.5, %v4349_v32 }
 0x7f1   :  { %v2818_v21 = vpop.f32.mrb[76].mxu0  ;;  %v2859_v34 = vpop.f32.mrb[92].mxu1 }
 0x7f2   :  { %v2870_v37 = vadd.f32 %v2818_v21, %v7822_v19  ;;  %v2872_v47 = vadd.f32 %v2859_v34, %v7823_v7  ;;  %v2820_v0 = vpop.f32.mrb[77].mxu0  ;;  %v2861_v60 = vpop.f32.mrb[93].mxu1  ;;  %v2889_v19 = vmul.f32 0.5, %v4345_v16  ;;  %v2886_v34 = vmul.f32 0.5, %v4347_v33 }
 0x7f3   :  { %v2871_v45 = vadd.f32 %v2820_v0, %v7824_v5  ;;  %v2873_v22 = vadd.f32 %v2861_v60, %v7825_v13  ;;  %v2822_v23 = vpop.f32.mrb[78].mxu0  ;;  %v2863_v1 = vpop.f32.mrb[94].mxu1  ;;  %v2893_v13 = vadd.f32 0.5, %v2887_v50 }
 0x7f4   :  { %4350 = vtanh.f32 %v2872_v47  ;;  %v2823_v6 = vpop.f32.mrb[79].mxu0  ;;  %v2864_v9 = vpop.f32.mrb[95].mxu1  ;;  %v2878_v21 = vmul.f32 0.5, %v2870_v37  ;;  %v2895_v0 = vadd.f32 0.5, %v2889_v19  ;;  %v2892_v60 = vadd.f32 0.5, %v2886_v34  ;;  %v7827_v34 = vld [vmem:[#allocation110_spill] sm:$0xff] }
 0x7f5   :  { %4352 = vtanh.f32 %v2873_v22  ;;  %v2879_v7 = vmul.f32 0.5, %v2871_v45  ;;  %v2900_v23 = vmul.f32 %v2894_v3, %v6157_v56 }
 0x7f6   :  { %4354 = vtanh.f32 %v2878_v21  ;;  %v2901_v22 = vmul.f32 %v2895_v0, %v6159_v35  ;;  %v7828_v0 = vld [vmem:[#allocation133_spill] sm:$0xff] }
 0x7f7   :  { %4356 = vtanh.f32 %v2879_v7  ;;  %v7826_v7 = vld [vmem:[#allocation132_spill] sm:$0xff] }
 0x7fe   :  { %v4351_v5 = vpop.eup %4350 }
 0x7ff   :  { %v4353_v47 = vpop.eup %4352  ;;  %v2902_v1 = vmul.f32 %v4351_v5, %v2892_v60  ;;  %v7829_v60 = vld [vmem:[#allocation112_spill] sm:$0xff]  ;;  %v7830_v5 = vld [vmem:[#allocation134_spill] sm:$0xff] }
 0x800   :  { %v2903_v6 = vmul.f32 %v4353_v47, %v2893_v13  ;;  %v4355_v45 = vpop.eup %4354  ;;  %v7831_v13 = vld [vmem:[#allocation114_spill] sm:$0xff]  ;;  %v7832_v47 = vld [vmem:[#allocation135_spill] sm:$0xff] }
 0x801   :  { %v6307_v30 = vadd.f32 %v2902_v1, %v2900_v23  ;;  %v4357_v9 = vpop.eup %4356  ;;  %v2890_v16 = vmul.f32 0.5, %v4355_v45  ;;  %v7833_v23 = vld [vmem:[#allocation116_spill] sm:$0xff]  ;;  %v7837_v45 = vld [vmem:[#allocation119_spill] sm:$0xff] }
 0x802   :  { %v6309_v37 = vadd.f32 %v2903_v6, %v2901_v22  ;;  %v2891_v33 = vmul.f32 0.5, %v4357_v9  ;;  %v7834_v1 = vld [vmem:[#allocation136_spill] sm:$0xff]  ;;  %v7835_v22 = vld [vmem:[#allocation118_spill] sm:$0xff]  ;;  %v7836_v6 = vld [vmem:[#allocation137_spill] sm:$0xff] }
 0x803   :  { %4358 = vtanh.f32 %v6307_v30  ;;  %v2896_v50 = vadd.f32 0.5, %v2890_v16  ;;  %v7838_v9 = vld [vmem:[#allocation138_spill] sm:$0xff]  ;;  %v7839_v16 = vld [vmem:[#allocation120_spill] sm:$0xff] }
 0x804   :  { %4360 = vtanh.f32 %v6309_v37  ;;  %v2897_v24 = vadd.f32 0.5, %v2891_v33  ;;  %v7840_v33 = vld [vmem:[#allocation139_spill] sm:$0xff] }
 0x80d   :  { %v4359_v32 = vpop.eup %4358 }
 0x80e   :  { %v4361_v56 = vpop.eup %4360  ;;  %v2908_v3 = vmul.f32 %v4359_v32, %v2896_v50  ;;  %v7841_v50 = vld [vmem:[#allocation121_spill] sm:$0xff]  ;;  %v7842_v32 = vld [vmem:[#allocation140_spill] sm:$0xff] }
 0x80f   :  { %v2909_v21 = vmul.f32 %v4361_v56, %v2897_v24  ;;  %v7843_v24 = vld [vmem:[#allocation122_spill] sm:$0xff]  ;;  %v7844_v56 = vld [vmem:[#allocation141_spill] sm:$0xff] }
 0x810   :  { %v6313_v19 = vpack.c.bf16 %v2908_v3, %v2908_v3  ;;  %v7845_v3 = vld [vmem:[#allocation124_spill] sm:$0xff] }
 0x811   :  { %v2922_v35 = vpack.c.bf16 %v2909_v21, %v2909_v21  ;;  %v7846_v21 = vld [vmem:[#allocation142_spill] sm:$0xff] }
 0x813   :  { %2955 = vmatprep.mubr.bf16.mxu0 %v2922_v35  ;;  %2996 = vmatprep.mubr.bf16.mxu1 %v2922_v35 }
 0x814   :  { %2956 = vmatmul.mubr.bf16.vlgmr.msra.gmra.mrb[80].mxu0 %v6313_v19  ;;  %2997 = vmatmul.mubr.bf16.vlgmr.msra.gmra.mrb[96].mxu1 %v6313_v19 }
 0x815   :  { %3006 = vmatpush1.bf16.msra.mxu0 %v7337_v49  ;;  %3047 = vmatpush1.bf16.msra.mxu1 %v7338_v25 }
 0x816   :  { %3037 = vmatprep.mubr.bf16.mxu0 %v2922_v35  ;;  %3078 = vmatprep.mubr.bf16.mxu1 %v2922_v35  ;;  %v7847_v35 = vld [vmem:[#allocation126_spill] sm:$0xff] }
 0x817   :  { %3007 = vmatprep.subr.bf16.mxu0 %v7339_v31  ;;  %3048 = vmatprep.subr.bf16.mxu1 %v7340_v2 }
 0x819   :  { %3008 = vmatpush1.bf16.msra.mxu0 %v7341_v40  ;;  %3049 = vmatpush1.bf16.msra.mxu1 %v7342_v12 }
 0x81a   :  { %3009 = vmatprep.subr.bf16.mxu0 %v7343_v14  ;;  %3050 = vmatprep.subr.bf16.mxu1 %v7344_v53 }
 0x81d   :  { %3010 = vmatpush1.bf16.msra.mxu0 %v7345_v54  ;;  %3051 = vmatpush1.bf16.msra.mxu1 %v7346_v29 }
 0x81e   :  { %3011 = vmatprep.subr.bf16.mxu0 %v7347_v57  ;;  %3052 = vmatprep.subr.bf16.mxu1 %v7348_v8 }
 0x821   :  { %3012 = vmatpush1.bf16.msra.mxu0 %v7349_v51  ;;  %3053 = vmatpush1.bf16.msra.mxu1 %v7350_v27 }
 0x822   :  { %3013 = vmatprep.subr.bf16.mxu0 %v7351_v48  ;;  %3054 = vmatprep.subr.bf16.mxu1 %v7352_v59 }
 0x825   :  { %3014 = vmatpush1.bf16.msra.mxu0 %v7353_v43  ;;  %3055 = vmatpush1.bf16.msra.mxu1 %v5114_v52 }
 0x826   :  { %3015 = vmatprep.subr.bf16.mxu0 %v7354_v55  ;;  %3056 = vmatprep.subr.bf16.mxu1 %v5120_v36 }
 0x829   :  { %3016 = vmatpush1.bf16.msra.mxu0 %v7355_v4  ;;  %3057 = vmatpush1.bf16.msra.mxu1 %v5126_v17 }
 0x82a   :  { %3017 = vmatprep.subr.bf16.mxu0 %v7356_v42  ;;  %3058 = vmatprep.subr.bf16.mxu1 %v5132_v18 }
 0x82d   :  { %3018 = vmatpush1.bf16.msra.mxu0 %v7357_v44  ;;  %3059 = vmatpush1.bf16.msra.mxu1 %v7438_v10 }
 0x82e   :  { %3019 = vmatprep.subr.bf16.mxu0 %v7358_v46  ;;  %3060 = vmatprep.subr.bf16.mxu1 %v7439_v15 }
 0x831   :  { %3020 = vmatpush1.bf16.msra.mxu0 %v7359_v62  ;;  %3061 = vmatpush1.bf16.msra.mxu1 %v7440_v58 }
 0x832   :  { %3021 = vmatprep.subr.bf16.mxu0 %v7360_v41  ;;  %3062 = vmatprep.subr.bf16.mxu1 %v7441_v26 }
 0x835   :  { %3022 = vmatpush1.bf16.msra.mxu0 %v7361_v63  ;;  %3063 = vmatpush1.bf16.msra.mxu1 %v7442_v11 }
 0x836   :  { %3023 = vmatprep.subr.bf16.mxu0 %v7362_v39  ;;  %3064 = vmatprep.subr.bf16.mxu1 %v7443_v20 }
 0x839   :  { %3024 = vmatpush1.bf16.msra.mxu0 %v7363_v38  ;;  %3065 = vmatpush1.bf16.msra.mxu1 %v7444_v28 }
 0x83a   :  { %3025 = vmatprep.subr.bf16.mxu0 %v7364_v61  ;;  %3066 = vmatprep.subr.bf16.mxu1 %v7826_v7 }
 0x83d   :  { %3026 = vmatpush1.bf16.msra.mxu0 %v7827_v34  ;;  %3067 = vmatpush1.bf16.msra.mxu1 %v7828_v0  ;;  %v7920_v0 = vld [vmem:[#allocation208_spill] sm:$0xff] }
 0x83e   :  { %3027 = vmatprep.subr.bf16.mxu0 %v7829_v60  ;;  %3068 = vmatprep.subr.bf16.mxu1 %v7830_v5 }
 0x841   :  { %3028 = vmatpush1.bf16.msra.mxu0 %v7831_v13  ;;  %3069 = vmatpush1.bf16.msra.mxu1 %v7832_v47 }
 0x842   :  { %3029 = vmatprep.subr.bf16.mxu0 %v7833_v23  ;;  %3070 = vmatprep.subr.bf16.mxu1 %v7834_v1  ;;  %v7917_v1 = vld [vmem:[#allocation145_spill] sm:$0xff]  ;;  %v7918_v23 = vld [vmem:[#allocation180_spill] sm:$0xff] }
 0x845   :  { %3030 = vmatpush1.bf16.msra.mxu0 %v7835_v22  ;;  %3071 = vmatpush1.bf16.msra.mxu1 %v7836_v6  ;;  %v7916_v6 = vld [vmem:[#allocation178_spill] sm:$0xff] }
 0x846   :  { %3031 = vmatprep.subr.bf16.mxu0 %v7837_v45  ;;  %3072 = vmatprep.subr.bf16.mxu1 %v7838_v9  ;;  %v7848_v45 = vld [vmem:[#allocation143_spill] sm:$0xff]  ;;  %v7849_v9 = vld [vmem:[#allocation20_spill] sm:$0xff] }
 0x849   :  { %3032 = vmatpush1.bf16.msra.mxu0 %v7839_v16  ;;  %3073 = vmatpush1.bf16.msra.mxu1 %v7840_v33  ;;  %v7850_v16 = vld [vmem:[#allocation21_spill] sm:$0xff]  ;;  %v7915_v33 = vld [vmem:[#allocation144_spill] sm:$0xff] }
 0x84a   :  { %3033 = vmatprep.subr.bf16.mxu0 %v7841_v50  ;;  %3074 = vmatprep.subr.bf16.mxu1 %v7842_v32  ;;  %v7851_v32 = vld [vmem:[#allocation22_spill] sm:$0xff]  ;;  %v7860_v50 = vld [vmem:[#allocation47_spill] sm:$0xff] }
 0x84d   :  { %3034 = vmatpush1.bf16.msra.mxu0 %v7843_v24  ;;  %3075 = vmatpush1.bf16.msra.mxu1 %v7844_v56  ;;  %v7852_v24 = vld [vmem:[#allocation39_spill] sm:$0xff] }
 0x84e   :  { %3035 = vmatprep.subr.bf16.mxu0 %v7845_v3  ;;  %3076 = vmatprep.subr.bf16.mxu1 %v7846_v21  ;;  %v7853_v56 = vld [vmem:[#allocation23_spill] sm:$0xff]  ;;  %v7854_v3 = vld [vmem:[#allocation41_spill] sm:$0xff]  ;;  %v7855_v21 = vld [vmem:[#allocation24_spill] sm:$0xff] }
 0x851   :  { %3036 = vmatpush1.bf16.msra.mxu0 %v7847_v35  ;;  %3077 = vmatpush1.bf16.msra.mxu1 %v7848_v45  ;;  %v7856_v35 = vld [vmem:[#allocation43_spill] sm:$0xff]  ;;  %v7857_v45 = vld [vmem:[#allocation25_spill] sm:$0xff] }
 0x852   :  { %3144 = vmatprep.subr.bf16.mxu0 %v7849_v9  ;;  %3185 = vmatprep.subr.bf16.mxu1 %v7850_v16  ;;  %v7858_v9 = vld [vmem:[#allocation45_spill] sm:$0xff]  ;;  %v7859_v16 = vld [vmem:[#allocation26_spill] sm:$0xff] }
 0x854   :  { %3038 = vmatmul.mubr.bf16.vlgmr.msra.gmra.mrb[84].mxu0 %v6313_v19  ;;  %3079 = vmatmul.mubr.bf16.vlgmr.msra.gmra.mrb[100].mxu1 %v6313_v19  ;;  %v7861_v19 = vld [vmem:[#allocation27_spill] sm:$0xff] }
 0x855   :  { %3145 = vmatpush1.bf16.msra.mxu0 %v7851_v32  ;;  %3186 = vmatpush1.bf16.msra.mxu1 %v7852_v24  ;;  %v7862_v32 = vld [vmem:[#allocation49_spill] sm:$0xff]  ;;  %v7863_v24 = vld [vmem:[#allocation28_spill] sm:$0xff] }
 0x856   :  { %3146 = vmatprep.subr.bf16.mxu0 %v7853_v56  ;;  %3187 = vmatprep.subr.bf16.mxu1 %v7854_v3  ;;  %v7864_v56 = vld [vmem:[#allocation51_spill] sm:$0xff]  ;;  %v7865_v3 = vld [vmem:[#allocation29_spill] sm:$0xff] }
 0x859   :  { %3147 = vmatpush1.bf16.msra.mxu0 %v7855_v21  ;;  %3188 = vmatpush1.bf16.msra.mxu1 %v7856_v35  ;;  %v7866_v21 = vld [vmem:[#allocation53_spill] sm:$0xff]  ;;  %v7867_v35 = vld [vmem:[#allocation30_spill] sm:$0xff] }
 0x85a   :  { %3148 = vmatprep.subr.bf16.mxu0 %v7857_v45  ;;  %3189 = vmatprep.subr.bf16.mxu1 %v7858_v9  ;;  %v7868_v45 = vld [vmem:[#allocation55_spill] sm:$0xff] }
 0x85b   :  { %v7869_v9 = vld [vmem:[#allocation31_spill] sm:$0xff] }
 0x85d   :  { %3149 = vmatpush1.bf16.msra.mxu0 %v7859_v16  ;;  %3190 = vmatpush1.bf16.msra.mxu1 %v7860_v50  ;;  %v7870_v16 = vld [vmem:[#allocation57_spill] sm:$0xff]  ;;  %v7871_v50 = vld [vmem:[#allocation32_spill] sm:$0xff] }
 0x85e   :  { %3150 = vmatprep.subr.bf16.mxu0 %v7861_v19  ;;  %3191 = vmatprep.subr.bf16.mxu1 %v7862_v32  ;;  %v7872_v19 = vld [vmem:[#allocation59_spill] sm:$0xff]  ;;  %v7873_v32 = vld [vmem:[#allocation33_spill] sm:$0xff] }
 0x861   :  { %3151 = vmatpush1.bf16.msra.mxu0 %v7863_v24  ;;  %3192 = vmatpush1.bf16.msra.mxu1 %v7864_v56  ;;  %v7874_v24 = vld [vmem:[#allocation61_spill] sm:$0xff]  ;;  %v7875_v56 = vld [vmem:[#allocation34_spill] sm:$0xff] }
 0x862   :  { %3152 = vmatprep.subr.bf16.mxu0 %v7865_v3  ;;  %3193 = vmatprep.subr.bf16.mxu1 %v7866_v21  ;;  %v7876_v3 = vld [vmem:[#allocation63_spill] sm:$0xff] }
 0x863   :  { %v7877_v21 = vld [vmem:[#allocation35_spill] sm:$0xff] }
 0x865   :  { %3153 = vmatpush1.bf16.msra.mxu0 %v7867_v35  ;;  %3194 = vmatpush1.bf16.msra.mxu1 %v7868_v45  ;;  %v7878_v35 = vld [vmem:[#allocation65_spill] sm:$0xff]  ;;  %v7879_v45 = vld [vmem:[#allocation36_spill] sm:$0xff] }
 0x866   :  { %3154 = vmatprep.subr.bf16.mxu0 %v7869_v9  ;;  %3195 = vmatprep.subr.bf16.mxu1 %v7870_v16  ;;  %v7880_v9 = vld [vmem:[#allocation67_spill] sm:$0xff]  ;;  %v7881_v16 = vld [vmem:[#allocation37_spill] sm:$0xff] }
 0x869   :  { %3155 = vmatpush1.bf16.msra.mxu0 %v7871_v50  ;;  %3196 = vmatpush1.bf16.msra.mxu1 %v7872_v19  ;;  %v7882_v50 = vld [vmem:[#allocation68_spill] sm:$0xff]  ;;  %v7883_v19 = vld [vmem:[#allocation38_spill] sm:$0xff] }
 0x86a   :  { %3156 = vmatprep.subr.bf16.mxu0 %v7873_v32  ;;  %3197 = vmatprep.subr.bf16.mxu1 %v7874_v24  ;;  %v7884_v32 = vld [vmem:[#allocation70_spill] sm:$0xff]  ;;  %v7885_v24 = vld [vmem:[#allocation40_spill] sm:$0xff] }
 0x86d   :  { %3157 = vmatpush1.bf16.msra.mxu0 %v7875_v56  ;;  %3198 = vmatpush1.bf16.msra.mxu1 %v7876_v3  ;;  %v7886_v56 = vld [vmem:[#allocation72_spill] sm:$0xff]  ;;  %v7887_v3 = vld [vmem:[#allocation42_spill] sm:$0xff] }
 0x86e   :  { %3158 = vmatprep.subr.bf16.mxu0 %v7877_v21  ;;  %3199 = vmatprep.subr.bf16.mxu1 %v7878_v35  ;;  %v7888_v21 = vld [vmem:[#allocation74_spill] sm:$0xff]  ;;  %v7889_v35 = vld [vmem:[#allocation44_spill] sm:$0xff] }
 0x871   :  { %3159 = vmatpush1.bf16.msra.mxu0 %v7879_v45  ;;  %3200 = vmatpush1.bf16.msra.mxu1 %v7880_v9  ;;  %v7890_v45 = vld [vmem:[#allocation76_spill] sm:$0xff]  ;;  %v7891_v9 = vld [vmem:[#allocation46_spill] sm:$0xff] }
 0x872   :  { %3160 = vmatprep.subr.bf16.mxu0 %v7881_v16  ;;  %3201 = vmatprep.subr.bf16.mxu1 %v7882_v50  ;;  %v7892_v16 = vld [vmem:[#allocation78_spill] sm:$0xff]  ;;  %v7893_v50 = vld [vmem:[#allocation48_spill] sm:$0xff] }
 0x875   :  { %3161 = vmatpush1.bf16.msra.mxu0 %v7883_v19  ;;  %3202 = vmatpush1.bf16.msra.mxu1 %v7884_v32  ;;  %v7894_v19 = vld [vmem:[#allocation80_spill] sm:$0xff]  ;;  %v7895_v32 = vld [vmem:[#allocation50_spill] sm:$0xff] }
 0x876   :  { %3162 = vmatprep.subr.bf16.mxu0 %v7885_v24  ;;  %3203 = vmatprep.subr.bf16.mxu1 %v7886_v56  ;;  %v7896_v24 = vld [vmem:[#allocation82_spill] sm:$0xff]  ;;  %v7897_v56 = vld [vmem:[#allocation52_spill] sm:$0xff] }
 0x879   :  { %3163 = vmatpush1.bf16.msra.mxu0 %v7887_v3  ;;  %3204 = vmatpush1.bf16.msra.mxu1 %v7888_v21  ;;  %v7898_v3 = vld [vmem:[#allocation84_spill] sm:$0xff]  ;;  %v7899_v21 = vld [vmem:[#allocation54_spill] sm:$0xff] }
 0x87a   :  { %3164 = vmatprep.subr.bf16.mxu0 %v7889_v35  ;;  %3205 = vmatprep.subr.bf16.mxu1 %v7890_v45  ;;  %v7900_v35 = vld [vmem:[#allocation86_spill] sm:$0xff]  ;;  %v7901_v45 = vld [vmem:[#allocation56_spill] sm:$0xff] }
 0x87d   :  { %3165 = vmatpush1.bf16.msra.mxu0 %v7891_v9  ;;  %3206 = vmatpush1.bf16.msra.mxu1 %v7892_v16  ;;  %v7902_v9 = vld [vmem:[#allocation88_spill] sm:$0xff]  ;;  %v7903_v16 = vld [vmem:[#allocation58_spill] sm:$0xff] }
 0x87e   :  { %3166 = vmatprep.subr.bf16.mxu0 %v7893_v50  ;;  %3207 = vmatprep.subr.bf16.mxu1 %v7894_v19  ;;  %v7904_v50 = vld [vmem:[#allocation90_spill] sm:$0xff]  ;;  %v7905_v19 = vld [vmem:[#allocation60_spill] sm:$0xff] }
 0x881   :  { %3167 = vmatpush1.bf16.msra.mxu0 %v7895_v32  ;;  %3208 = vmatpush1.bf16.msra.mxu1 %v7896_v24  ;;  %v7906_v32 = vld [vmem:[#allocation92_spill] sm:$0xff]  ;;  %v7907_v24 = vld [vmem:[#allocation62_spill] sm:$0xff] }
 0x882   :  { %3168 = vmatprep.subr.bf16.mxu0 %v7897_v56  ;;  %3209 = vmatprep.subr.bf16.mxu1 %v7898_v3  ;;  %v7908_v56 = vld [vmem:[#allocation94_spill] sm:$0xff]  ;;  %v7909_v3 = vld [vmem:[#allocation64_spill] sm:$0xff] }
 0x885   :  { %3169 = vmatpush1.bf16.msra.mxu0 %v7899_v21  ;;  %3210 = vmatpush1.bf16.msra.mxu1 %v7900_v35  ;;  %v7910_v21 = vld [vmem:[#allocation96_spill] sm:$0xff]  ;;  %v7911_v35 = vld [vmem:[#allocation66_spill] sm:$0xff] }
 0x886   :  { %3170 = vmatprep.subr.bf16.mxu0 %v7901_v45  ;;  %3211 = vmatprep.subr.bf16.mxu1 %v7902_v9  ;;  %v7912_v45 = vld [vmem:[#allocation98_spill] sm:$0xff]  ;;  %v7913_v9 = vld [vmem:[#allocation69_spill] sm:$0xff] }
 0x889   :  { %3171 = vmatpush1.bf16.msra.mxu0 %v7903_v16  ;;  %3212 = vmatpush1.bf16.msra.mxu1 %v7904_v50  ;;  %v7914_v16 = vld [vmem:[#allocation101_spill] sm:$0xff] }
 0x88a   :  { %3172 = vmatprep.subr.bf16.mxu0 %v7905_v19  ;;  %3213 = vmatprep.subr.bf16.mxu1 %v7906_v32 }
 0x88d   :  { %3173 = vmatpush1.bf16.msra.mxu0 %v7907_v24  ;;  %3214 = vmatpush1.bf16.msra.mxu1 %v7908_v56 }
 0x88e   :  { %3174 = vmatprep.subr.bf16.mxu0 %v7909_v3  ;;  %3215 = vmatprep.subr.bf16.mxu1 %v7910_v21 }
 0x891   :  { %3175 = vmatpush1.bf16.msra.mxu0 %v7911_v35  ;;  %3216 = vmatpush1.bf16.msra.mxu1 %v7912_v45 }
 0x892   :  { %3226 = vmatprep.subr.bf16.mxu0 %v7913_v9  ;;  %3267 = vmatprep.subr.bf16.mxu1 %v7914_v16 }
 0x8e7   :  { %v2957_v50 = vpop.f32.mrb[80].mxu0  ;;  %v2998_v19 = vpop.f32.mrb[96].mxu1 }
 0x8e8   :  { %v3087_v32 = vadd.f32 %v2957_v50, %v7915_v33  ;;  %v3089_v24 = vadd.f32 %v2998_v19, %v7916_v6  ;;  %v2959_v22 = vpop.f32.mrb[81].mxu0  ;;  %v3000_v56 = vpop.f32.mrb[97].mxu1  ;;  %v7919_v50 = vld [vmem:[#allocation187_spill] sm:$0xff] }
 0x8e9   :  { %v3088_v3 = vadd.f32 %v2959_v22, %v7917_v1  ;;  %v3090_v21 = vadd.f32 %v3000_v56, %v7918_v23  ;;  %v2961_v47 = vpop.f32.mrb[82].mxu0  ;;  %v3002_v35 = vpop.f32.mrb[98].mxu1 }
 0x8ea   :  { %v2962_v13 = vpop.f32.mrb[83].mxu0  ;;  %v3003_v45 = vpop.f32.mrb[99].mxu1  ;;  %v3097_v5 = vmul.f32 0.5, %v3089_v24  ;;  %v3095_v60 = vmul.f32 0.5, %v3087_v32  ;;  %v7921_v47 = vld [vmem:[#allocation189_spill] sm:$0xff] }
 0x8eb   :  { %v3098_v9 = vmul.f32 0.5, %v3090_v21  ;;  %v3096_v16 = vmul.f32 0.5, %v3088_v3  ;;  %v7922_v13 = vld [vmem:[#allocation209_spill] sm:$0xff] }
 0x8ec   :  { %4362 = vtanh.f32 %v3097_v5 }
 0x8ed   :  { %4364 = vtanh.f32 %v3098_v9 }
 0x8ee   :  { %4366 = vtanh.f32 %v3095_v60 }
 0x8ef   :  { %4368 = vtanh.f32 %v3096_v16 }
 0x8f6   :  { %v4363_v32 = vpop.eup %4362 }
 0x8f7   :  { %v4365_v60 = vpop.eup %4364  ;;  %v3109_v35 = vmul.f32 0.5, %v4363_v32 }
 0x8f8   :  { %v4367_v16 = vpop.eup %4366 }
 0x8f9   :  { %v4369_v3 = vpop.eup %4368  ;;  %v3115_v7 = vadd.f32 0.5, %v3109_v35 }
 0x8fa   :  { %v3108_v34 = vmul.f32 0.5, %v4369_v3 }
 0x927   :  { %v3039_v33 = vpop.f32.mrb[84].mxu0  ;;  %v3080_v6 = vpop.f32.mrb[100].mxu1 }
 0x928   :  { %v3091_v19 = vadd.f32 %v3039_v33, %v7919_v50  ;;  %v3093_v1 = vadd.f32 %v3080_v6, %v7920_v0  ;;  %v3041_v22 = vpop.f32.mrb[85].mxu0  ;;  %v3082_v23 = vpop.f32.mrb[101].mxu1  ;;  %v3110_v50 = vmul.f32 0.5, %v4365_v60  ;;  %v3107_v6 = vmul.f32 0.5, %v4367_v16 }
 0x929   :  { %v3092_v56 = vadd.f32 %v3041_v22, %v7921_v47  ;;  %v3094_v45 = vadd.f32 %v3082_v23, %v7922_v13  ;;  %v3043_v24 = vpop.f32.mrb[86].mxu0  ;;  %v3084_v21 = vpop.f32.mrb[102].mxu1  ;;  %v3114_v13 = vadd.f32 0.5, %v3108_v34 }
 0x92a   :  { %4370 = vtanh.f32 %v3093_v1  ;;  %v3044_v5 = vpop.f32.mrb[87].mxu0  ;;  %v3085_v9 = vpop.f32.mrb[103].mxu1  ;;  %v3099_v33 = vmul.f32 0.5, %v3091_v19  ;;  %v3116_v22 = vadd.f32 0.5, %v3110_v50  ;;  %v3113_v23 = vadd.f32 0.5, %v3107_v6  ;;  %v7924_v6 = vld [vmem:[#allocation110_spill] sm:$0xff] }
 0x92b   :  { %4372 = vtanh.f32 %v3094_v45  ;;  %v3100_v0 = vmul.f32 0.5, %v3092_v56  ;;  %v3121_v24 = vmul.f32 %v3115_v7, %v6307_v30 }
 0x92c   :  { %4374 = vtanh.f32 %v3099_v33  ;;  %v3122_v45 = vmul.f32 %v3116_v22, %v6309_v37  ;;  %v7925_v22 = vld [vmem:[#allocation133_spill] sm:$0xff] }
 0x92d   :  { %4376 = vtanh.f32 %v3100_v0  ;;  %v7923_v0 = vld [vmem:[#allocation132_spill] sm:$0xff] }
 0x934   :  { %v4371_v47 = vpop.eup %4370 }
 0x935   :  { %v4373_v1 = vpop.eup %4372  ;;  %v3123_v21 = vmul.f32 %v4371_v47, %v3113_v23  ;;  %v7926_v23 = vld [vmem:[#allocation112_spill] sm:$0xff]  ;;  %v7927_v47 = vld [vmem:[#allocation134_spill] sm:$0xff] }
 0x936   :  { %v3124_v5 = vmul.f32 %v4373_v1, %v3114_v13  ;;  %v4375_v56 = vpop.eup %4374  ;;  %v7928_v13 = vld [vmem:[#allocation114_spill] sm:$0xff]  ;;  %v7929_v1 = vld [vmem:[#allocation135_spill] sm:$0xff] }
 0x937   :  { %v6457_v32 = vadd.f32 %v3123_v21, %v3121_v24  ;;  %v4377_v9 = vpop.eup %4376  ;;  %v3111_v60 = vmul.f32 0.5, %v4375_v56  ;;  %v7930_v24 = vld [vmem:[#allocation116_spill] sm:$0xff]  ;;  %v7934_v56 = vld [vmem:[#allocation119_spill] sm:$0xff] }
 0x938   :  { %v6459_v19 = vadd.f32 %v3124_v5, %v3122_v45  ;;  %v3112_v16 = vmul.f32 0.5, %v4377_v9  ;;  %v7931_v21 = vld [vmem:[#allocation136_spill] sm:$0xff]  ;;  %v7932_v45 = vld [vmem:[#allocation118_spill] sm:$0xff]  ;;  %v7933_v5 = vld [vmem:[#allocation137_spill] sm:$0xff] }
 0x939   :  { %4378 = vtanh.f32 %v6457_v32  ;;  %v3117_v34 = vadd.f32 0.5, %v3111_v60  ;;  %v7935_v9 = vld [vmem:[#allocation138_spill] sm:$0xff]  ;;  %v7936_v60 = vld [vmem:[#allocation120_spill] sm:$0xff] }
 0x93a   :  { %4380 = vtanh.f32 %v6459_v19  ;;  %v3118_v35 = vadd.f32 0.5, %v3112_v16  ;;  %v7937_v16 = vld [vmem:[#allocation139_spill] sm:$0xff] }
 0x943   :  { %v4379_v3 = vpop.eup %4378 }
 0x944   :  { %v4381_v30 = vpop.eup %4380  ;;  %v3129_v7 = vmul.f32 %v4379_v3, %v3117_v34  ;;  %v7938_v34 = vld [vmem:[#allocation121_spill] sm:$0xff]  ;;  %v7939_v3 = vld [vmem:[#allocation140_spill] sm:$0xff] }
 0x945   :  { %v3130_v33 = vmul.f32 %v4381_v30, %v3118_v35  ;;  %v7940_v35 = vld [vmem:[#allocation122_spill] sm:$0xff]  ;;  %v7941_v30 = vld [vmem:[#allocation141_spill] sm:$0xff] }
 0x946   :  { %v6463_v50 = vpack.c.bf16 %v3129_v7, %v3129_v7  ;;  %v7942_v7 = vld [vmem:[#allocation124_spill] sm:$0xff] }
 0x947   :  { %v3143_v37 = vpack.c.bf16 %v3130_v33, %v3130_v33  ;;  %v7943_v33 = vld [vmem:[#allocation142_spill] sm:$0xff] }
 0x949   :  { %3176 = vmatprep.mubr.bf16.mxu0 %v3143_v37  ;;  %3217 = vmatprep.mubr.bf16.mxu1 %v3143_v37 }
 0x94a   :  { %3177 = vmatmul.mubr.bf16.vlgmr.msra.gmra.mrb[88].mxu0 %v6463_v50  ;;  %3218 = vmatmul.mubr.bf16.vlgmr.msra.gmra.mrb[104].mxu1 %v6463_v50 }
 0x94b   :  { %3227 = vmatpush1.bf16.msra.mxu0 %v7337_v49  ;;  %3268 = vmatpush1.bf16.msra.mxu1 %v7338_v25 }
 0x94c   :  { %3258 = vmatprep.mubr.bf16.mxu0 %v3143_v37  ;;  %3299 = vmatprep.mubr.bf16.mxu1 %v3143_v37  ;;  %v7944_v37 = vld [vmem:[#allocation126_spill] sm:$0xff] }
 0x94d   :  { %3228 = vmatprep.subr.bf16.mxu0 %v7339_v31  ;;  %3269 = vmatprep.subr.bf16.mxu1 %v7340_v2 }
 0x94f   :  { %3229 = vmatpush1.bf16.msra.mxu0 %v7341_v40  ;;  %3270 = vmatpush1.bf16.msra.mxu1 %v7342_v12 }
 0x950   :  { %3230 = vmatprep.subr.bf16.mxu0 %v7343_v14  ;;  %3271 = vmatprep.subr.bf16.mxu1 %v7344_v53 }
 0x953   :  { %3231 = vmatpush1.bf16.msra.mxu0 %v7345_v54  ;;  %3272 = vmatpush1.bf16.msra.mxu1 %v7346_v29 }
 0x954   :  { %3232 = vmatprep.subr.bf16.mxu0 %v7347_v57  ;;  %3273 = vmatprep.subr.bf16.mxu1 %v7348_v8 }
 0x957   :  { %3233 = vmatpush1.bf16.msra.mxu0 %v7349_v51  ;;  %3274 = vmatpush1.bf16.msra.mxu1 %v7350_v27 }
 0x958   :  { %3234 = vmatprep.subr.bf16.mxu0 %v7351_v48  ;;  %3275 = vmatprep.subr.bf16.mxu1 %v7352_v59 }
 0x95b   :  { %3235 = vmatpush1.bf16.msra.mxu0 %v7353_v43  ;;  %3276 = vmatpush1.bf16.msra.mxu1 %v5114_v52 }
 0x95c   :  { %3236 = vmatprep.subr.bf16.mxu0 %v7354_v55  ;;  %3277 = vmatprep.subr.bf16.mxu1 %v5120_v36 }
 0x95f   :  { %3237 = vmatpush1.bf16.msra.mxu0 %v7355_v4  ;;  %3278 = vmatpush1.bf16.msra.mxu1 %v5126_v17 }
 0x960   :  { %3238 = vmatprep.subr.bf16.mxu0 %v7356_v42  ;;  %3279 = vmatprep.subr.bf16.mxu1 %v5132_v18 }
 0x963   :  { %3239 = vmatpush1.bf16.msra.mxu0 %v7357_v44  ;;  %3280 = vmatpush1.bf16.msra.mxu1 %v7438_v10 }
 0x964   :  { %3240 = vmatprep.subr.bf16.mxu0 %v7358_v46  ;;  %3281 = vmatprep.subr.bf16.mxu1 %v7439_v15 }
 0x967   :  { %3241 = vmatpush1.bf16.msra.mxu0 %v7359_v62  ;;  %3282 = vmatpush1.bf16.msra.mxu1 %v7440_v58 }
 0x968   :  { %3242 = vmatprep.subr.bf16.mxu0 %v7360_v41  ;;  %3283 = vmatprep.subr.bf16.mxu1 %v7441_v26 }
 0x96b   :  { %3243 = vmatpush1.bf16.msra.mxu0 %v7361_v63  ;;  %3284 = vmatpush1.bf16.msra.mxu1 %v7442_v11 }
 0x96c   :  { %3244 = vmatprep.subr.bf16.mxu0 %v7362_v39  ;;  %3285 = vmatprep.subr.bf16.mxu1 %v7443_v20 }
 0x96f   :  { %3245 = vmatpush1.bf16.msra.mxu0 %v7363_v38  ;;  %3286 = vmatpush1.bf16.msra.mxu1 %v7444_v28 }
 0x970   :  { %3246 = vmatprep.subr.bf16.mxu0 %v7364_v61  ;;  %3287 = vmatprep.subr.bf16.mxu1 %v7923_v0 }
 0x973   :  { %3247 = vmatpush1.bf16.msra.mxu0 %v7924_v6  ;;  %3288 = vmatpush1.bf16.msra.mxu1 %v7925_v22  ;;  %v8017_v22 = vld [vmem:[#allocation210_spill] sm:$0xff] }
 0x974   :  { %3248 = vmatprep.subr.bf16.mxu0 %v7926_v23  ;;  %3289 = vmatprep.subr.bf16.mxu1 %v7927_v47 }
 0x977   :  { %3249 = vmatpush1.bf16.msra.mxu0 %v7928_v13  ;;  %3290 = vmatpush1.bf16.msra.mxu1 %v7929_v1 }
 0x978   :  { %3250 = vmatprep.subr.bf16.mxu0 %v7930_v24  ;;  %3291 = vmatprep.subr.bf16.mxu1 %v7931_v21  ;;  %v8014_v21 = vld [vmem:[#allocation148_spill] sm:$0xff] }
 0x979   :  { %v8015_v24 = vld [vmem:[#allocation184_spill] sm:$0xff] }
 0x97b   :  { %3251 = vmatpush1.bf16.msra.mxu0 %v7932_v45  ;;  %3292 = vmatpush1.bf16.msra.mxu1 %v7933_v5  ;;  %v8013_v5 = vld [vmem:[#allocation182_spill] sm:$0xff] }
 0x97c   :  { %3252 = vmatprep.subr.bf16.mxu0 %v7934_v56  ;;  %3293 = vmatprep.subr.bf16.mxu1 %v7935_v9  ;;  %v7945_v56 = vld [vmem:[#allocation143_spill] sm:$0xff]  ;;  %v7946_v9 = vld [vmem:[#allocation20_spill] sm:$0xff] }
 0x97f   :  { %3253 = vmatpush1.bf16.msra.mxu0 %v7936_v60  ;;  %3294 = vmatpush1.bf16.msra.mxu1 %v7937_v16  ;;  %v7947_v60 = vld [vmem:[#allocation21_spill] sm:$0xff]  ;;  %v8012_v16 = vld [vmem:[#allocation146_spill] sm:$0xff] }
 0x980   :  { %3254 = vmatprep.subr.bf16.mxu0 %v7938_v34  ;;  %3295 = vmatprep.subr.bf16.mxu1 %v7939_v3  ;;  %v7948_v3 = vld [vmem:[#allocation22_spill] sm:$0xff]  ;;  %v7957_v34 = vld [vmem:[#allocation47_spill] sm:$0xff] }
 0x983   :  { %3255 = vmatpush1.bf16.msra.mxu0 %v7940_v35  ;;  %3296 = vmatpush1.bf16.msra.mxu1 %v7941_v30  ;;  %v7949_v35 = vld [vmem:[#allocation39_spill] sm:$0xff] }
 0x984   :  { %3256 = vmatprep.subr.bf16.mxu0 %v7942_v7  ;;  %3297 = vmatprep.subr.bf16.mxu1 %v7943_v33  ;;  %v7950_v30 = vld [vmem:[#allocation23_spill] sm:$0xff]  ;;  %v7951_v7 = vld [vmem:[#allocation41_spill] sm:$0xff]  ;;  %v7952_v33 = vld [vmem:[#allocation24_spill] sm:$0xff] }
 0x987   :  { %3257 = vmatpush1.bf16.msra.mxu0 %v7944_v37  ;;  %3298 = vmatpush1.bf16.msra.mxu1 %v7945_v56  ;;  %v7953_v37 = vld [vmem:[#allocation43_spill] sm:$0xff]  ;;  %v7954_v56 = vld [vmem:[#allocation25_spill] sm:$0xff] }
 0x988   :  { %3365 = vmatprep.subr.bf16.mxu0 %v7946_v9  ;;  %3406 = vmatprep.subr.bf16.mxu1 %v7947_v60  ;;  %v7955_v9 = vld [vmem:[#allocation45_spill] sm:$0xff]  ;;  %v7956_v60 = vld [vmem:[#allocation26_spill] sm:$0xff] }
 0x98a   :  { %3259 = vmatmul.mubr.bf16.vlgmr.msra.gmra.mrb[92].mxu0 %v6463_v50  ;;  %3300 = vmatmul.mubr.bf16.vlgmr.msra.gmra.mrb[108].mxu1 %v6463_v50  ;;  %v7958_v50 = vld [vmem:[#allocation27_spill] sm:$0xff] }
 0x98b   :  { %3366 = vmatpush1.bf16.msra.mxu0 %v7948_v3  ;;  %3407 = vmatpush1.bf16.msra.mxu1 %v7949_v35  ;;  %v7959_v3 = vld [vmem:[#allocation49_spill] sm:$0xff]  ;;  %v7960_v35 = vld [vmem:[#allocation28_spill] sm:$0xff] }
 0x98c   :  { %3367 = vmatprep.subr.bf16.mxu0 %v7950_v30  ;;  %3408 = vmatprep.subr.bf16.mxu1 %v7951_v7  ;;  %v7961_v30 = vld [vmem:[#allocation51_spill] sm:$0xff]  ;;  %v7962_v7 = vld [vmem:[#allocation29_spill] sm:$0xff] }
 0x98f   :  { %3368 = vmatpush1.bf16.msra.mxu0 %v7952_v33  ;;  %3409 = vmatpush1.bf16.msra.mxu1 %v7953_v37  ;;  %v7963_v33 = vld [vmem:[#allocation53_spill] sm:$0xff]  ;;  %v7964_v37 = vld [vmem:[#allocation30_spill] sm:$0xff] }
 0x990   :  { %3369 = vmatprep.subr.bf16.mxu0 %v7954_v56  ;;  %3410 = vmatprep.subr.bf16.mxu1 %v7955_v9  ;;  %v7965_v56 = vld [vmem:[#allocation55_spill] sm:$0xff] }
 0x991   :  { %v7966_v9 = vld [vmem:[#allocation31_spill] sm:$0xff] }
 0x993   :  { %3370 = vmatpush1.bf16.msra.mxu0 %v7956_v60  ;;  %3411 = vmatpush1.bf16.msra.mxu1 %v7957_v34  ;;  %v7967_v60 = vld [vmem:[#allocation57_spill] sm:$0xff]  ;;  %v7968_v34 = vld [vmem:[#allocation32_spill] sm:$0xff] }
 0x994   :  { %3371 = vmatprep.subr.bf16.mxu0 %v7958_v50  ;;  %3412 = vmatprep.subr.bf16.mxu1 %v7959_v3  ;;  %v7969_v50 = vld [vmem:[#allocation59_spill] sm:$0xff]  ;;  %v7970_v3 = vld [vmem:[#allocation33_spill] sm:$0xff] }
 0x997   :  { %3372 = vmatpush1.bf16.msra.mxu0 %v7960_v35  ;;  %3413 = vmatpush1.bf16.msra.mxu1 %v7961_v30  ;;  %v7971_v35 = vld [vmem:[#allocation61_spill] sm:$0xff]  ;;  %v7972_v30 = vld [vmem:[#allocation34_spill] sm:$0xff] }
 0x998   :  { %3373 = vmatprep.subr.bf16.mxu0 %v7962_v7  ;;  %3414 = vmatprep.subr.bf16.mxu1 %v7963_v33  ;;  %v7973_v7 = vld [vmem:[#allocation63_spill] sm:$0xff] }
 0x999   :  { %v7974_v33 = vld [vmem:[#allocation35_spill] sm:$0xff] }
 0x99b   :  { %3374 = vmatpush1.bf16.msra.mxu0 %v7964_v37  ;;  %3415 = vmatpush1.bf16.msra.mxu1 %v7965_v56  ;;  %v7975_v37 = vld [vmem:[#allocation65_spill] sm:$0xff]  ;;  %v7976_v56 = vld [vmem:[#allocation36_spill] sm:$0xff] }
 0x99c   :  { %3375 = vmatprep.subr.bf16.mxu0 %v7966_v9  ;;  %3416 = vmatprep.subr.bf16.mxu1 %v7967_v60  ;;  %v7977_v9 = vld [vmem:[#allocation67_spill] sm:$0xff]  ;;  %v7978_v60 = vld [vmem:[#allocation37_spill] sm:$0xff] }
 0x99f   :  { %3376 = vmatpush1.bf16.msra.mxu0 %v7968_v34  ;;  %3417 = vmatpush1.bf16.msra.mxu1 %v7969_v50  ;;  %v7979_v34 = vld [vmem:[#allocation68_spill] sm:$0xff]  ;;  %v7980_v50 = vld [vmem:[#allocation38_spill] sm:$0xff] }
 0x9a0   :  { %3377 = vmatprep.subr.bf16.mxu0 %v7970_v3  ;;  %3418 = vmatprep.subr.bf16.mxu1 %v7971_v35  ;;  %v7981_v3 = vld [vmem:[#allocation70_spill] sm:$0xff]  ;;  %v7982_v35 = vld [vmem:[#allocation40_spill] sm:$0xff] }
 0x9a3   :  { %3378 = vmatpush1.bf16.msra.mxu0 %v7972_v30  ;;  %3419 = vmatpush1.bf16.msra.mxu1 %v7973_v7  ;;  %v7983_v30 = vld [vmem:[#allocation72_spill] sm:$0xff]  ;;  %v7984_v7 = vld [vmem:[#allocation42_spill] sm:$0xff] }
 0x9a4   :  { %3379 = vmatprep.subr.bf16.mxu0 %v7974_v33  ;;  %3420 = vmatprep.subr.bf16.mxu1 %v7975_v37  ;;  %v7985_v33 = vld [vmem:[#allocation74_spill] sm:$0xff]  ;;  %v7986_v37 = vld [vmem:[#allocation44_spill] sm:$0xff] }
 0x9a7   :  { %3380 = vmatpush1.bf16.msra.mxu0 %v7976_v56  ;;  %3421 = vmatpush1.bf16.msra.mxu1 %v7977_v9  ;;  %v7987_v56 = vld [vmem:[#allocation76_spill] sm:$0xff]  ;;  %v7988_v9 = vld [vmem:[#allocation46_spill] sm:$0xff] }
 0x9a8   :  { %3381 = vmatprep.subr.bf16.mxu0 %v7978_v60  ;;  %3422 = vmatprep.subr.bf16.mxu1 %v7979_v34  ;;  %v7989_v60 = vld [vmem:[#allocation78_spill] sm:$0xff]  ;;  %v7990_v34 = vld [vmem:[#allocation48_spill] sm:$0xff] }
 0x9ab   :  { %3382 = vmatpush1.bf16.msra.mxu0 %v7980_v50  ;;  %3423 = vmatpush1.bf16.msra.mxu1 %v7981_v3  ;;  %v7991_v50 = vld [vmem:[#allocation80_spill] sm:$0xff]  ;;  %v7992_v3 = vld [vmem:[#allocation50_spill] sm:$0xff] }
 0x9ac   :  { %3383 = vmatprep.subr.bf16.mxu0 %v7982_v35  ;;  %3424 = vmatprep.subr.bf16.mxu1 %v7983_v30  ;;  %v7993_v35 = vld [vmem:[#allocation82_spill] sm:$0xff]  ;;  %v7994_v30 = vld [vmem:[#allocation52_spill] sm:$0xff] }
 0x9af   :  { %3384 = vmatpush1.bf16.msra.mxu0 %v7984_v7  ;;  %3425 = vmatpush1.bf16.msra.mxu1 %v7985_v33  ;;  %v7995_v7 = vld [vmem:[#allocation84_spill] sm:$0xff]  ;;  %v7996_v33 = vld [vmem:[#allocation54_spill] sm:$0xff] }
 0x9b0   :  { %3385 = vmatprep.subr.bf16.mxu0 %v7986_v37  ;;  %3426 = vmatprep.subr.bf16.mxu1 %v7987_v56  ;;  %v7997_v37 = vld [vmem:[#allocation86_spill] sm:$0xff]  ;;  %v7998_v56 = vld [vmem:[#allocation56_spill] sm:$0xff] }
 0x9b3   :  { %3386 = vmatpush1.bf16.msra.mxu0 %v7988_v9  ;;  %3427 = vmatpush1.bf16.msra.mxu1 %v7989_v60  ;;  %v7999_v9 = vld [vmem:[#allocation88_spill] sm:$0xff]  ;;  %v8000_v60 = vld [vmem:[#allocation58_spill] sm:$0xff] }
 0x9b4   :  { %3387 = vmatprep.subr.bf16.mxu0 %v7990_v34  ;;  %3428 = vmatprep.subr.bf16.mxu1 %v7991_v50  ;;  %v8001_v34 = vld [vmem:[#allocation90_spill] sm:$0xff]  ;;  %v8002_v50 = vld [vmem:[#allocation60_spill] sm:$0xff] }
 0x9b7   :  { %3388 = vmatpush1.bf16.msra.mxu0 %v7992_v3  ;;  %3429 = vmatpush1.bf16.msra.mxu1 %v7993_v35  ;;  %v8003_v3 = vld [vmem:[#allocation92_spill] sm:$0xff]  ;;  %v8004_v35 = vld [vmem:[#allocation62_spill] sm:$0xff] }
 0x9b8   :  { %3389 = vmatprep.subr.bf16.mxu0 %v7994_v30  ;;  %3430 = vmatprep.subr.bf16.mxu1 %v7995_v7  ;;  %v8005_v30 = vld [vmem:[#allocation94_spill] sm:$0xff]  ;;  %v8006_v7 = vld [vmem:[#allocation64_spill] sm:$0xff] }
 0x9bb   :  { %3390 = vmatpush1.bf16.msra.mxu0 %v7996_v33  ;;  %3431 = vmatpush1.bf16.msra.mxu1 %v7997_v37  ;;  %v8007_v33 = vld [vmem:[#allocation96_spill] sm:$0xff]  ;;  %v8008_v37 = vld [vmem:[#allocation66_spill] sm:$0xff] }
 0x9bc   :  { %3391 = vmatprep.subr.bf16.mxu0 %v7998_v56  ;;  %3432 = vmatprep.subr.bf16.mxu1 %v7999_v9  ;;  %v8009_v56 = vld [vmem:[#allocation98_spill] sm:$0xff]  ;;  %v8010_v9 = vld [vmem:[#allocation69_spill] sm:$0xff] }
 0x9bf   :  { %3392 = vmatpush1.bf16.msra.mxu0 %v8000_v60  ;;  %3433 = vmatpush1.bf16.msra.mxu1 %v8001_v34  ;;  %v8011_v60 = vld [vmem:[#allocation101_spill] sm:$0xff] }
 0x9c0   :  { %3393 = vmatprep.subr.bf16.mxu0 %v8002_v50  ;;  %3434 = vmatprep.subr.bf16.mxu1 %v8003_v3 }
 0x9c3   :  { %3394 = vmatpush1.bf16.msra.mxu0 %v8004_v35  ;;  %3435 = vmatpush1.bf16.msra.mxu1 %v8005_v30 }
 0x9c4   :  { %3395 = vmatprep.subr.bf16.mxu0 %v8006_v7  ;;  %3436 = vmatprep.subr.bf16.mxu1 %v8007_v33 }
 0x9c7   :  { %3396 = vmatpush1.bf16.msra.mxu0 %v8008_v37  ;;  %3437 = vmatpush1.bf16.msra.mxu1 %v8009_v56 }
 0x9c8   :  { %3447 = vmatprep.subr.bf16.mxu0 %v8010_v9  ;;  %3488 = vmatprep.subr.bf16.mxu1 %v8011_v60 }
 0xa1d   :  { %v3178_v34 = vpop.f32.mrb[88].mxu0  ;;  %v3219_v50 = vpop.f32.mrb[104].mxu1 }
 0xa1e   :  { %v3308_v3 = vadd.f32 %v3178_v34, %v8012_v16  ;;  %v3310_v35 = vadd.f32 %v3219_v50, %v8013_v5  ;;  %v3180_v45 = vpop.f32.mrb[89].mxu0  ;;  %v3221_v30 = vpop.f32.mrb[105].mxu1  ;;  %v8016_v34 = vld [vmem:[#allocation191_spill] sm:$0xff] }
 0xa1f   :  { %v3309_v7 = vadd.f32 %v3180_v45, %v8014_v21  ;;  %v3311_v33 = vadd.f32 %v3221_v30, %v8015_v24  ;;  %v3182_v1 = vpop.f32.mrb[90].mxu0  ;;  %v3223_v37 = vpop.f32.mrb[106].mxu1 }
 0xa20   :  { %v3183_v13 = vpop.f32.mrb[91].mxu0  ;;  %v3224_v56 = vpop.f32.mrb[107].mxu1  ;;  %v3318_v47 = vmul.f32 0.5, %v3310_v35  ;;  %v3316_v23 = vmul.f32 0.5, %v3308_v3  ;;  %v8018_v1 = vld [vmem:[#allocation193_spill] sm:$0xff] }
 0xa21   :  { %v3319_v9 = vmul.f32 0.5, %v3311_v33  ;;  %v3317_v60 = vmul.f32 0.5, %v3309_v7  ;;  %v8019_v13 = vld [vmem:[#allocation211_spill] sm:$0xff] }
 0xa22   :  { %4382 = vtanh.f32 %v3318_v47 }
 0xa23   :  { %4384 = vtanh.f32 %v3319_v9 }
 0xa24   :  { %4386 = vtanh.f32 %v3316_v23 }
 0xa25   :  { %4388 = vtanh.f32 %v3317_v60 }
 0xa2c   :  { %v4383_v3 = vpop.eup %4382 }
 0xa2d   :  { %v4385_v23 = vpop.eup %4384  ;;  %v3330_v37 = vmul.f32 0.5, %v4383_v3 }
 0xa2e   :  { %v4387_v60 = vpop.eup %4386 }
 0xa2f   :  { %v4389_v7 = vpop.eup %4388  ;;  %v3336_v0 = vadd.f32 0.5, %v3330_v37 }
 0xa30   :  { %v3329_v6 = vmul.f32 0.5, %v4389_v7 }
 0xa5d   :  { %v3260_v16 = vpop.f32.mrb[92].mxu0  ;;  %v3301_v5 = vpop.f32.mrb[108].mxu1 }
 0xa5e   :  { %v3312_v50 = vadd.f32 %v3260_v16, %v8016_v34  ;;  %v3314_v21 = vadd.f32 %v3301_v5, %v8017_v22  ;;  %v3262_v45 = vpop.f32.mrb[93].mxu0  ;;  %v3303_v24 = vpop.f32.mrb[109].mxu1  ;;  %v3331_v34 = vmul.f32 0.5, %v4385_v23  ;;  %v3328_v5 = vmul.f32 0.5, %v4387_v60 }
 0xa5f   :  { %v3313_v30 = vadd.f32 %v3262_v45, %v8018_v1  ;;  %v3315_v56 = vadd.f32 %v3303_v24, %v8019_v13  ;;  %v3264_v35 = vpop.f32.mrb[94].mxu0  ;;  %v3305_v33 = vpop.f32.mrb[110].mxu1  ;;  %v3335_v13 = vadd.f32 0.5, %v3329_v6 }
 0xa60   :  { %4390 = vtanh.f32 %v3314_v21  ;;  %v3265_v47 = vpop.f32.mrb[95].mxu0  ;;  %v3306_v9 = vpop.f32.mrb[111].mxu1  ;;  %v3320_v16 = vmul.f32 0.5, %v3312_v50  ;;  %v3337_v45 = vadd.f32 0.5, %v3331_v34  ;;  %v3334_v24 = vadd.f32 0.5, %v3328_v5  ;;  %v8021_v5 = vld [vmem:[#allocation110_spill] sm:$0xff] }
 0xa61   :  { %4392 = vtanh.f32 %v3315_v56  ;;  %v3321_v22 = vmul.f32 0.5, %v3313_v30  ;;  %v3342_v35 = vmul.f32 %v3336_v0, %v6457_v32 }
 0xa62   :  { %4394 = vtanh.f32 %v3320_v16  ;;  %v3343_v56 = vmul.f32 %v3337_v45, %v6459_v19  ;;  %v8022_v45 = vld [vmem:[#allocation133_spill] sm:$0xff] }
 0xa63   :  { %4396 = vtanh.f32 %v3321_v22  ;;  %v8020_v22 = vld [vmem:[#allocation132_spill] sm:$0xff] }
 0xa6a   :  { %v4391_v1 = vpop.eup %4390 }
 0xa6b   :  { %v4393_v21 = vpop.eup %4392  ;;  %v3344_v33 = vmul.f32 %v4391_v1, %v3334_v24  ;;  %v8023_v24 = vld [vmem:[#allocation112_spill] sm:$0xff]  ;;  %v8024_v1 = vld [vmem:[#allocation134_spill] sm:$0xff] }
 0xa6c   :  { %v3345_v47 = vmul.f32 %v4393_v21, %v3335_v13  ;;  %v4395_v30 = vpop.eup %4394  ;;  %v8025_v13 = vld [vmem:[#allocation114_spill] sm:$0xff]  ;;  %v8026_v21 = vld [vmem:[#allocation135_spill] sm:$0xff] }
 0xa6d   :  { %v6607_v3 = vadd.f32 %v3344_v33, %v3342_v35  ;;  %v4397_v9 = vpop.eup %4396  ;;  %v3332_v23 = vmul.f32 0.5, %v4395_v30  ;;  %v8027_v35 = vld [vmem:[#allocation116_spill] sm:$0xff]  ;;  %v8031_v30 = vld [vmem:[#allocation119_spill] sm:$0xff] }
 0xa6e   :  { %v6609_v50 = vadd.f32 %v3345_v47, %v3343_v56  ;;  %v3333_v60 = vmul.f32 0.5, %v4397_v9  ;;  %v8028_v33 = vld [vmem:[#allocation136_spill] sm:$0xff]  ;;  %v8029_v56 = vld [vmem:[#allocation118_spill] sm:$0xff]  ;;  %v8030_v47 = vld [vmem:[#allocation137_spill] sm:$0xff] }
 0xa6f   :  { %4398 = vtanh.f32 %v6607_v3  ;;  %v3338_v6 = vadd.f32 0.5, %v3332_v23  ;;  %v8032_v9 = vld [vmem:[#allocation138_spill] sm:$0xff]  ;;  %v8033_v23 = vld [vmem:[#allocation120_spill] sm:$0xff] }
 0xa70   :  { %4400 = vtanh.f32 %v6609_v50  ;;  %v3339_v37 = vadd.f32 0.5, %v3333_v60  ;;  %v8034_v60 = vld [vmem:[#allocation139_spill] sm:$0xff] }
 0xa79   :  { %v4399_v7 = vpop.eup %4398 }
 0xa7a   :  { %v4401_v32 = vpop.eup %4400  ;;  %v3350_v0 = vmul.f32 %v4399_v7, %v3338_v6  ;;  %v8035_v6 = vld [vmem:[#allocation121_spill] sm:$0xff]  ;;  %v8036_v7 = vld [vmem:[#allocation140_spill] sm:$0xff] }
 0xa7b   :  { %v3351_v16 = vmul.f32 %v4401_v32, %v3339_v37  ;;  %v8037_v37 = vld [vmem:[#allocation122_spill] sm:$0xff]  ;;  %v8038_v32 = vld [vmem:[#allocation141_spill] sm:$0xff] }
 0xa7c   :  { %v6613_v34 = vpack.c.bf16 %v3350_v0, %v3350_v0  ;;  %v8039_v0 = vld [vmem:[#allocation124_spill] sm:$0xff] }
 0xa7d   :  { %v3364_v19 = vpack.c.bf16 %v3351_v16, %v3351_v16  ;;  %v8040_v16 = vld [vmem:[#allocation142_spill] sm:$0xff] }
 0xa7f   :  { %3397 = vmatprep.mubr.bf16.mxu0 %v3364_v19  ;;  %3438 = vmatprep.mubr.bf16.mxu1 %v3364_v19 }
 0xa80   :  { %3398 = vmatmul.mubr.bf16.vlgmr.msra.gmra.mrb[96].mxu0 %v6613_v34  ;;  %3439 = vmatmul.mubr.bf16.vlgmr.msra.gmra.mrb[112].mxu1 %v6613_v34 }
 0xa81   :  { %3448 = vmatpush1.bf16.msra.mxu0 %v7337_v49  ;;  %3489 = vmatpush1.bf16.msra.mxu1 %v7338_v25 }
 0xa82   :  { %3479 = vmatprep.mubr.bf16.mxu0 %v3364_v19  ;;  %3520 = vmatprep.mubr.bf16.mxu1 %v3364_v19  ;;  %v8041_v19 = vld [vmem:[#allocation126_spill] sm:$0xff] }
 0xa83   :  { %3449 = vmatprep.subr.bf16.mxu0 %v7339_v31  ;;  %3490 = vmatprep.subr.bf16.mxu1 %v7340_v2 }
 0xa85   :  { %3450 = vmatpush1.bf16.msra.mxu0 %v7341_v40  ;;  %3491 = vmatpush1.bf16.msra.mxu1 %v7342_v12 }
 0xa86   :  { %3451 = vmatprep.subr.bf16.mxu0 %v7343_v14  ;;  %3492 = vmatprep.subr.bf16.mxu1 %v7344_v53 }
 0xa89   :  { %3452 = vmatpush1.bf16.msra.mxu0 %v7345_v54  ;;  %3493 = vmatpush1.bf16.msra.mxu1 %v7346_v29 }
 0xa8a   :  { %3453 = vmatprep.subr.bf16.mxu0 %v7347_v57  ;;  %3494 = vmatprep.subr.bf16.mxu1 %v7348_v8 }
 0xa8d   :  { %3454 = vmatpush1.bf16.msra.mxu0 %v7349_v51  ;;  %3495 = vmatpush1.bf16.msra.mxu1 %v7350_v27 }
 0xa8e   :  { %3455 = vmatprep.subr.bf16.mxu0 %v7351_v48  ;;  %3496 = vmatprep.subr.bf16.mxu1 %v7352_v59 }
 0xa91   :  { %3456 = vmatpush1.bf16.msra.mxu0 %v7353_v43  ;;  %3497 = vmatpush1.bf16.msra.mxu1 %v5114_v52 }
 0xa92   :  { %3457 = vmatprep.subr.bf16.mxu0 %v7354_v55  ;;  %3498 = vmatprep.subr.bf16.mxu1 %v5120_v36 }
 0xa95   :  { %3458 = vmatpush1.bf16.msra.mxu0 %v7355_v4  ;;  %3499 = vmatpush1.bf16.msra.mxu1 %v5126_v17 }
 0xa96   :  { %3459 = vmatprep.subr.bf16.mxu0 %v7356_v42  ;;  %3500 = vmatprep.subr.bf16.mxu1 %v5132_v18 }
 0xa99   :  { %3460 = vmatpush1.bf16.msra.mxu0 %v7357_v44  ;;  %3501 = vmatpush1.bf16.msra.mxu1 %v7438_v10 }
 0xa9a   :  { %3461 = vmatprep.subr.bf16.mxu0 %v7358_v46  ;;  %3502 = vmatprep.subr.bf16.mxu1 %v7439_v15 }
 0xa9d   :  { %3462 = vmatpush1.bf16.msra.mxu0 %v7359_v62  ;;  %3503 = vmatpush1.bf16.msra.mxu1 %v7440_v58 }
 0xa9e   :  { %3463 = vmatprep.subr.bf16.mxu0 %v7360_v41  ;;  %3504 = vmatprep.subr.bf16.mxu1 %v7441_v26 }
 0xaa1   :  { %3464 = vmatpush1.bf16.msra.mxu0 %v7361_v63  ;;  %3505 = vmatpush1.bf16.msra.mxu1 %v7442_v11 }
 0xaa2   :  { %3465 = vmatprep.subr.bf16.mxu0 %v7362_v39  ;;  %3506 = vmatprep.subr.bf16.mxu1 %v7443_v20 }
 0xaa5   :  { %3466 = vmatpush1.bf16.msra.mxu0 %v7363_v38  ;;  %3507 = vmatpush1.bf16.msra.mxu1 %v7444_v28 }
 0xaa6   :  { %3467 = vmatprep.subr.bf16.mxu0 %v7364_v61  ;;  %3508 = vmatprep.subr.bf16.mxu1 %v8020_v22 }
 0xaa9   :  { %3468 = vmatpush1.bf16.msra.mxu0 %v8021_v5  ;;  %3509 = vmatpush1.bf16.msra.mxu1 %v8022_v45  ;;  %v8114_v45 = vld [vmem:[#allocation212_spill] sm:$0xff] }
 0xaaa   :  { %3469 = vmatprep.subr.bf16.mxu0 %v8023_v24  ;;  %3510 = vmatprep.subr.bf16.mxu1 %v8024_v1 }
 0xaad   :  { %3470 = vmatpush1.bf16.msra.mxu0 %v8025_v13  ;;  %3511 = vmatpush1.bf16.msra.mxu1 %v8026_v21 }
 0xaae   :  { %3471 = vmatprep.subr.bf16.mxu0 %v8027_v35  ;;  %3512 = vmatprep.subr.bf16.mxu1 %v8028_v33  ;;  %v8111_v33 = vld [vmem:[#allocation152_spill] sm:$0xff] }
 0xaaf   :  { %v8112_v35 = vld [vmem:[#allocation188_spill] sm:$0xff] }
 0xab1   :  { %3472 = vmatpush1.bf16.msra.mxu0 %v8029_v56  ;;  %3513 = vmatpush1.bf16.msra.mxu1 %v8030_v47  ;;  %v8110_v47 = vld [vmem:[#allocation186_spill] sm:$0xff] }
 0xab2   :  { %3473 = vmatprep.subr.bf16.mxu0 %v8031_v30  ;;  %3514 = vmatprep.subr.bf16.mxu1 %v8032_v9  ;;  %v8042_v30 = vld [vmem:[#allocation143_spill] sm:$0xff]  ;;  %v8043_v9 = vld [vmem:[#allocation20_spill] sm:$0xff] }
 0xab5   :  { %3474 = vmatpush1.bf16.msra.mxu0 %v8033_v23  ;;  %3515 = vmatpush1.bf16.msra.mxu1 %v8034_v60  ;;  %v8044_v23 = vld [vmem:[#allocation21_spill] sm:$0xff]  ;;  %v8109_v60 = vld [vmem:[#allocation150_spill] sm:$0xff] }
 0xab6   :  { %3475 = vmatprep.subr.bf16.mxu0 %v8035_v6  ;;  %3516 = vmatprep.subr.bf16.mxu1 %v8036_v7  ;;  %v8045_v7 = vld [vmem:[#allocation22_spill] sm:$0xff]  ;;  %v8054_v6 = vld [vmem:[#allocation47_spill] sm:$0xff] }
 0xab9   :  { %3476 = vmatpush1.bf16.msra.mxu0 %v8037_v37  ;;  %3517 = vmatpush1.bf16.msra.mxu1 %v8038_v32  ;;  %v8046_v37 = vld [vmem:[#allocation39_spill] sm:$0xff] }
 0xaba   :  { %3477 = vmatprep.subr.bf16.mxu0 %v8039_v0  ;;  %3518 = vmatprep.subr.bf16.mxu1 %v8040_v16  ;;  %v8047_v32 = vld [vmem:[#allocation23_spill] sm:$0xff]  ;;  %v8048_v0 = vld [vmem:[#allocation41_spill] sm:$0xff]  ;;  %v8049_v16 = vld [vmem:[#allocation24_spill] sm:$0xff] }
 0xabd   :  { %3478 = vmatpush1.bf16.msra.mxu0 %v8041_v19  ;;  %3519 = vmatpush1.bf16.msra.mxu1 %v8042_v30  ;;  %v8050_v19 = vld [vmem:[#allocation43_spill] sm:$0xff]  ;;  %v8051_v30 = vld [vmem:[#allocation25_spill] sm:$0xff] }
 0xabe   :  { %3586 = vmatprep.subr.bf16.mxu0 %v8043_v9  ;;  %3627 = vmatprep.subr.bf16.mxu1 %v8044_v23  ;;  %v8052_v9 = vld [vmem:[#allocation45_spill] sm:$0xff]  ;;  %v8053_v23 = vld [vmem:[#allocation26_spill] sm:$0xff] }
 0xac0   :  { %3480 = vmatmul.mubr.bf16.vlgmr.msra.gmra.mrb[100].mxu0 %v6613_v34  ;;  %3521 = vmatmul.mubr.bf16.vlgmr.msra.gmra.mrb[116].mxu1 %v6613_v34  ;;  %v8055_v34 = vld [vmem:[#allocation27_spill] sm:$0xff] }
 0xac1   :  { %3587 = vmatpush1.bf16.msra.mxu0 %v8045_v7  ;;  %3628 = vmatpush1.bf16.msra.mxu1 %v8046_v37  ;;  %v8056_v7 = vld [vmem:[#allocation49_spill] sm:$0xff]  ;;  %v8057_v37 = vld [vmem:[#allocation28_spill] sm:$0xff] }
 0xac2   :  { %3588 = vmatprep.subr.bf16.mxu0 %v8047_v32  ;;  %3629 = vmatprep.subr.bf16.mxu1 %v8048_v0  ;;  %v8058_v32 = vld [vmem:[#allocation51_spill] sm:$0xff]  ;;  %v8059_v0 = vld [vmem:[#allocation29_spill] sm:$0xff] }
 0xac5   :  { %3589 = vmatpush1.bf16.msra.mxu0 %v8049_v16  ;;  %3630 = vmatpush1.bf16.msra.mxu1 %v8050_v19  ;;  %v8060_v16 = vld [vmem:[#allocation53_spill] sm:$0xff]  ;;  %v8061_v19 = vld [vmem:[#allocation30_spill] sm:$0xff] }
 0xac6   :  { %3590 = vmatprep.subr.bf16.mxu0 %v8051_v30  ;;  %3631 = vmatprep.subr.bf16.mxu1 %v8052_v9  ;;  %v8062_v30 = vld [vmem:[#allocation55_spill] sm:$0xff] }
 0xac7   :  { %v8063_v9 = vld [vmem:[#allocation31_spill] sm:$0xff] }
 0xac9   :  { %3591 = vmatpush1.bf16.msra.mxu0 %v8053_v23  ;;  %3632 = vmatpush1.bf16.msra.mxu1 %v8054_v6  ;;  %v8064_v23 = vld [vmem:[#allocation57_spill] sm:$0xff]  ;;  %v8065_v6 = vld [vmem:[#allocation32_spill] sm:$0xff] }
 0xaca   :  { %3592 = vmatprep.subr.bf16.mxu0 %v8055_v34  ;;  %3633 = vmatprep.subr.bf16.mxu1 %v8056_v7  ;;  %v8066_v34 = vld [vmem:[#allocation59_spill] sm:$0xff]  ;;  %v8067_v7 = vld [vmem:[#allocation33_spill] sm:$0xff] }
 0xacd   :  { %3593 = vmatpush1.bf16.msra.mxu0 %v8057_v37  ;;  %3634 = vmatpush1.bf16.msra.mxu1 %v8058_v32  ;;  %v8068_v37 = vld [vmem:[#allocation61_spill] sm:$0xff]  ;;  %v8069_v32 = vld [vmem:[#allocation34_spill] sm:$0xff] }
 0xace   :  { %3594 = vmatprep.subr.bf16.mxu0 %v8059_v0  ;;  %3635 = vmatprep.subr.bf16.mxu1 %v8060_v16  ;;  %v8070_v0 = vld [vmem:[#allocation63_spill] sm:$0xff] }
 0xacf   :  { %v8071_v16 = vld [vmem:[#allocation35_spill] sm:$0xff] }
 0xad1   :  { %3595 = vmatpush1.bf16.msra.mxu0 %v8061_v19  ;;  %3636 = vmatpush1.bf16.msra.mxu1 %v8062_v30  ;;  %v8072_v19 = vld [vmem:[#allocation65_spill] sm:$0xff]  ;;  %v8073_v30 = vld [vmem:[#allocation36_spill] sm:$0xff] }
 0xad2   :  { %3596 = vmatprep.subr.bf16.mxu0 %v8063_v9  ;;  %3637 = vmatprep.subr.bf16.mxu1 %v8064_v23  ;;  %v8074_v9 = vld [vmem:[#allocation67_spill] sm:$0xff]  ;;  %v8075_v23 = vld [vmem:[#allocation37_spill] sm:$0xff] }
 0xad5   :  { %3597 = vmatpush1.bf16.msra.mxu0 %v8065_v6  ;;  %3638 = vmatpush1.bf16.msra.mxu1 %v8066_v34  ;;  %v8076_v6 = vld [vmem:[#allocation68_spill] sm:$0xff]  ;;  %v8077_v34 = vld [vmem:[#allocation38_spill] sm:$0xff] }
 0xad6   :  { %3598 = vmatprep.subr.bf16.mxu0 %v8067_v7  ;;  %3639 = vmatprep.subr.bf16.mxu1 %v8068_v37  ;;  %v8078_v7 = vld [vmem:[#allocation70_spill] sm:$0xff]  ;;  %v8079_v37 = vld [vmem:[#allocation40_spill] sm:$0xff] }
 0xad9   :  { %3599 = vmatpush1.bf16.msra.mxu0 %v8069_v32  ;;  %3640 = vmatpush1.bf16.msra.mxu1 %v8070_v0  ;;  %v8080_v32 = vld [vmem:[#allocation72_spill] sm:$0xff]  ;;  %v8081_v0 = vld [vmem:[#allocation42_spill] sm:$0xff] }
 0xada   :  { %3600 = vmatprep.subr.bf16.mxu0 %v8071_v16  ;;  %3641 = vmatprep.subr.bf16.mxu1 %v8072_v19  ;;  %v8082_v16 = vld [vmem:[#allocation74_spill] sm:$0xff]  ;;  %v8083_v19 = vld [vmem:[#allocation44_spill] sm:$0xff] }
 0xadd   :  { %3601 = vmatpush1.bf16.msra.mxu0 %v8073_v30  ;;  %3642 = vmatpush1.bf16.msra.mxu1 %v8074_v9  ;;  %v8084_v30 = vld [vmem:[#allocation76_spill] sm:$0xff]  ;;  %v8085_v9 = vld [vmem:[#allocation46_spill] sm:$0xff] }
 0xade   :  { %3602 = vmatprep.subr.bf16.mxu0 %v8075_v23  ;;  %3643 = vmatprep.subr.bf16.mxu1 %v8076_v6  ;;  %v8086_v23 = vld [vmem:[#allocation78_spill] sm:$0xff]  ;;  %v8087_v6 = vld [vmem:[#allocation48_spill] sm:$0xff] }
 0xae1   :  { %3603 = vmatpush1.bf16.msra.mxu0 %v8077_v34  ;;  %3644 = vmatpush1.bf16.msra.mxu1 %v8078_v7  ;;  %v8088_v34 = vld [vmem:[#allocation80_spill] sm:$0xff]  ;;  %v8089_v7 = vld [vmem:[#allocation50_spill] sm:$0xff] }
 0xae2   :  { %3604 = vmatprep.subr.bf16.mxu0 %v8079_v37  ;;  %3645 = vmatprep.subr.bf16.mxu1 %v8080_v32  ;;  %v8090_v37 = vld [vmem:[#allocation82_spill] sm:$0xff]  ;;  %v8091_v32 = vld [vmem:[#allocation52_spill] sm:$0xff] }
 0xae5   :  { %3605 = vmatpush1.bf16.msra.mxu0 %v8081_v0  ;;  %3646 = vmatpush1.bf16.msra.mxu1 %v8082_v16  ;;  %v8092_v0 = vld [vmem:[#allocation84_spill] sm:$0xff]  ;;  %v8093_v16 = vld [vmem:[#allocation54_spill] sm:$0xff] }
 0xae6   :  { %3606 = vmatprep.subr.bf16.mxu0 %v8083_v19  ;;  %3647 = vmatprep.subr.bf16.mxu1 %v8084_v30  ;;  %v8094_v19 = vld [vmem:[#allocation86_spill] sm:$0xff]  ;;  %v8095_v30 = vld [vmem:[#allocation56_spill] sm:$0xff] }
 0xae9   :  { %3607 = vmatpush1.bf16.msra.mxu0 %v8085_v9  ;;  %3648 = vmatpush1.bf16.msra.mxu1 %v8086_v23  ;;  %v8096_v9 = vld [vmem:[#allocation88_spill] sm:$0xff]  ;;  %v8097_v23 = vld [vmem:[#allocation58_spill] sm:$0xff] }
 0xaea   :  { %3608 = vmatprep.subr.bf16.mxu0 %v8087_v6  ;;  %3649 = vmatprep.subr.bf16.mxu1 %v8088_v34  ;;  %v8098_v6 = vld [vmem:[#allocation90_spill] sm:$0xff]  ;;  %v8099_v34 = vld [vmem:[#allocation60_spill] sm:$0xff] }
 0xaed   :  { %3609 = vmatpush1.bf16.msra.mxu0 %v8089_v7  ;;  %3650 = vmatpush1.bf16.msra.mxu1 %v8090_v37  ;;  %v8100_v7 = vld [vmem:[#allocation92_spill] sm:$0xff]  ;;  %v8101_v37 = vld [vmem:[#allocation62_spill] sm:$0xff] }
 0xaee   :  { %3610 = vmatprep.subr.bf16.mxu0 %v8091_v32  ;;  %3651 = vmatprep.subr.bf16.mxu1 %v8092_v0  ;;  %v8102_v32 = vld [vmem:[#allocation94_spill] sm:$0xff]  ;;  %v8103_v0 = vld [vmem:[#allocation64_spill] sm:$0xff] }
 0xaf1   :  { %3611 = vmatpush1.bf16.msra.mxu0 %v8093_v16  ;;  %3652 = vmatpush1.bf16.msra.mxu1 %v8094_v19  ;;  %v8104_v16 = vld [vmem:[#allocation96_spill] sm:$0xff]  ;;  %v8105_v19 = vld [vmem:[#allocation66_spill] sm:$0xff] }
 0xaf2   :  { %3612 = vmatprep.subr.bf16.mxu0 %v8095_v30  ;;  %3653 = vmatprep.subr.bf16.mxu1 %v8096_v9  ;;  %v8106_v30 = vld [vmem:[#allocation98_spill] sm:$0xff]  ;;  %v8107_v9 = vld [vmem:[#allocation69_spill] sm:$0xff] }
 0xaf5   :  { %3613 = vmatpush1.bf16.msra.mxu0 %v8097_v23  ;;  %3654 = vmatpush1.bf16.msra.mxu1 %v8098_v6  ;;  %v8108_v23 = vld [vmem:[#allocation101_spill] sm:$0xff] }
 0xaf6   :  { %3614 = vmatprep.subr.bf16.mxu0 %v8099_v34  ;;  %3655 = vmatprep.subr.bf16.mxu1 %v8100_v7 }
 0xaf9   :  { %3615 = vmatpush1.bf16.msra.mxu0 %v8101_v37  ;;  %3656 = vmatpush1.bf16.msra.mxu1 %v8102_v32 }
 0xafa   :  { %3616 = vmatprep.subr.bf16.mxu0 %v8103_v0  ;;  %3657 = vmatprep.subr.bf16.mxu1 %v8104_v16 }
 0xafd   :  { %3617 = vmatpush1.bf16.msra.mxu0 %v8105_v19  ;;  %3658 = vmatpush1.bf16.msra.mxu1 %v8106_v30 }
 0xafe   :  { %3668 = vmatprep.subr.bf16.mxu0 %v8107_v9  ;;  %3709 = vmatprep.subr.bf16.mxu1 %v8108_v23 }
 0xb53   :  { %v3399_v6 = vpop.f32.mrb[96].mxu0  ;;  %v3440_v34 = vpop.f32.mrb[112].mxu1 }
 0xb54   :  { %v3529_v7 = vadd.f32 %v3399_v6, %v8109_v60  ;;  %v3531_v37 = vadd.f32 %v3440_v34, %v8110_v47  ;;  %v3401_v56 = vpop.f32.mrb[97].mxu0  ;;  %v3442_v32 = vpop.f32.mrb[113].mxu1  ;;  %v8113_v6 = vld [vmem:[#allocation194_spill] sm:$0xff] }
 0xb55   :  { %v3530_v0 = vadd.f32 %v3401_v56, %v8111_v33  ;;  %v3532_v16 = vadd.f32 %v3442_v32, %v8112_v35  ;;  %v3403_v21 = vpop.f32.mrb[98].mxu0  ;;  %v3444_v19 = vpop.f32.mrb[114].mxu1 }
 0xb56   :  { %v3404_v13 = vpop.f32.mrb[99].mxu0  ;;  %v3445_v30 = vpop.f32.mrb[115].mxu1  ;;  %v3539_v1 = vmul.f32 0.5, %v3531_v37  ;;  %v3537_v24 = vmul.f32 0.5, %v3529_v7  ;;  %v8115_v21 = vld [vmem:[#allocation195_spill] sm:$0xff] }
 0xb57   :  { %v3540_v9 = vmul.f32 0.5, %v3532_v16  ;;  %v3538_v23 = vmul.f32 0.5, %v3530_v0  ;;  %v8116_v13 = vld [vmem:[#allocation213_spill] sm:$0xff] }
 0xb58   :  { %4402 = vtanh.f32 %v3539_v1 }
 0xb59   :  { %4404 = vtanh.f32 %v3540_v9 }
 0xb5a   :  { %4406 = vtanh.f32 %v3537_v24 }
 0xb5b   :  { %4408 = vtanh.f32 %v3538_v23 }
 0xb62   :  { %v4403_v7 = vpop.eup %4402 }
 0xb63   :  { %v4405_v24 = vpop.eup %4404  ;;  %v3551_v23 = vmul.f32 0.5, %v4403_v7 }
 0xb64   :  { %v4407_v30 = vpop.eup %4406 }
 0xb65   :  { %v4409_v9 = vpop.eup %4408  ;;  %v3557_v22 = vadd.f32 0.5, %v3551_v23 }
 0xb66   :  { %v3550_v5 = vmul.f32 0.5, %v4409_v9 }
 0xb93   :  { %v3481_v60 = vpop.f32.mrb[100].mxu0  ;;  %v3522_v47 = vpop.f32.mrb[116].mxu1 }
 0xb94   :  { %v3533_v34 = vadd.f32 %v3481_v60, %v8113_v6  ;;  %v3535_v33 = vadd.f32 %v3522_v47, %v8114_v45  ;;  %v3483_v56 = vpop.f32.mrb[101].mxu0  ;;  %v3524_v35 = vpop.f32.mrb[117].mxu1  ;;  %v3552_v6 = vmul.f32 0.5, %v4405_v24  ;;  %v3549_v47 = vmul.f32 0.5, %v4407_v30 }
 0xb95   :  { %v3534_v32 = vadd.f32 %v3483_v56, %v8115_v21  ;;  %v3536_v19 = vadd.f32 %v3524_v35, %v8116_v13  ;;  %v3485_v37 = vpop.f32.mrb[102].mxu0  ;;  %v3526_v16 = vpop.f32.mrb[118].mxu1  ;;  %v3556_v13 = vadd.f32 0.5, %v3550_v5 }
 0xb96   :  { %4410 = vtanh.f32 %v3535_v33  ;;  %v3486_v1 = vpop.f32.mrb[103].mxu0  ;;  %v3527_v0 = vpop.f32.mrb[119].mxu1  ;;  %v3541_v60 = vmul.f32 0.5, %v3533_v34  ;;  %v3558_v56 = vadd.f32 0.5, %v3552_v6  ;;  %v3555_v35 = vadd.f32 0.5, %v3549_v47 }
 0xb97   :  { %4412 = vtanh.f32 %v3536_v19  ;;  %v3542_v45 = vmul.f32 0.5, %v3534_v32  ;;  %v3563_v37 = vmul.f32 %v3557_v22, %v6607_v3 }
 0xb98   :  { %4414 = vtanh.f32 %v3541_v60  ;;  %v3564_v19 = vmul.f32 %v3558_v56, %v6609_v50  ;;  %v8140_v56 = vld [vmem:[#allocation154_spill] sm:$0xff] }
 0xb99   :  { %4416 = vtanh.f32 %v3542_v45 }
 0xba0   :  { %v4411_v21 = vpop.eup %4410 }
 0xba1   :  { %v4413_v33 = vpop.eup %4412  ;;  %v3565_v16 = vmul.f32 %v4411_v21, %v3555_v35  ;;  %v8141_v21 = vld [vmem:[#allocation190_spill] sm:$0xff] }
 0xba2   :  { %v3566_v1 = vmul.f32 %v4413_v33, %v3556_v13  ;;  %v4415_v32 = vpop.eup %4414 }
 0xba3   :  { %v6757_v7 = vadd.f32 %v3565_v16, %v3563_v37  ;;  %v4417_v0 = vpop.eup %4416  ;;  %v3553_v24 = vmul.f32 0.5, %v4415_v32  ;;  %v8142_v16 = vld [vmem:[#allocation156_spill] sm:$0xff] }
 0xba4   :  { %v6759_v34 = vadd.f32 %v3566_v1, %v3564_v19  ;;  %v3554_v30 = vmul.f32 0.5, %v4417_v0  ;;  %v8143_v1 = vld [vmem:[#allocation192_spill] sm:$0xff] }
 0xba5   :  { %4418 = vtanh.f32 %v6757_v7  ;;  %v3559_v5 = vadd.f32 0.5, %v3553_v24 }
 0xba6   :  { %4420 = vtanh.f32 %v6759_v34  ;;  %v3560_v23 = vadd.f32 0.5, %v3554_v30 }
 0xbaf   :  { %v4419_v9 = vpop.eup %4418 }
 0xbb0   :  { %v4421_v3 = vpop.eup %4420  ;;  %v3571_v22 = vmul.f32 %v4419_v9, %v3559_v5 }
 0xbb1   :  { %v3572_v60 = vmul.f32 %v4421_v3, %v3560_v23 }
 0xbb2   :  { %v6763_v6 = vpack.c.bf16 %v3571_v22, %v3571_v22 }
 0xbb3   :  { %v3585_v50 = vpack.c.bf16 %v3572_v60, %v3572_v60 }
 0xbb5   :  { %3618 = vmatprep.mubr.bf16.mxu0 %v3585_v50  ;;  %3659 = vmatprep.mubr.bf16.mxu1 %v3585_v50 }
 0xbb6   :  { %3619 = vmatmul.mubr.bf16.vlgmr.msra.gmra.mrb[104].mxu0 %v6763_v6  ;;  %3660 = vmatmul.mubr.bf16.vlgmr.msra.gmra.mrb[120].mxu1 %v6763_v6 }
 0xbb7   :  { %3669 = vmatpush1.bf16.msra.mxu0 %v7337_v49  ;;  %3710 = vmatpush1.bf16.msra.mxu1 %v7338_v25  ;;  %v8121_v49 = vld [vmem:[#allocation134_spill] sm:$0xff] }
 0xbb8   :  { %3700 = vmatprep.mubr.bf16.mxu0 %v3585_v50  ;;  %3741 = vmatprep.mubr.bf16.mxu1 %v3585_v50  ;;  %v8122_v25 = vld [vmem:[#allocation114_spill] sm:$0xff] }
 0xbb9   :  { %3670 = vmatprep.subr.bf16.mxu0 %v7339_v31  ;;  %3711 = vmatprep.subr.bf16.mxu1 %v7340_v2  ;;  %v8123_v31 = vld [vmem:[#allocation135_spill] sm:$0xff]  ;;  %v8124_v2 = vld [vmem:[#allocation116_spill] sm:$0xff] }
 0xbbb   :  { %3671 = vmatpush1.bf16.msra.mxu0 %v7341_v40  ;;  %3712 = vmatpush1.bf16.msra.mxu1 %v7342_v12  ;;  %v8126_v40 = vld [vmem:[#allocation118_spill] sm:$0xff]  ;;  %v8128_v12 = vld [vmem:[#allocation119_spill] sm:$0xff] }
 0xbbc   :  { %3672 = vmatprep.subr.bf16.mxu0 %v7343_v14  ;;  %3713 = vmatprep.subr.bf16.mxu1 %v7344_v53  ;;  %v8129_v14 = vld [vmem:[#allocation138_spill] sm:$0xff]  ;;  %v8130_v53 = vld [vmem:[#allocation120_spill] sm:$0xff] }
 0xbbf   :  { %3673 = vmatpush1.bf16.msra.mxu0 %v7345_v54  ;;  %3714 = vmatpush1.bf16.msra.mxu1 %v7346_v29  ;;  %v8131_v54 = vld [vmem:[#allocation139_spill] sm:$0xff]  ;;  %v8132_v29 = vld [vmem:[#allocation121_spill] sm:$0xff] }
 0xbc0   :  { %3674 = vmatprep.subr.bf16.mxu0 %v7347_v57  ;;  %3715 = vmatprep.subr.bf16.mxu1 %v7348_v8  ;;  %v8133_v57 = vld [vmem:[#allocation140_spill] sm:$0xff]  ;;  %v8134_v8 = vld [vmem:[#allocation122_spill] sm:$0xff] }
 0xbc3   :  { %3675 = vmatpush1.bf16.msra.mxu0 %v7349_v51  ;;  %3716 = vmatpush1.bf16.msra.mxu1 %v7350_v27  ;;  %v8135_v51 = vld [vmem:[#allocation141_spill] sm:$0xff]  ;;  %v8136_v27 = vld [vmem:[#allocation124_spill] sm:$0xff] }
 0xbc4   :  { %3676 = vmatprep.subr.bf16.mxu0 %v7351_v48  ;;  %3717 = vmatprep.subr.bf16.mxu1 %v7352_v59  ;;  %v8137_v48 = vld [vmem:[#allocation142_spill] sm:$0xff] }
 0xbc5   :  { %v8138_v59 = vld [vmem:[#allocation126_spill] sm:$0xff] }
 0xbc7   :  { %3677 = vmatpush1.bf16.msra.mxu0 %v7353_v43  ;;  %3718 = vmatpush1.bf16.msra.mxu1 %v5114_v52  ;;  %v8117_v52 = vld [vmem:[#allocation132_spill] sm:$0xff]  ;;  %v8139_v43 = vld [vmem:[#allocation143_spill] sm:$0xff] }
 0xbc8   :  { %3678 = vmatprep.subr.bf16.mxu0 %v7354_v55  ;;  %3719 = vmatprep.subr.bf16.mxu1 %v5120_v36  ;;  %v8118_v36 = vld [vmem:[#allocation110_spill] sm:$0xff]  ;;  %v4226_v55 = vld [vmem:[#allocation14 + $0x40] sm:$0xff]  }
 0xbcb   :  { %3679 = vmatpush1.bf16.msra.mxu0 %v7355_v4  ;;  %3720 = vmatpush1.bf16.msra.mxu1 %v5126_v17  ;;  %v8119_v17 = vld [vmem:[#allocation133_spill] sm:$0xff]  ;;  %v4227_v4 = vld [vmem:[#allocation14] sm:$0xff]  }
 0xbcc   :  { %3680 = vmatprep.subr.bf16.mxu0 %v7356_v42  ;;  %3721 = vmatprep.subr.bf16.mxu1 %v5132_v18  ;;  %v8120_v18 = vld [vmem:[#allocation112_spill] sm:$0xff]  ;;  %v4228_v42 = vld [vmem:[#allocation14 + $0x48] sm:$0xff]  }
 0xbcf   :  { %3681 = vmatpush1.bf16.msra.mxu0 %v7357_v44  ;;  %3722 = vmatpush1.bf16.msra.mxu1 %v7438_v10  ;;  %v4229_v44 = vld [vmem:[#allocation14 + $0x8] sm:$0xff]   ;;  %v4235_v10 = vld [vmem:[#allocation14 + $0x20] sm:$0xff]  }
 0xbd0   :  { %3682 = vmatprep.subr.bf16.mxu0 %v7358_v46  ;;  %3723 = vmatprep.subr.bf16.mxu1 %v7439_v15  ;;  %v4230_v46 = vld [vmem:[#allocation14 + $0x50] sm:$0xff]   ;;  %v4236_v15 = vld [vmem:[#allocation14 + $0x68] sm:$0xff]  }
 0xbd3   :  { %3683 = vmatpush1.bf16.msra.mxu0 %v7359_v62  ;;  %3724 = vmatpush1.bf16.msra.mxu1 %v7440_v58  ;;  %v4231_v62 = vld [vmem:[#allocation14 + $0x10] sm:$0xff]   ;;  %v4237_v58 = vld [vmem:[#allocation14 + $0x28] sm:$0xff]  }
 0xbd4   :  { %3684 = vmatprep.subr.bf16.mxu0 %v7360_v41  ;;  %3725 = vmatprep.subr.bf16.mxu1 %v7441_v26  ;;  %v4232_v41 = vld [vmem:[#allocation14 + $0x58] sm:$0xff]   ;;  %v4238_v26 = vld [vmem:[#allocation14 + $0x70] sm:$0xff]  }
 0xbd7   :  { %3685 = vmatpush1.bf16.msra.mxu0 %v7361_v63  ;;  %3726 = vmatpush1.bf16.msra.mxu1 %v7442_v11  ;;  %v4233_v63 = vld [vmem:[#allocation14 + $0x18] sm:$0xff]   ;;  %v4239_v11 = vld [vmem:[#allocation14 + $0x30] sm:$0xff]  }
 0xbd8   :  { %3686 = vmatprep.subr.bf16.mxu0 %v7362_v39  ;;  %3727 = vmatprep.subr.bf16.mxu1 %v7443_v20  ;;  %v4234_v39 = vld [vmem:[#allocation14 + $0x60] sm:$0xff]   ;;  %v4240_v20 = vld [vmem:[#allocation14 + $0x78] sm:$0xff]  }
 0xbdb   :  { %3687 = vmatpush1.bf16.msra.mxu0 %v7363_v38  ;;  %3728 = vmatpush1.bf16.msra.mxu1 %v7444_v28  ;;  %v8125_v38 = vld [vmem:[#allocation136_spill] sm:$0xff]  ;;  %v4241_v28 = vld [vmem:[#allocation14 + $0x38] sm:$0xff]  }
 0xbdc   :  { %3688 = vmatprep.subr.bf16.mxu0 %v7364_v61  ;;  %3729 = vmatprep.subr.bf16.mxu1 %v8117_v52  ;;  %v8127_v61 = vld [vmem:[#allocation137_spill] sm:$0xff] }
 0xbdf   :  { %3689 = vmatpush1.bf16.msra.mxu0 %v8118_v36  ;;  %3730 = vmatpush1.bf16.msra.mxu1 %v8119_v17  ;;  %v8145_v36 = vld [vmem:[#allocation214_spill] sm:$0xff] }
 0xbe0   :  { %3690 = vmatprep.subr.bf16.mxu0 %v8120_v18  ;;  %3731 = vmatprep.subr.bf16.mxu1 %v8121_v49 }
 0xbe3   :  { %3691 = vmatpush1.bf16.msra.mxu0 %v8122_v25  ;;  %3732 = vmatpush1.bf16.msra.mxu1 %v8123_v31  ;;  %v8146_v25 = vld [vmem:[#allocation199_spill] sm:$0xff] }
 0xbe4   :  { %3692 = vmatprep.subr.bf16.mxu0 %v8124_v2  ;;  %3733 = vmatprep.subr.bf16.mxu1 %v8125_v38  ;;  %v8147_v2 = vld [vmem:[#allocation215_spill] sm:$0xff] }
 0xbe7   :  { %3693 = vmatpush1.bf16.msra.mxu0 %v8126_v40  ;;  %3734 = vmatpush1.bf16.msra.mxu1 %v8127_v61 }
 0xbe8   :  { %3694 = vmatprep.subr.bf16.mxu0 %v8128_v12  ;;  %3735 = vmatprep.subr.bf16.mxu1 %v8129_v14 }
 0xbeb   :  { %3695 = vmatpush1.bf16.msra.mxu0 %v8130_v53  ;;  %3736 = vmatpush1.bf16.msra.mxu1 %v8131_v54 }
 0xbec   :  { %3696 = vmatprep.subr.bf16.mxu0 %v8132_v29  ;;  %3737 = vmatprep.subr.bf16.mxu1 %v8133_v57 }
 0xbef   :  { %3697 = vmatpush1.bf16.msra.mxu0 %v8134_v8  ;;  %3738 = vmatpush1.bf16.msra.mxu1 %v8135_v51 }
 0xbf0   :  { %3698 = vmatprep.subr.bf16.mxu0 %v8136_v27  ;;  %3739 = vmatprep.subr.bf16.mxu1 %v8137_v48 }
 0xbf3   :  { %3699 = vmatpush1.bf16.msra.mxu0 %v8138_v59  ;;  %3740 = vmatpush1.bf16.msra.mxu1 %v8139_v43 }
 0xbf4   :  { %4191 = vmatprep.subr.bf16.mxu0 %v4226_v55 }
 0xbf6   :  { %3701 = vmatmul.mubr.bf16.vlgmr.msra.gmra.mrb[108].mxu0 %v6763_v6  ;;  %3742 = vmatmul.mubr.bf16.vlgmr.msra.gmra.mrb[124].mxu1 %v6763_v6  ;;  %v8144_v6 = vld [vmem:[#allocation197_spill] sm:$0xff] }
 0xbf7   :  { %4192 = vmatpush3.bf16.msra.mxu0 %v4227_v4 }
 0xbf8   :  { %4193 = vmatprep.subr.bf16.mxu0 %v4228_v42 }
 0xbfb   :  { %4194 = vmatpush3.bf16.msra.mxu0 %v4229_v44 }
 0xbfc   :  { %4195 = vmatprep.subr.bf16.mxu0 %v4230_v46 }
 0xbff   :  { %4196 = vmatpush3.bf16.msra.mxu0 %v4231_v62 }
 0xc00   :  { %4197 = vmatprep.subr.bf16.mxu0 %v4232_v41 }
 0xc03   :  { %4198 = vmatpush3.bf16.msra.mxu0 %v4233_v63 }
 0xc04   :  { %4199 = vmatprep.subr.bf16.mxu0 %v4234_v39 }
 0xc07   :  { %4200 = vmatpush3.bf16.msra.mxu0 %v4235_v10 }
 0xc08   :  { %4201 = vmatprep.subr.bf16.mxu0 %v4236_v15 }
 0xc0b   :  { %4202 = vmatpush3.bf16.msra.mxu0 %v4237_v58 }
 0xc0c   :  { %4203 = vmatprep.subr.bf16.mxu0 %v4238_v26 }
 0xc0f   :  { %4204 = vmatpush3.bf16.msra.mxu0 %v4239_v11 }
 0xc10   :  { %4205 = vmatprep.subr.bf16.mxu0 %v4240_v20 }
 0xc13   :  { %4206 = vmatpush3.bf16.msra.mxu0 %v4241_v28 }
 0xc89   :  { %v3620_v45 = vpop.f32.mrb[104].mxu0  ;;  %v3661_v47 = vpop.f32.mrb[120].mxu1 }
 0xc8a   :  { %v3750_v35 = vadd.f32 %v3620_v45, %v8140_v56  ;;  %v3752_v13 = vadd.f32 %v3661_v47, %v8141_v21  ;;  %v3622_v33 = vpop.f32.mrb[105].mxu0  ;;  %v3663_v37 = vpop.f32.mrb[121].mxu1 }
 0xc8b   :  { %v3751_v19 = vadd.f32 %v3622_v33, %v8142_v16  ;;  %v3753_v32 = vadd.f32 %v3663_v37, %v8143_v1  ;;  %v3624_v0 = vpop.f32.mrb[106].mxu0  ;;  %v3665_v24 = vpop.f32.mrb[122].mxu1  ;;  %v4172_v16 = vld [vmem:[%s6854_s4] ss:$0 sm:$0xff] }
 0xc8c   :  { %v3625_v30 = vpop.f32.mrb[107].mxu0  ;;  %v3666_v5 = vpop.f32.mrb[123].mxu1  ;;  %v3760_v9 = vmul.f32 0.5, %v3752_v13  ;;  %v3758_v3 = vmul.f32 0.5, %v3750_v35  ;;  %v4189_v24 = vld [vmem:[%s6855_s5] ss:$0 sm:$0xff] }
 0xc8d   :  { %v3761_v23 = vmul.f32 0.5, %v3753_v32  ;;  %v3759_v22 = vmul.f32 0.5, %v3751_v19 }
 0xc8e   :  { %4422 = vtanh.f32 %v3760_v9  ;;  %v4190_v9 = vld [vmem:[#allocation8] ss:$0 sm:$0xff] }
 0xc8f   :  { %4424 = vtanh.f32 %v3761_v23 }
 0xc90   :  { %4426 = vtanh.f32 %v3758_v3 }
 0xc91   :  { %4428 = vtanh.f32 %v3759_v22 }
 0xc98   :  { %v4423_v12 = vpop.eup %4422 }
 0xc99   :  { %v4425_v54 = vpop.eup %4424  ;;  %v3772_v8 = vmul.f32 0.5, %v4423_v12 }
 0xc9a   :  { %v4427_v29 = vpop.eup %4426  ;;  %v3773_v27 = vmul.f32 0.5, %v4425_v54 }
 0xc9b   :  { %v4429_v57 = vpop.eup %4428  ;;  %v3770_v59 = vmul.f32 0.5, %v4427_v29  ;;  %v3778_v55 = vadd.f32 0.5, %v3772_v8 }
 0xc9c   :  { %v3771_v43 = vmul.f32 0.5, %v4429_v57  ;;  %v3779_v4 = vadd.f32 0.5, %v3773_v27 }
 0xc9d   :  { %v3776_v42 = vadd.f32 0.5, %v3770_v59  ;;  %v3784_v41 = vmul.f32 %v3778_v55, %v6757_v7 }
 0xc9e   :  { %v3777_v46 = vadd.f32 0.5, %v3771_v43  ;;  %v3785_v39 = vmul.f32 %v3779_v4, %v6759_v34 }
 0xcc9   :  { %v3702_v60 = vpop.f32.mrb[108].mxu0  ;;  %v3743_v50 = vpop.f32.mrb[124].mxu1 }
 0xcca   :  { %v3754_v52 = vadd.f32 %v3702_v60, %v8144_v6  ;;  %v3756_v17 = vadd.f32 %v3743_v50, %v8145_v36  ;;  %v3704_v18 = vpop.f32.mrb[109].mxu0  ;;  %v3745_v49 = vpop.f32.mrb[125].mxu1 }
 0xccb   :  { %v3755_v31 = vadd.f32 %v3704_v18, %v8146_v25  ;;  %v3757_v38 = vadd.f32 %v3745_v49, %v8147_v2  ;;  %v3706_v40 = vpop.f32.mrb[110].mxu0  ;;  %v3747_v61 = vpop.f32.mrb[126].mxu1 }
 0xccc   :  { %4430 = vtanh.f32 %v3756_v17  ;;  %v3707_v14 = vpop.f32.mrb[111].mxu0  ;;  %v3748_v53 = vpop.f32.mrb[127].mxu1  ;;  %v3762_v51 = vmul.f32 0.5, %v3754_v52 }
 0xccd   :  { %4432 = vtanh.f32 %v3757_v38  ;;  %v3763_v48 = vmul.f32 0.5, %v3755_v31 }
 0xcce   :  { %4434 = vtanh.f32 %v3762_v51 }
 0xccf   :  { %4436 = vtanh.f32 %v3763_v48 }
 0xcd6   :  { %v4431_v44 = vpop.eup %4430 }
 0xcd7   :  { %v4433_v62 = vpop.eup %4432  ;;  %v3786_v63 = vmul.f32 %v4431_v44, %v3776_v42 }
 0xcd8   :  { %v3787_v10 = vmul.f32 %v4433_v62, %v3777_v46  ;;  %v4435_v26 = vpop.eup %4434 }
 0xcd9   :  { %v3788_v15 = vadd.f32 %v3786_v63, %v3784_v41  ;;  %v4437_v11 = vpop.eup %4436  ;;  %v3774_v20 = vmul.f32 0.5, %v4435_v26 }
 0xcda   :  { %v3789_v58 = vadd.f32 %v3787_v10, %v3785_v39  ;;  %v3775_v28 = vmul.f32 0.5, %v4437_v11 }
 0xcdb   :  { %4438 = vtanh.f32 %v3788_v15  ;;  %v3780_v45 = vadd.f32 0.5, %v3774_v20 }
 0xcdc   :  { %4440 = vtanh.f32 %v3789_v58  ;;  %v3781_v56 = vadd.f32 0.5, %v3775_v28 }
 0xce5   :  { %v4439_v47 = vpop.eup %4438 }
 0xce6   :  { %v4441_v35 = vpop.eup %4440  ;;  %v3792_v21 = vmul.f32 %v4439_v47, %v3780_v45 }
 0xce7   :  { %v3793_v13 = vmul.f32 %v4441_v35, %v3781_v56 }
 0xce8   :  { %v3794_v7 = vpack.c.bf16 %v3792_v21, %v3792_v21 }
 0xce9   :  { %v3795_v33 = vpack.c.bf16 %v3793_v13, %v3793_v13 }
 0xceb   :  { %3963 = vmatprep.mubr.bf16.mxu0 %v3795_v33 }
 0xcec   :  { %3964 = vmatmul.mubr.bf16.vlgmr.msra.gmra.mrb[112].mxu0 %v3794_v7 }
 0xdbf   :  { %v4207_v34 = vpop.f32.mrb[112].mxu0 }
 0xdc0   :  { %v4208_v37 = vpop.f32.mrb[113].mxu0 }
 0xdc1   :  { %v4209_v19 = vadd.f32 %v4208_v37, %v4207_v34  ;;  %v4210_v1 = vpop.f32.mrb[114].mxu0 }
 0xdc2   :  { %v4211_v32 = vpop.f32.mrb[115].mxu0 }
 0xdc3   :  { %v3966_v0 = vadd.f32 %v4209_v19, %v4172_v16 }
 0xdc5   :  { %v3971_v30 = vmax.f32 %v3966_v0, 0.0 }
 0xdc7   :  { %v3979_v5 = vmul.f32 %v4189_v24, %v3971_v30 }
 0xdc9   :  { %3980 = vadd.xlane.f32.xlu0 %v3979_v5 }
 0xe56   :  { %v3981_v23 = vpop.xlane.xlu0 %3980 }
 0xe57   :  { %v3989_v3 = vadd.f32 %v4190_v9, %v3981_v23 }
 0xe59   :  { %3991 = vst.msk [vmem:[%s6859_s9] sm:$0xff] %vm3990_vm3, %v3989_v3 }
 0xe5a   :  { %3996 = vsyncpa [#allocation10], 1 }
 0xe5b   :  { %3997 = vsyncpa [#allocation12], 1 }
 0xe5c   :  { %3998 = vsyncpa [#allocation15], 1 }

</bundles_post_ra>
